<compile_context>
chip_gen: v5e
topology: v5e:2x2
jax: 0.10.0
libtpu: 0.0.40
codegen_flags: <defaults>
</compile_context>

<pallas_src>
import math

import jax
import jax.numpy as jnp
from jax import lax
from jax.experimental import pallas as pl
from jax.experimental.pallas import tpu as pltpu

S = 10            # fixed sequence length (AD slices x[:10]; mask is 10x10)
D_MODEL = 32
FC1 = 16          # hidden width of the first fc layer
D_FF = 2048       # nn.TransformerEncoderLayer default dim_feedforward
FF_CHUNK = 512    # feed-forward chunk along D_FF (keeps intermediates small)
ATT_SEQS = 16     # sequences per attention sub-block (160-row score matrices)
LN_EPS = 1e-5     # nn.LayerNorm default eps
NEG_INF = -1e30


def _layernorm(y, g, b):
    mu = jnp.mean(y, axis=-1, keepdims=True)
    var = jnp.mean((y - mu) ** 2, axis=-1, keepdims=True)
    return (y - mu) * lax.rsqrt(var + LN_EPS) * g + b


def positional_encoding():
    pos = jnp.arange(S, dtype=jnp.float32)[:, None]
    div = jnp.exp(jnp.arange(0, D_MODEL, 2, dtype=jnp.float32)
                  * (-math.log(10000.0) / D_MODEL))
    pe = jnp.zeros((S, D_MODEL), jnp.float32)
    pe = pe.at[:, 0::2].set(jnp.sin(pos * div))
    pe = pe.at[:, 1::2].set(jnp.cos(pos * div))
    return pe


# ----------------------------------------------------------------------------- kernel
def ad_kernel(x_ref, mask_ref, pe_ref, fcw1_ref, w32_ref, b32_ref,
              wqkv_ref, bqkv_ref, wf1_ref, bf1_ref, wf2_ref, aw3_ref, ab3_ref,
              out_ref):
    # b32 rows (f32): 0 fc_b1p, 1 fc_b2, 2 fc_b3, 3 bo, 4 ln1_g, 5 ln1_b, 6 bf2,
    #                 7 ln2_g, 8 ln2_b, 9 ab1, 10 ab2
    # w32 mats (bf16): 0 fc_w2p, 1 fc_w3, 2 aw1, 3 aw2
    rows = pe_ref.shape[0]
    att_rows = mask_ref.shape[0]
    bf16 = jnp.bfloat16

    def row(i):
        return b32_ref[i:i + 1, :]                    # (1, 32) f32 bias row

    def dot(a, w):                                    # bf16 x bf16 -> f32 MXU matmul
        return jnp.dot(a.astype(bf16), w, preferred_element_type=jnp.float32)

    x = x_ref[...]                                    # (rows, N_STATES)

    # --- TransAm.fc: Linear(N,16)+ReLU, Linear(16,32)+ReLU, Linear(32,32)+ReLU ---
    # (fc1 output / fc2 input are zero-padded to 32, so results are exact.)
    h = jnp.maximum(dot(x, fcw1_ref[...]) + row(0), 0.0)
    h = jnp.maximum(dot(h, w32_ref[0]) + row(1), 0.0)
    h = jnp.maximum(dot(h, w32_ref[1]) + row(2), 0.0)

    # --- PositionalEncoding (pre-tiled over the tile's sequences) ---
    h = h + pe_ref[...]

    # --- single-head self-attention: fused QKV, wo folded into V columns,
    #     1/sqrt(d_model) folded into Q columns, block-diagonal causal mask ---
    qkv = dot(h, wqkv_ref[...]) + bqkv_ref[...]       # (rows, 96) f32
    mask = mask_ref[...]

    parts = []
    for c in range(rows // att_rows):                 # attention sub-blocks
        sl = slice(c * att_rows, (c + 1) * att_rows)
        q = qkv[sl, 0:D_MODEL].astype(bf16)
        k = qkv[sl, D_MODEL:2 * D_MODEL].astype(bf16)
        v = qkv[sl, 2 * D_MODEL:3 * D_MODEL].astype(bf16)   # already includes @ wo
        s = jnp.einsum('qd,kd->qk', q, k,
                       preferred_element_type=jnp.float32) + mask
        s = s - jnp.max(s, axis=-1, keepdims=True)
        e = jnp.exp(s)
        p = e * pl.reciprocal(jnp.sum(e, axis=-1, keepdims=True), approx=True)
        parts.append(jnp.dot(p.astype(bf16), v, preferred_element_type=jnp.float32))
    attn_out = (parts[0] if len(parts) == 1
                else jnp.concatenate(parts, axis=0)) + row(3)

    # --- add & norm 1 (post-norm TransformerEncoderLayer) ---
    h = _layernorm(h + attn_out, row(4), row(5))

    # --- feed-forward, chunked over D_FF: bf16 weights/activations, f32 accumulation ---
    h_bf = h.astype(bf16)
    ff = None
    for c in range(D_FF // FF_CHUNK):
        lo, hi = c * FF_CHUNK, (c + 1) * FF_CHUNK
        a1 = jnp.dot(h_bf, wf1_ref[:, lo:hi], preferred_element_type=jnp.float32)
        a1 = jnp.maximum(a1 + bf1_ref[:, lo:hi], 0.0)
        part = jnp.dot(a1.astype(bf16), wf2_ref[lo:hi, :],
                       preferred_element_type=jnp.float32)
        ff = part if ff is None else ff + part
    ff = ff + row(6)

    # --- add & norm 2 ---
    h = _layernorm(h + ff, row(7), row(8))

    # --- AdOut head: Linear+ReLU, Linear+ReLU, Linear(32, N_STATES padded to 128) ---
    a = jnp.maximum(dot(h, w32_ref[2]) + row(9), 0.0)
    a = jnp.maximum(dot(a, w32_ref[3]) + row(10), 0.0)
    out_ref[...] = dot(a, aw3_ref[...]) + ab3_ref[...]


# ----------------------------------------------------------------------------- params
def init_raw_params(key, n_states):
    """Raw (PyTorch-shaped, transposed to (in,out)) f32 parameters."""
    it = iter(jax.random.split(key, 32))

    def w(shape):
        return 0.1 * jax.random.normal(next(it), shape, dtype=jnp.float32)

    def b(n):
        return 0.1 * jax.random.normal(next(it), (n,), dtype=jnp.float32)

    return dict(
        fc_w1=w((n_states, FC1)), fc_b1=b(FC1),
        fc_w2=w((FC1, D_MODEL)), fc_b2=b(D_MODEL),
        fc_w3=w((D_MODEL, D_MODEL)), fc_b3=b(D_MODEL),
        wq=w((D_MODEL, D_MODEL)), bq=b(D_MODEL),
        wk=w((D_MODEL, D_MODEL)), bk=b(D_MODEL),
        wv=w((D_MODEL, D_MODEL)), bv=b(D_MODEL),
        wo=w((D_MODEL, D_MODEL)), bo=b(D_MODEL),
        ln1_g=jnp.ones((D_MODEL,), jnp.float32),
        ln1_b=jnp.zeros((D_MODEL,), jnp.float32),
        wf1=w((D_MODEL, D_FF)), bf1=b(D_FF),
        wf2=w((D_FF, D_MODEL)), bf2=b(D_MODEL),
        ln2_g=jnp.ones((D_MODEL,), jnp.float32),
        ln2_b=jnp.zeros((D_MODEL,), jnp.float32),
        aw1=w((D_MODEL, D_MODEL)), ab1=b(D_MODEL),
        aw2=w((D_MODEL, D_MODEL)), ab2=b(D_MODEL),
        aw3=w((D_MODEL, n_states)), ab3=b(n_states),
    )


def pack_params(raw, n_states):
    """Pack 29 small tensors into 11 kernel arrays (mask/pe are built in the wrapper)."""
    scale = 1.0 / math.sqrt(D_MODEL)
    bf16 = jnp.bfloat16

    fc_w1p = jnp.zeros((n_states, D_MODEL), jnp.float32).at[:, :FC1].set(raw['fc_w1'])
    fc_b1p = jnp.zeros((D_MODEL,), jnp.float32).at[:FC1].set(raw['fc_b1'])
    fc_w2p = jnp.zeros((D_MODEL, D_MODEL), jnp.float32).at[:FC1, :].set(raw['fc_w2'])

    w32 = jnp.stack([fc_w2p, raw['fc_w3'], raw['aw1'], raw['aw2']]).astype(bf16)
    b32 = jnp.stack([fc_b1p, raw['fc_b2'], raw['fc_b3'], raw['bo'],
                     raw['ln1_g'], raw['ln1_b'], raw['bf2'],
                     raw['ln2_g'], raw['ln2_b'], raw['ab1'], raw['ab2']])

    # Fold the attention output projection into V:  (attn @ (h@wv+bv)) @ wo + bo
    #   == attn @ (h @ (wv@wo) + bv@wo) + bo   (softmax rows sum to ~1).
    wv_o = raw['wv'] @ raw['wo']
    bv_o = raw['bv'] @ raw['wo']
    wqkv = jnp.concatenate([raw['wq'] * scale, raw['wk'], wv_o], axis=1).astype(bf16)
    bqkv = jnp.concatenate([raw['bq'] * scale, raw['bk'], bv_o])[None, :]

    n_out_pad = ((n_states + 127) // 128) * 128
    aw3p = jnp.zeros((D_MODEL, n_out_pad), jnp.float32).at[:, :n_states].set(raw['aw3'])
    ab3p = jnp.zeros((1, n_out_pad), jnp.float32).at[0, :n_states].set(raw['ab3'])

    return dict(fc_w1p=fc_w1p.astype(bf16), w32=w32, b32=b32, wqkv=wqkv, bqkv=bqkv,
                wf1=raw['wf1'].astype(bf16),
                bf1=raw['bf1'][None, :],
                wf2=raw['wf2'].astype(bf16),
                aw3p=aw3p.astype(bf16), ab3p=ab3p)


# ----------------------------------------------------------------------------- wrapper
def _choose_b_tile(B):
    """Largest tile from {32,16,8} that still leaves >=2 grid steps (v7x dual-TC);
    tiny batches fall back to a single 8-sequence tile."""
    for t in (32, 16, 8):
        if B >= 2 * t:
            return t
    return 8


def ad_forward(x, kp):
    """x: (L, B, N_STATES) PyTorch transformer layout. Returns {'ad': (10, B, N_STATES)}."""
    x = x[:S].astype(jnp.float32)                  # AD.forward: x.float(); encoder(x[:10])
    _, B, n_states = x.shape
    xb = jnp.transpose(x, (1, 0, 2))               # (B, S, N_STATES)

    b_tile = _choose_b_tile(B)
    rows = b_tile * S
    att_rows = min(b_tile, ATT_SEQS) * S           # attention sub-block row count

    B_pad = ((B + b_tile - 1) // b_tile) * b_tile  # pad batch to a whole tile
    if B_pad != B:
        xb = jnp.pad(xb, ((0, B_pad - B), (0, 0), (0, 0)))
    x_flat = xb.reshape(B_pad * S, n_states)       # rows = b*S + s

    # block-diagonal causal additive mask for one attention sub-block
    r = jnp.arange(att_rows)
    same_seq = (r[:, None] // S) == (r[None, :] // S)
    causal = (r[None, :] % S) <= (r[:, None] % S)
    mask = jnp.where(same_seq & causal, 0.0, NEG_INF).astype(jnp.float32)
    pe_tiled = jnp.tile(positional_encoding(), (b_tile, 1))   # (rows, 32)

    n_out_pad = kp['aw3p'].shape[1]
    consts = [mask, pe_tiled, kp['fc_w1p'], kp['w32'], kp['b32'], kp['wqkv'],
              kp['bqkv'], kp['wf1'], kp['bf1'], kp['wf2'], kp['aw3p'], kp['ab3p']]
    const_specs = [pl.BlockSpec(c.shape, (lambda b, _nd=c.ndim: (0,) * _nd))
                   for c in consts]

    out_flat = pl.pallas_call(
        ad_kernel,
        grid=(B_pad // b_tile,),
        in_specs=[pl.BlockSpec((rows, n_states), lambda b: (b, 0))] + const_specs,
        out_specs=pl.BlockSpec((rows, n_out_pad), lambda b: (b, 0)),
        out_shape=jax.ShapeDtypeStruct((B_pad * S, n_out_pad), jnp.float32),
        compiler_params=pltpu.CompilerParams(
            dimension_semantics=("parallel",)),        # batch tiles shard across cores
    )(x_flat, *consts)

    out = out_flat.reshape(B_pad, S, n_out_pad)[:B, :, :n_states]
    return {'ad': jnp.transpose(out, (1, 0, 2))}       # back to (S, B, N_STATES)


# ----------------------------------------------------------------------------- reference
def ref_forward(x, raw):
    """Pure-JAX f32 reference of AD.forward (eval mode), layout (S, B, N_STATES)."""
    relu = lambda t: jnp.maximum(t, 0.0)
    x = x[:S].astype(jnp.float32)
    h = relu(x @ raw['fc_w1'] + raw['fc_b1'])
    h = relu(h @ raw['fc_w2'] + raw['fc_b2'])
    h = relu(h @ raw['fc_w3'] + raw['fc_b3'])
    h = h + positional_encoding()[:, None, :]

    q = h @ raw['wq'] + raw['bq']
    k = h @ raw['wk'] + raw['bk']
    v = h @ raw['wv'] + raw['bv']
    scores = jnp.einsum('qbd,kbd->bqk', q, k) / math.sqrt(D_MODEL)
    causal = jnp.where(jnp.arange(S)[None, :] <= jnp.arange(S)[:, None], 0.0, NEG_INF)
    attn = jax.nn.softmax(scores + causal[None], axis=-1)
    ctx = jnp.einsum('bqk,kbd->qbd', attn, v)
    attn_out = ctx @ raw['wo'] + raw['bo']

    h = _layernorm(h + attn_out, raw['ln1_g'], raw['ln1_b'])
    ff = relu(h @ raw['wf1'] + raw['bf1'])
    ff = ff @ raw['wf2'] + raw['bf2']
    h = _layernorm(h + ff, raw['ln2_g'], raw['ln2_b'])

    a = relu(h @ raw['aw1'] + raw['ab1'])
    a = relu(a @ raw['aw2'] + raw['ab2'])
    return a @ raw['aw3'] + raw['ab3']


if __name__ == "__main__":
    key = jax.random.PRNGKey(0)
    kx, kp = jax.random.split(key)

    N_STATES = 8
    B = 4
    L = 12   # sliced to 10 inside ad_forward, as AD.forward does

    x = jax.random.normal(kx, (L, B, N_STATES), dtype=jnp.float32)
    raw = init_raw_params(kp, N_STATES)
    packed = pack_params(raw, N_STATES)

    out = jax.jit(ad_forward)(x, packed)
    jax.block_until_ready(out['ad'])
    assert out['ad'].shape == (S, B, N_STATES)

    # loose tolerance: all weights in bf16 + approx softmax reciprocal + wo folding
    ref = ref_forward(x, raw)
    max_err = float(jnp.max(jnp.abs(out['ad'] - ref)))
    assert max_err < 1.5e-1, f"max abs err vs reference: {max_err}"

    print("KERNEL_OK")
</pallas_src>

<mosaic_0001>
module attributes {stable_mosaic.version = 11 : i64} {
  func.func @ad_kernel(%arg0: i32, %arg1: memref<80x8xf32, #tpu.memory_space<vmem>>, %arg2: memref<80x80xf32, #tpu.memory_space<vmem>>, %arg3: memref<80x32xf32, #tpu.memory_space<vmem>>, %arg4: memref<8x32xbf16, #tpu.memory_space<vmem>>, %arg5: memref<4x32x32xbf16, #tpu.memory_space<vmem>>, %arg6: memref<11x32xf32, #tpu.memory_space<vmem>>, %arg7: memref<32x96xbf16, #tpu.memory_space<vmem>>, %arg8: memref<1x96xf32, #tpu.memory_space<vmem>>, %arg9: memref<32x2048xbf16, #tpu.memory_space<vmem>>, %arg10: memref<1x2048xf32, #tpu.memory_space<vmem>>, %arg11: memref<2048x32xbf16, #tpu.memory_space<vmem>>, %arg12: memref<32x128xbf16, #tpu.memory_space<vmem>>, %arg13: memref<1x128xf32, #tpu.memory_space<vmem>>, %arg14: memref<80x128xf32, #tpu.memory_space<vmem>>) attributes {dimension_semantics = [#tpu.dimension_semantics<parallel>], iteration_bounds = array<i64: 1>, scalar_prefetch = 0 : i64, scratch_operands = 0 : i64, tpu.core_type = #tpu.core_type<tc>, window_params = [{transform_indices = @transform_0, window_bounds = array<i64: 80, 8>}, {pipeline_mode = #tpu.pipeline_mode<synchronous>, transform_indices = @transform_1, window_bounds = array<i64: 80, 80>}, {pipeline_mode = #tpu.pipeline_mode<synchronous>, transform_indices = @transform_2, window_bounds = array<i64: 80, 32>}, {pipeline_mode = #tpu.pipeline_mode<synchronous>, transform_indices = @transform_3, window_bounds = array<i64: 8, 32>}, {pipeline_mode = #tpu.pipeline_mode<synchronous>, transform_indices = @transform_4, window_bounds = array<i64: 4, 32, 32>}, {pipeline_mode = #tpu.pipeline_mode<synchronous>, transform_indices = @transform_5, window_bounds = array<i64: 11, 32>}, {pipeline_mode = #tpu.pipeline_mode<synchronous>, transform_indices = @transform_6, window_bounds = array<i64: 32, 96>}, {pipeline_mode = #tpu.pipeline_mode<synchronous>, transform_indices = @transform_7, window_bounds = array<i64: 1, 96>}, {pipeline_mode = #tpu.pipeline_mode<synchronous>, transform_indices = @transform_8, window_bounds = array<i64: 32, 2048>}, {pipeline_mode = #tpu.pipeline_mode<synchronous>, transform_indices = @transform_9, window_bounds = array<i64: 1, 2048>}, {pipeline_mode = #tpu.pipeline_mode<synchronous>, transform_indices = @transform_10, window_bounds = array<i64: 2048, 32>}, {pipeline_mode = #tpu.pipeline_mode<synchronous>, transform_indices = @transform_11, window_bounds = array<i64: 32, 128>}, {pipeline_mode = #tpu.pipeline_mode<synchronous>, transform_indices = @transform_12, window_bounds = array<i64: 1, 128>}, {transform_indices = @transform_13, window_bounds = array<i64: 80, 128>}]} {
    %c0 = arith.constant 0 : index
    %c0_0 = arith.constant 0 : index
    %0 = vector.load %arg1[%c0, %c0_0] : memref<80x8xf32, #tpu.memory_space<vmem>>, vector<80x8xf32>
    %c0_1 = arith.constant 0 : index
    %c0_2 = arith.constant 0 : index
    %1 = vector.load %arg4[%c0_1, %c0_2] : memref<8x32xbf16, #tpu.memory_space<vmem>>, vector<8x32xbf16>
    %2 = arith.truncf %0 : vector<80x8xf32> to vector<80x8xbf16>
    %cst = arith.constant dense<0.000000e+00> : vector<80x32xf32>
    %3 = tpu.matmul %2, %1, %cst {dimension_numbers = #tpu.dot_dimension_numbers<[1], [0], [0], [1], [0, 0, 1, 1], [], []>} : vector<80x8xbf16>, vector<8x32xbf16>, vector<80x32xf32> -> vector<80x32xf32>
    %c0_3 = arith.constant 0 : index
    %c0_4 = arith.constant 0 : index
    %4 = vector.load %arg6[%c0_3, %c0_4] : memref<11x32xf32, #tpu.memory_space<vmem>>, vector<1x32xf32>
    %5 = vector.broadcast %4 : vector<1x32xf32> to vector<80x32xf32>
    %6 = arith.addf %3, %5 : vector<80x32xf32>
    %cst_5 = arith.constant 0.000000e+00 : f32
    %7 = vector.broadcast %cst_5 : f32 to vector<80x32xf32>
    %8 = arith.maximumf %6, %7 : vector<80x32xf32>
    %c0_6 = arith.constant 0 : index
    %c0_7 = arith.constant 0 : index
    %c0_8 = arith.constant 0 : index
    %9 = vector.load %arg5[%c0_6, %c0_7, %c0_8] : memref<4x32x32xbf16, #tpu.memory_space<vmem>>, vector<1x32x32xbf16>
    %10 = vector.shape_cast %9 : vector<1x32x32xbf16> to vector<32x32xbf16>
    %11 = arith.truncf %8 : vector<80x32xf32> to vector<80x32xbf16>
    %cst_9 = arith.constant dense<0.000000e+00> : vector<80x32xf32>
    %12 = tpu.matmul %11, %10, %cst_9 {dimension_numbers = #tpu.dot_dimension_numbers<[1], [0], [0], [1], [0, 0, 1, 1], [], []>} : vector<80x32xbf16>, vector<32x32xbf16>, vector<80x32xf32> -> vector<80x32xf32>
    %c1 = arith.constant 1 : index
    %c0_10 = arith.constant 0 : index
    %13 = vector.load %arg6[%c1, %c0_10] : memref<11x32xf32, #tpu.memory_space<vmem>>, vector<1x32xf32>
    %14 = vector.broadcast %13 : vector<1x32xf32> to vector<80x32xf32>
    %15 = arith.addf %12, %14 : vector<80x32xf32>
    %cst_11 = arith.constant 0.000000e+00 : f32
    %16 = vector.broadcast %cst_11 : f32 to vector<80x32xf32>
    %17 = arith.maximumf %15, %16 : vector<80x32xf32>
    %c1_12 = arith.constant 1 : index
    %c0_13 = arith.constant 0 : index
    %c0_14 = arith.constant 0 : index
    %18 = vector.load %arg5[%c1_12, %c0_13, %c0_14] : memref<4x32x32xbf16, #tpu.memory_space<vmem>>, vector<1x32x32xbf16>
    %19 = vector.shape_cast %18 : vector<1x32x32xbf16> to vector<32x32xbf16>
    %20 = arith.truncf %17 : vector<80x32xf32> to vector<80x32xbf16>
    %cst_15 = arith.constant dense<0.000000e+00> : vector<80x32xf32>
    %21 = tpu.matmul %20, %19, %cst_15 {dimension_numbers = #tpu.dot_dimension_numbers<[1], [0], [0], [1], [0, 0, 1, 1], [], []>} : vector<80x32xbf16>, vector<32x32xbf16>, vector<80x32xf32> -> vector<80x32xf32>
    %c2 = arith.constant 2 : index
    %c0_16 = arith.constant 0 : index
    %22 = vector.load %arg6[%c2, %c0_16] : memref<11x32xf32, #tpu.memory_space<vmem>>, vector<1x32xf32>
    %23 = vector.broadcast %22 : vector<1x32xf32> to vector<80x32xf32>
    %24 = arith.addf %21, %23 : vector<80x32xf32>
    %cst_17 = arith.constant 0.000000e+00 : f32
    %25 = vector.broadcast %cst_17 : f32 to vector<80x32xf32>
    %26 = arith.maximumf %24, %25 : vector<80x32xf32>
    %c0_18 = arith.constant 0 : index
    %c0_19 = arith.constant 0 : index
    %27 = vector.load %arg3[%c0_18, %c0_19] : memref<80x32xf32, #tpu.memory_space<vmem>>, vector<80x32xf32>
    %28 = arith.addf %26, %27 : vector<80x32xf32>
    %c0_20 = arith.constant 0 : index
    %c0_21 = arith.constant 0 : index
    %29 = vector.load %arg7[%c0_20, %c0_21] : memref<32x96xbf16, #tpu.memory_space<vmem>>, vector<32x96xbf16>
    %30 = arith.truncf %28 : vector<80x32xf32> to vector<80x32xbf16>
    %cst_22 = arith.constant dense<0.000000e+00> : vector<80x96xf32>
    %31 = tpu.matmul %30, %29, %cst_22 {dimension_numbers = #tpu.dot_dimension_numbers<[1], [0], [0], [1], [0, 0, 1, 1], [], []>} : vector<80x32xbf16>, vector<32x96xbf16>, vector<80x96xf32> -> vector<80x96xf32>
    %c0_23 = arith.constant 0 : index
    %c0_24 = arith.constant 0 : index
    %32 = vector.load %arg8[%c0_23, %c0_24] : memref<1x96xf32, #tpu.memory_space<vmem>>, vector<1x96xf32>
    %33 = vector.broadcast %32 : vector<1x96xf32> to vector<80x96xf32>
    %34 = arith.addf %31, %33 : vector<80x96xf32>
    %c0_25 = arith.constant 0 : index
    %c0_26 = arith.constant 0 : index
    %35 = vector.load %arg2[%c0_25, %c0_26] : memref<80x80xf32, #tpu.memory_space<vmem>>, vector<80x80xf32>
    %36 = vector.extract_strided_slice %34 {offsets = [0, 0], sizes = [80, 32], strides = [1, 1]} : vector<80x96xf32> to vector<80x32xf32>
    %37 = arith.truncf %36 : vector<80x32xf32> to vector<80x32xbf16>
    %38 = vector.extract_strided_slice %34 {offsets = [0, 32], sizes = [80, 32], strides = [1, 1]} : vector<80x96xf32> to vector<80x32xf32>
    %39 = arith.truncf %38 : vector<80x32xf32> to vector<80x32xbf16>
    %40 = vector.extract_strided_slice %34 {offsets = [0, 64], sizes = [80, 32], strides = [1, 1]} : vector<80x96xf32> to vector<80x32xf32>
    %41 = arith.truncf %40 : vector<80x32xf32> to vector<80x32xbf16>
    "tpu.trace_start"() <{level = 10 : i32, message = "qd,kd->qk"}> : () -> ()
    %cst_27 = arith.constant dense<0.000000e+00> : vector<80x80xf32>
    %42 = tpu.matmul %37, %39, %cst_27 {dimension_numbers = #tpu.dot_dimension_numbers<[1], [1], [0], [0], [0, 0, 1, 0], [], []>} : vector<80x32xbf16>, vector<80x32xbf16>, vector<80x80xf32> -> vector<80x80xf32>
    "tpu.trace_stop"() : () -> ()
    %43 = arith.addf %42, %35 : vector<80x80xf32>
    %cst_28 = arith.constant dense<0xFF800000> : vector<80xf32>
    %44 = vector.multi_reduction <maximumf>, %43, %cst_28 [1] : vector<80x80xf32> to vector<80xf32>
    %45 = vector.shape_cast %44 : vector<80xf32> to vector<80x1xf32>
    %46 = vector.broadcast %45 : vector<80x1xf32> to vector<80x80xf32>
    %47 = arith.subf %43, %46 : vector<80x80xf32>
    %48 = math.exp %47 : vector<80x80xf32>
    %cst_29 = arith.constant dense<0.000000e+00> : vector<80xf32>
    %49 = vector.multi_reduction <add>, %48, %cst_29 [1] : vector<80x80xf32> to vector<80xf32>
    %50 = vector.shape_cast %49 : vector<80xf32> to vector<80x1xf32>
    %51 = tpu.reciprocal %50 {approx = true} : vector<80x1xf32> -> vector<80x1xf32>
    %52 = vector.broadcast %51 : vector<80x1xf32> to vector<80x80xf32>
    %53 = arith.mulf %48, %52 : vector<80x80xf32>
    %54 = arith.truncf %53 : vector<80x80xf32> to vector<80x80xbf16>
    %cst_30 = arith.constant dense<0.000000e+00> : vector<80x32xf32>
    %55 = tpu.matmul %54, %41, %cst_30 {dimension_numbers = #tpu.dot_dimension_numbers<[1], [0], [0], [1], [0, 0, 1, 1], [], []>} : vector<80x80xbf16>, vector<80x32xbf16>, vector<80x32xf32> -> vector<80x32xf32>
    %c3 = arith.constant 3 : index
    %c0_31 = arith.constant 0 : index
    %56 = vector.load %arg6[%c3, %c0_31] : memref<11x32xf32, #tpu.memory_space<vmem>>, vector<1x32xf32>
    %57 = vector.broadcast %56 : vector<1x32xf32> to vector<80x32xf32>
    %58 = arith.addf %55, %57 : vector<80x32xf32>
    %59 = arith.addf %28, %58 : vector<80x32xf32>
    %c4 = arith.constant 4 : index
    %c0_32 = arith.constant 0 : index
    %60 = vector.load %arg6[%c4, %c0_32] : memref<11x32xf32, #tpu.memory_space<vmem>>, vector<1x32xf32>
    %c5 = arith.constant 5 : index
    %c0_33 = arith.constant 0 : index
    %61 = vector.load %arg6[%c5, %c0_33] : memref<11x32xf32, #tpu.memory_space<vmem>>, vector<1x32xf32>
    %cst_34 = arith.constant dense<0.000000e+00> : vector<80xf32>
    %62 = vector.multi_reduction <add>, %59, %cst_34 [1] : vector<80x32xf32> to vector<80xf32>
    %63 = vector.shape_cast %62 : vector<80xf32> to vector<80x1xf32>
    %cst_35 = arith.constant 3.200000e+01 : f32
    %64 = vector.broadcast %cst_35 : f32 to vector<80x1xf32>
    %65 = arith.divf %63, %64 : vector<80x1xf32>
    %66 = vector.broadcast %65 : vector<80x1xf32> to vector<80x32xf32>
    %67 = arith.subf %59, %66 : vector<80x32xf32>
    %68 = arith.mulf %67, %67 : vector<80x32xf32>
    %cst_36 = arith.constant dense<0.000000e+00> : vector<80xf32>
    %69 = vector.multi_reduction <add>, %68, %cst_36 [1] : vector<80x32xf32> to vector<80xf32>
    %70 = vector.shape_cast %69 : vector<80xf32> to vector<80x1xf32>
    %cst_37 = arith.constant 3.200000e+01 : f32
    %71 = vector.broadcast %cst_37 : f32 to vector<80x1xf32>
    %72 = arith.divf %70, %71 : vector<80x1xf32>
    %73 = vector.broadcast %65 : vector<80x1xf32> to vector<80x32xf32>
    %74 = arith.subf %59, %73 : vector<80x32xf32>
    %cst_38 = arith.constant 9.99999974E-6 : f32
    %75 = vector.broadcast %cst_38 : f32 to vector<80x1xf32>
    %76 = arith.addf %72, %75 : vector<80x1xf32>
    %77 = math.rsqrt %76 : vector<80x1xf32>
    %78 = vector.broadcast %77 : vector<80x1xf32> to vector<80x32xf32>
    %79 = arith.mulf %74, %78 : vector<80x32xf32>
    %80 = vector.broadcast %60 : vector<1x32xf32> to vector<80x32xf32>
    %81 = arith.mulf %79, %80 : vector<80x32xf32>
    %82 = vector.broadcast %61 : vector<1x32xf32> to vector<80x32xf32>
    %83 = arith.addf %81, %82 : vector<80x32xf32>
    %84 = arith.truncf %83 : vector<80x32xf32> to vector<80x32xbf16>
    %c0_39 = arith.constant 0 : index
    %c0_40 = arith.constant 0 : index
    %85 = vector.load %arg9[%c0_39, %c0_40] : memref<32x2048xbf16, #tpu.memory_space<vmem>>, vector<32x512xbf16>
    %cst_41 = arith.constant dense<0.000000e+00> : vector<80x512xf32>
    %86 = tpu.matmul %84, %85, %cst_41 {dimension_numbers = #tpu.dot_dimension_numbers<[1], [0], [0], [1], [0, 0, 1, 1], [], []>} : vector<80x32xbf16>, vector<32x512xbf16>, vector<80x512xf32> -> vector<80x512xf32>
    %c0_42 = arith.constant 0 : index
    %c0_43 = arith.constant 0 : index
    %87 = vector.load %arg10[%c0_42, %c0_43] : memref<1x2048xf32, #tpu.memory_space<vmem>>, vector<1x512xf32>
    %88 = vector.broadcast %87 : vector<1x512xf32> to vector<80x512xf32>
    %89 = arith.addf %86, %88 : vector<80x512xf32>
    %cst_44 = arith.constant 0.000000e+00 : f32
    %90 = vector.broadcast %cst_44 : f32 to vector<80x512xf32>
    %91 = arith.maximumf %89, %90 : vector<80x512xf32>
    %92 = arith.truncf %91 : vector<80x512xf32> to vector<80x512xbf16>
    %c0_45 = arith.constant 0 : index
    %c0_46 = arith.constant 0 : index
    %93 = vector.load %arg11[%c0_45, %c0_46] : memref<2048x32xbf16, #tpu.memory_space<vmem>>, vector<512x32xbf16>
    %cst_47 = arith.constant dense<0.000000e+00> : vector<80x32xf32>
    %94 = tpu.matmul %92, %93, %cst_47 {dimension_numbers = #tpu.dot_dimension_numbers<[1], [0], [0], [1], [0, 0, 1, 1], [], []>} : vector<80x512xbf16>, vector<512x32xbf16>, vector<80x32xf32> -> vector<80x32xf32>
    %c0_48 = arith.constant 0 : index
    %c512 = arith.constant 512 : index
    %95 = vector.load %arg9[%c0_48, %c512] : memref<32x2048xbf16, #tpu.memory_space<vmem>>, vector<32x512xbf16>
    %cst_49 = arith.constant dense<0.000000e+00> : vector<80x512xf32>
    %96 = tpu.matmul %84, %95, %cst_49 {dimension_numbers = #tpu.dot_dimension_numbers<[1], [0], [0], [1], [0, 0, 1, 1], [], []>} : vector<80x32xbf16>, vector<32x512xbf16>, vector<80x512xf32> -> vector<80x512xf32>
    %c0_50 = arith.constant 0 : index
    %c512_51 = arith.constant 512 : index
    %97 = vector.load %arg10[%c0_50, %c512_51] : memref<1x2048xf32, #tpu.memory_space<vmem>>, vector<1x512xf32>
    %98 = vector.broadcast %97 : vector<1x512xf32> to vector<80x512xf32>
    %99 = arith.addf %96, %98 : vector<80x512xf32>
    %cst_52 = arith.constant 0.000000e+00 : f32
    %100 = vector.broadcast %cst_52 : f32 to vector<80x512xf32>
    %101 = arith.maximumf %99, %100 : vector<80x512xf32>
    %102 = arith.truncf %101 : vector<80x512xf32> to vector<80x512xbf16>
    %c512_53 = arith.constant 512 : index
    %c0_54 = arith.constant 0 : index
    %103 = vector.load %arg11[%c512_53, %c0_54] : memref<2048x32xbf16, #tpu.memory_space<vmem>>, vector<512x32xbf16>
    %cst_55 = arith.constant dense<0.000000e+00> : vector<80x32xf32>
    %104 = tpu.matmul %102, %103, %cst_55 {dimension_numbers = #tpu.dot_dimension_numbers<[1], [0], [0], [1], [0, 0, 1, 1], [], []>} : vector<80x512xbf16>, vector<512x32xbf16>, vector<80x32xf32> -> vector<80x32xf32>
    %105 = arith.addf %94, %104 : vector<80x32xf32>
    %c0_56 = arith.constant 0 : index
    %c1024 = arith.constant 1024 : index
    %106 = vector.load %arg9[%c0_56, %c1024] : memref<32x2048xbf16, #tpu.memory_space<vmem>>, vector<32x512xbf16>
    %cst_57 = arith.constant dense<0.000000e+00> : vector<80x512xf32>
    %107 = tpu.matmul %84, %106, %cst_57 {dimension_numbers = #tpu.dot_dimension_numbers<[1], [0], [0], [1], [0, 0, 1, 1], [], []>} : vector<80x32xbf16>, vector<32x512xbf16>, vector<80x512xf32> -> vector<80x512xf32>
    %c0_58 = arith.constant 0 : index
    %c1024_59 = arith.constant 1024 : index
    %108 = vector.load %arg10[%c0_58, %c1024_59] : memref<1x2048xf32, #tpu.memory_space<vmem>>, vector<1x512xf32>
    %109 = vector.broadcast %108 : vector<1x512xf32> to vector<80x512xf32>
    %110 = arith.addf %107, %109 : vector<80x512xf32>
    %cst_60 = arith.constant 0.000000e+00 : f32
    %111 = vector.broadcast %cst_60 : f32 to vector<80x512xf32>
    %112 = arith.maximumf %110, %111 : vector<80x512xf32>
    %113 = arith.truncf %112 : vector<80x512xf32> to vector<80x512xbf16>
    %c1024_61 = arith.constant 1024 : index
    %c0_62 = arith.constant 0 : index
    %114 = vector.load %arg11[%c1024_61, %c0_62] : memref<2048x32xbf16, #tpu.memory_space<vmem>>, vector<512x32xbf16>
    %cst_63 = arith.constant dense<0.000000e+00> : vector<80x32xf32>
    %115 = tpu.matmul %113, %114, %cst_63 {dimension_numbers = #tpu.dot_dimension_numbers<[1], [0], [0], [1], [0, 0, 1, 1], [], []>} : vector<80x512xbf16>, vector<512x32xbf16>, vector<80x32xf32> -> vector<80x32xf32>
    %116 = arith.addf %105, %115 : vector<80x32xf32>
    %c0_64 = arith.constant 0 : index
    %c1536 = arith.constant 1536 : index
    %117 = vector.load %arg9[%c0_64, %c1536] : memref<32x2048xbf16, #tpu.memory_space<vmem>>, vector<32x512xbf16>
    %cst_65 = arith.constant dense<0.000000e+00> : vector<80x512xf32>
    %118 = tpu.matmul %84, %117, %cst_65 {dimension_numbers = #tpu.dot_dimension_numbers<[1], [0], [0], [1], [0, 0, 1, 1], [], []>} : vector<80x32xbf16>, vector<32x512xbf16>, vector<80x512xf32> -> vector<80x512xf32>
    %c0_66 = arith.constant 0 : index
    %c1536_67 = arith.constant 1536 : index
    %119 = vector.load %arg10[%c0_66, %c1536_67] : memref<1x2048xf32, #tpu.memory_space<vmem>>, vector<1x512xf32>
    %120 = vector.broadcast %119 : vector<1x512xf32> to vector<80x512xf32>
    %121 = arith.addf %118, %120 : vector<80x512xf32>
    %cst_68 = arith.constant 0.000000e+00 : f32
    %122 = vector.broadcast %cst_68 : f32 to vector<80x512xf32>
    %123 = arith.maximumf %121, %122 : vector<80x512xf32>
    %124 = arith.truncf %123 : vector<80x512xf32> to vector<80x512xbf16>
    %c1536_69 = arith.constant 1536 : index
    %c0_70 = arith.constant 0 : index
    %125 = vector.load %arg11[%c1536_69, %c0_70] : memref<2048x32xbf16, #tpu.memory_space<vmem>>, vector<512x32xbf16>
    %cst_71 = arith.constant dense<0.000000e+00> : vector<80x32xf32>
    %126 = tpu.matmul %124, %125, %cst_71 {dimension_numbers = #tpu.dot_dimension_numbers<[1], [0], [0], [1], [0, 0, 1, 1], [], []>} : vector<80x512xbf16>, vector<512x32xbf16>, vector<80x32xf32> -> vector<80x32xf32>
    %127 = arith.addf %116, %126 : vector<80x32xf32>
    %c6 = arith.constant 6 : index
    %c0_72 = arith.constant 0 : index
    %128 = vector.load %arg6[%c6, %c0_72] : memref<11x32xf32, #tpu.memory_space<vmem>>, vector<1x32xf32>
    %129 = vector.broadcast %128 : vector<1x32xf32> to vector<80x32xf32>
    %130 = arith.addf %127, %129 : vector<80x32xf32>
    %131 = arith.addf %83, %130 : vector<80x32xf32>
    %c7 = arith.constant 7 : index
    %c0_73 = arith.constant 0 : index
    %132 = vector.load %arg6[%c7, %c0_73] : memref<11x32xf32, #tpu.memory_space<vmem>>, vector<1x32xf32>
    %c8 = arith.constant 8 : index
    %c0_74 = arith.constant 0 : index
    %133 = vector.load %arg6[%c8, %c0_74] : memref<11x32xf32, #tpu.memory_space<vmem>>, vector<1x32xf32>
    %cst_75 = arith.constant dense<0.000000e+00> : vector<80xf32>
    %134 = vector.multi_reduction <add>, %131, %cst_75 [1] : vector<80x32xf32> to vector<80xf32>
    %135 = vector.shape_cast %134 : vector<80xf32> to vector<80x1xf32>
    %cst_76 = arith.constant 3.200000e+01 : f32
    %136 = vector.broadcast %cst_76 : f32 to vector<80x1xf32>
    %137 = arith.divf %135, %136 : vector<80x1xf32>
    %138 = vector.broadcast %137 : vector<80x1xf32> to vector<80x32xf32>
    %139 = arith.subf %131, %138 : vector<80x32xf32>
    %140 = arith.mulf %139, %139 : vector<80x32xf32>
    %cst_77 = arith.constant dense<0.000000e+00> : vector<80xf32>
    %141 = vector.multi_reduction <add>, %140, %cst_77 [1] : vector<80x32xf32> to vector<80xf32>
    %142 = vector.shape_cast %141 : vector<80xf32> to vector<80x1xf32>
    %cst_78 = arith.constant 3.200000e+01 : f32
    %143 = vector.broadcast %cst_78 : f32 to vector<80x1xf32>
    %144 = arith.divf %142, %143 : vector<80x1xf32>
    %145 = vector.broadcast %137 : vector<80x1xf32> to vector<80x32xf32>
    %146 = arith.subf %131, %145 : vector<80x32xf32>
    %cst_79 = arith.constant 9.99999974E-6 : f32
    %147 = vector.broadcast %cst_79 : f32 to vector<80x1xf32>
    %148 = arith.addf %144, %147 : vector<80x1xf32>
    %149 = math.rsqrt %148 : vector<80x1xf32>
    %150 = vector.broadcast %149 : vector<80x1xf32> to vector<80x32xf32>
    %151 = arith.mulf %146, %150 : vector<80x32xf32>
    %152 = vector.broadcast %132 : vector<1x32xf32> to vector<80x32xf32>
    %153 = arith.mulf %151, %152 : vector<80x32xf32>
    %154 = vector.broadcast %133 : vector<1x32xf32> to vector<80x32xf32>
    %155 = arith.addf %153, %154 : vector<80x32xf32>
    %c2_80 = arith.constant 2 : index
    %c0_81 = arith.constant 0 : index
    %c0_82 = arith.constant 0 : index
    %156 = vector.load %arg5[%c2_80, %c0_81, %c0_82] : memref<4x32x32xbf16, #tpu.memory_space<vmem>>, vector<1x32x32xbf16>
    %157 = vector.shape_cast %156 : vector<1x32x32xbf16> to vector<32x32xbf16>
    %158 = arith.truncf %155 : vector<80x32xf32> to vector<80x32xbf16>
    %cst_83 = arith.constant dense<0.000000e+00> : vector<80x32xf32>
    %159 = tpu.matmul %158, %157, %cst_83 {dimension_numbers = #tpu.dot_dimension_numbers<[1], [0], [0], [1], [0, 0, 1, 1], [], []>} : vector<80x32xbf16>, vector<32x32xbf16>, vector<80x32xf32> -> vector<80x32xf32>
    %c9 = arith.constant 9 : index
    %c0_84 = arith.constant 0 : index
    %160 = vector.load %arg6[%c9, %c0_84] : memref<11x32xf32, #tpu.memory_space<vmem>>, vector<1x32xf32>
    %161 = vector.broadcast %160 : vector<1x32xf32> to vector<80x32xf32>
    %162 = arith.addf %159, %161 : vector<80x32xf32>
    %cst_85 = arith.constant 0.000000e+00 : f32
    %163 = vector.broadcast %cst_85 : f32 to vector<80x32xf32>
    %164 = arith.maximumf %162, %163 : vector<80x32xf32>
    %c3_86 = arith.constant 3 : index
    %c0_87 = arith.constant 0 : index
    %c0_88 = arith.constant 0 : index
    %165 = vector.load %arg5[%c3_86, %c0_87, %c0_88] : memref<4x32x32xbf16, #tpu.memory_space<vmem>>, vector<1x32x32xbf16>
    %166 = vector.shape_cast %165 : vector<1x32x32xbf16> to vector<32x32xbf16>
    %167 = arith.truncf %164 : vector<80x32xf32> to vector<80x32xbf16>
    %cst_89 = arith.constant dense<0.000000e+00> : vector<80x32xf32>
    %168 = tpu.matmul %167, %166, %cst_89 {dimension_numbers = #tpu.dot_dimension_numbers<[1], [0], [0], [1], [0, 0, 1, 1], [], []>} : vector<80x32xbf16>, vector<32x32xbf16>, vector<80x32xf32> -> vector<80x32xf32>
    %c10 = arith.constant 10 : index
    %c0_90 = arith.constant 0 : index
    %169 = vector.load %arg6[%c10, %c0_90] : memref<11x32xf32, #tpu.memory_space<vmem>>, vector<1x32xf32>
    %170 = vector.broadcast %169 : vector<1x32xf32> to vector<80x32xf32>
    %171 = arith.addf %168, %170 : vector<80x32xf32>
    %cst_91 = arith.constant 0.000000e+00 : f32
    %172 = vector.broadcast %cst_91 : f32 to vector<80x32xf32>
    %173 = arith.maximumf %171, %172 : vector<80x32xf32>
    %c0_92 = arith.constant 0 : index
    %c0_93 = arith.constant 0 : index
    %174 = vector.load %arg12[%c0_92, %c0_93] : memref<32x128xbf16, #tpu.memory_space<vmem>>, vector<32x128xbf16>
    %175 = arith.truncf %173 : vector<80x32xf32> to vector<80x32xbf16>
    %cst_94 = arith.constant dense<0.000000e+00> : vector<80x128xf32>
    %176 = tpu.matmul %175, %174, %cst_94 {dimension_numbers = #tpu.dot_dimension_numbers<[1], [0], [0], [1], [0, 0, 1, 1], [], []>} : vector<80x32xbf16>, vector<32x128xbf16>, vector<80x128xf32> -> vector<80x128xf32>
    %c0_95 = arith.constant 0 : index
    %c0_96 = arith.constant 0 : index
    %177 = vector.load %arg13[%c0_95, %c0_96] : memref<1x128xf32, #tpu.memory_space<vmem>>, vector<1x128xf32>
    %178 = vector.broadcast %177 : vector<1x128xf32> to vector<80x128xf32>
    %179 = arith.addf %176, %178 : vector<80x128xf32>
    %c0_97 = arith.constant 0 : index
    %c0_98 = arith.constant 0 : index
    %180 = vector.load %arg14[%c0_97, %c0_98] : memref<80x128xf32, #tpu.memory_space<vmem>>, vector<80x128xf32>
    tpu.vector_store %arg14[%c0_97, %c0_98], %179 {strides = array<i32>} : memref<80x128xf32, #tpu.memory_space<vmem>>, vector<80x128xf32>,
    return
  }
  func.func @transform_0(%arg0: i32) -> (i32, i32) {
    %c0_i32 = arith.constant 0 : i32
    %c0_i32_0 = arith.constant 0 : i32
    return %arg0, %c0_i32 : i32, i32
  }
  func.func @transform_1(%arg0: i32) -> (i32, i32) {
    %c0_i32 = arith.constant 0 : i32
    %c0_i32_0 = arith.constant 0 : i32
    %c0_i32_1 = arith.constant 0 : i32
    return %c0_i32, %c0_i32_0 : i32, i32
  }
  func.func @transform_2(%arg0: i32) -> (i32, i32) {
    %c0_i32 = arith.constant 0 : i32
    %c0_i32_0 = arith.constant 0 : i32
    %c0_i32_1 = arith.constant 0 : i32
    return %c0_i32, %c0_i32_0 : i32, i32
  }
  func.func @transform_3(%arg0: i32) -> (i32, i32) {
    %c0_i32 = arith.constant 0 : i32
    %c0_i32_0 = arith.constant 0 : i32
    %c0_i32_1 = arith.constant 0 : i32
    return %c0_i32, %c0_i32_0 : i32, i32
  }
  func.func @transform_4(%arg0: i32) -> (i32, i32, i32) {
    %c0_i32 = arith.constant 0 : i32
    %c0_i32_0 = arith.constant 0 : i32
    %c0_i32_1 = arith.constant 0 : i32
    %c0_i32_2 = arith.constant 0 : i32
    return %c0_i32, %c0_i32_0, %c0_i32_1 : i32, i32, i32
  }
  func.func @transform_5(%arg0: i32) -> (i32, i32) {
    %c0_i32 = arith.constant 0 : i32
    %c0_i32_0 = arith.constant 0 : i32
    %c0_i32_1 = arith.constant 0 : i32
    return %c0_i32, %c0_i32_0 : i32, i32
  }
  func.func @transform_6(%arg0: i32) -> (i32, i32) {
    %c0_i32 = arith.constant 0 : i32
    %c0_i32_0 = arith.constant 0 : i32
    %c0_i32_1 = arith.constant 0 : i32
    return %c0_i32, %c0_i32_0 : i32, i32
  }
  func.func @transform_7(%arg0: i32) -> (i32, i32) {
    %c0_i32 = arith.constant 0 : i32
    %c0_i32_0 = arith.constant 0 : i32
    %c0_i32_1 = arith.constant 0 : i32
    return %c0_i32, %c0_i32_0 : i32, i32
  }
  func.func @transform_8(%arg0: i32) -> (i32, i32) {
    %c0_i32 = arith.constant 0 : i32
    %c0_i32_0 = arith.constant 0 : i32
    %c0_i32_1 = arith.constant 0 : i32
    return %c0_i32, %c0_i32_0 : i32, i32
  }
  func.func @transform_9(%arg0: i32) -> (i32, i32) {
    %c0_i32 = arith.constant 0 : i32
    %c0_i32_0 = arith.constant 0 : i32
    %c0_i32_1 = arith.constant 0 : i32
    return %c0_i32, %c0_i32_0 : i32, i32
  }
  func.func @transform_10(%arg0: i32) -> (i32, i32) {
    %c0_i32 = arith.constant 0 : i32
    %c0_i32_0 = arith.constant 0 : i32
    %c0_i32_1 = arith.constant 0 : i32
    return %c0_i32, %c0_i32_0 : i32, i32
  }
  func.func @transform_11(%arg0: i32) -> (i32, i32) {
    %c0_i32 = arith.constant 0 : i32
    %c0_i32_0 = arith.constant 0 : i32
    %c0_i32_1 = arith.constant 0 : i32
    return %c0_i32, %c0_i32_0 : i32, i32
  }
  func.func @transform_12(%arg0: i32) -> (i32, i32) {
    %c0_i32 = arith.constant 0 : i32
    %c0_i32_0 = arith.constant 0 : i32
    %c0_i32_1 = arith.constant 0 : i32
    return %c0_i32, %c0_i32_0 : i32, i32
  }
  func.func @transform_13(%arg0: i32) -> (i32, i32) {
    %c0_i32 = arith.constant 0 : i32
    %c0_i32_0 = arith.constant 0 : i32
    return %arg0, %c0_i32 : i32, i32
  }
}

</mosaic_0001>

<bundles_post_ra>
// kernel: tile.9
= control target key start
LH: loop header
LB: loop body
LE: loop exit
PB: predicated region body
PF: predicated region fallthrough
CT: control target
= control target key end

     0   :  { %vm3_vm0 = vcmask 261120   ;;  %s232_s0 = inlined_call_operand.vmem [shape: f32[8,10,32], index: 0, kind: input, shape index: {}]   ;;  %s233_s1 = inlined_call_operand.vmem [shape: f32[80,32], index: 1, kind: output, shape index: {}]  }
   0x1   :  { %v2_v0 = vld [vmem:[%s232_s0] sm:$0xff]   ;;  %v80_v1 = vld [vmem:[%s232_s0 + $0x8] sm:$0x3]   ;;  %v82_v2 = vld [vmem:[%s232_s0 + $0x10] sm:$0xff]  }
   0x2   :  { %4 = vst.msk [vmem:[%s233_s1] sm:$0xff] %vm3_vm0, %v2_v0   ;;  %v84_v3 = vld [vmem:[%s232_s0 + $0x18] sm:$0x3]   ;;  %v86_v4 = vld [vmem:[%s232_s0 + $0x20] sm:$0xff]   ;;  %v88_v5 = vld [vmem:[%s232_s0 + $0x28] sm:$0x3]  }
   0x3   :  { %81 = vst.msk [vmem:[%s233_s1 + $0x8] sm:$0x3] %vm3_vm0, %v80_v1   ;;  %v90_v6 = vld [vmem:[%s232_s0 + $0x30] sm:$0xff]   ;;  %v92_v7 = vld [vmem:[%s232_s0 + $0x38] sm:$0x3]   ;;  %v94_v8 = vld [vmem:[%s232_s0 + $0x40] sm:$0xff]  }
   0x4   :  { %83 = vst.msk [vmem:[%s233_s1 + $0xa] sm:$0xff] %vm3_vm0, %v82_v2   ;;  %v96_v9 = vld [vmem:[%s232_s0 + $0x48] sm:$0x3]   ;;  %v98_v10 = vld [vmem:[%s232_s0 + $0x50] sm:$0xff]   ;;  %v100_v11 = vld [vmem:[%s232_s0 + $0x58] sm:$0x3]  }
   0x5   :  { %85 = vst.msk [vmem:[%s233_s1 + $0x12] sm:$0x3] %vm3_vm0, %v84_v3   ;;  %v102_v12 = vld [vmem:[%s232_s0 + $0x60] sm:$0xff]   ;;  %v104_v13 = vld [vmem:[%s232_s0 + $0x68] sm:$0x3]   ;;  %v106_v14 = vld [vmem:[%s232_s0 + $0x70] sm:$0xff]  }
   0x6   :  { %87 = vst.msk [vmem:[%s233_s1 + $0x14] sm:$0xff] %vm3_vm0, %v86_v4   ;;  %v108_v15 = vld [vmem:[%s232_s0 + $0x78] sm:$0x3]  }
   0x7   :  { %89 = vst.msk [vmem:[%s233_s1 + $0x1c] sm:$0x3] %vm3_vm0, %v88_v5  }
   0x8   :  { %91 = vst.msk [vmem:[%s233_s1 + $0x1e] sm:$0xff] %vm3_vm0, %v90_v6  }
   0x9   :  { %93 = vst.msk [vmem:[%s233_s1 + $0x26] sm:$0x3] %vm3_vm0, %v92_v7  }
   0xa   :  { %95 = vst.msk [vmem:[%s233_s1 + $0x28] sm:$0xff] %vm3_vm0, %v94_v8  }
   0xb   :  { %97 = vst.msk [vmem:[%s233_s1 + $0x30] sm:$0x3] %vm3_vm0, %v96_v9  }
   0xc   :  { %99 = vst.msk [vmem:[%s233_s1 + $0x32] sm:$0xff] %vm3_vm0, %v98_v10  }
   0xd   :  { %101 = vst.msk [vmem:[%s233_s1 + $0x3a] sm:$0x3] %vm3_vm0, %v100_v11  }
   0xe   :  { %103 = vst.msk [vmem:[%s233_s1 + $0x3c] sm:$0xff] %vm3_vm0, %v102_v12  }
   0xf   :  { %105 = vst.msk [vmem:[%s233_s1 + $0x44] sm:$0x3] %vm3_vm0, %v104_v13  }
  0x10   :  { %107 = vst.msk [vmem:[%s233_s1 + $0x46] sm:$0xff] %vm3_vm0, %v106_v14  }
  0x11   :  { %109 = vst.msk [vmem:[%s233_s1 + $0x4e] sm:$0x3] %vm3_vm0, %v108_v15  }

// kernel: ad_forward.1
= control target key start
LH: loop header
LB: loop body
LE: loop exit
PB: predicated region body
PF: predicated region fallthrough
CT: control target
= control target key end

     0   :  { %vm79_vm0 = vcmask 1043456   ;;  %vm63_vm1 = vcmask 64512   ;;  %vm150_vm2 = vcmask 261120   ;;  %s5169_s30 = smov 96   ;;  %vm481_vm3 = vcmask 654336   ;;  %s7229_s3 = inlined_call_operand.vmem [shape: bf16[8,32], index: 3, kind: input, shape index: {}]   ;;  %s7230_s0 = inlined_call_operand.vmem [shape: f32[80,8], index: 0, kind: input, shape index: {}]   ;;  %s7231_s5 = inlined_call_operand.vmem [shape: f32[11,32], index: 5, kind: input, shape index: {}]   ;;  %s7232_s4 = inlined_call_operand.vmem [shape: bf16[4,32,32], index: 4, kind: input, shape index: {}]   ;;  %s7233_s7 = inlined_call_operand.vmem [shape: f32[1,96], index: 7, kind: input, shape index: {}]   ;;  %s7234_s6 = inlined_call_operand.vmem [shape: bf16[32,96], index: 6, kind: input, shape index: {}]   ;;  %s7235_s2 = inlined_call_operand.vmem [shape: f32[80,32], index: 2, kind: input, shape index: {}]   ;;  %s7236_s1 = inlined_call_operand.vmem [shape: f32[80,80], index: 1, kind: input, shape index: {}]   ;;  %s7237_s8 = inlined_call_operand.vmem [shape: bf16[32,2048], index: 8, kind: input, shape index: {}]   ;;  %s7238_s10 = inlined_call_operand.vmem [shape: bf16[2048,32], index: 10, kind: input, shape index: {}]   ;;  %s7239_s9 = inlined_call_operand.vmem [shape: f32[1,2048], index: 9, kind: input, shape index: {}]   ;;  %s7240_s11 = inlined_call_operand.vmem [shape: bf16[32,128], index: 11, kind: input, shape index: {}]   ;;  %s7241_s12 = inlined_call_operand.vmem [shape: f32[1,128], index: 12, kind: input, shape index: {}]   ;;  %s7242_s13 = inlined_call_operand.vmem [shape: f32[80,128], index: 13, kind: output, shape index: {}]  }
   0x1   :  { %v55_v0 = vld [vmem:[%s7229_s3] sm:$0xf]  ;;  %v46_v2 = vld [vmem:[%s7230_s0 + $0x8] sm:$0xff]  ;;  %v51_v5 = vld [vmem:[%s7230_s0 + $0x30] sm:$0xff] }
   0x2   :  { %v45_v1 = vld [vmem:[%s7230_s0] sm:$0xff]  ;;  %v81_v3 = vsel %vm79_vm0, %v55_v0, 0  ;;  %v52_v6 = vld [vmem:[%s7230_s0 + $0x38] sm:$0xff]  ;;  %v4894_v8 = vld [vmem:[%s7232_s4 + $0x8] sm:$0xff] }
   0x3   :  { %v56_v4 = vpack.c.bf16 %v46_v2, %v45_v1  ;;  %90 = vmatpush.bf16.msra.mxu0 %v81_v3  ;;  %5065 = vmatpush.bf16.msra.mxu1 %v81_v3  ;;  %v59_v7 = vpack.c.bf16 %v52_v6, %v51_v5  ;;  %v47_v9 = vld [vmem:[%s7230_s0 + $0x10] sm:$0xff]  ;;  %v48_v10 = vld [vmem:[%s7230_s0 + $0x18] sm:$0xff]  ;;  %v53_v12 = vld [vmem:[%s7230_s0 + $0x40] sm:$0xff] }
   0x4   :  { %v57_v11 = vpack.c.bf16 %v48_v10, %v47_v9  ;;  %v54_v13 = vld [vmem:[%s7230_s0 + $0x48] sm:$0xff]  ;;  %v49_v15 = vld [vmem:[%s7230_s0 + $0x20] sm:$0xff]  ;;  %v4896_v55 = vld [vmem:[%s7232_s4 + $0x18] sm:$0xff] }
   0x5   :  { %v60_v14 = vpack.c.bf16 %v54_v13, %v53_v12  ;;  %v50_v16 = vld [vmem:[%s7230_s0 + $0x28] sm:$0xff]  ;;  %v4893_v18 = vld [vmem:[%s7232_s4] sm:$0xff]  ;;  %255 = vmatpush.bf16.msra.mxu2 %v4896_v55  ;;  %v4895_v56 = vld [vmem:[%s7232_s4 + $0x10] sm:$0xff] }
   0x6   :  { %4068 = vmatmul.msk.bf16.vlgmr.msra.gmra.mxu0 %vm63_vm1, %v56_v4  ;;  %4071 = vmatmul.msk.bf16.vlgmr.msra.gmra.mxu1 %vm63_vm1, %v59_v7  ;;  %v58_v17 = vpack.c.bf16 %v50_v16, %v49_v15  ;;  %v5074_v20 = vld [vmem:[%s7231_s5] ss:$0 sm:$0xff]  ;;  %v5075_v58 = vld [vmem:[%s7231_s5 + $0x1] ss:$0 sm:$0xff] }
   0x7   :  { %172 = vmatpush.bf16.msrb.mxu1 %v4894_v8 }
   0x9   :  { %256 = vmatpush.bf16.msra.mxu2 %v4895_v56 }
   0xb   :  { %173 = vmatpush.bf16.msrb.mxu1 %v4893_v18 }
  0x16   :  { %4069 = vmatmul.msk.bf16.gmra.mxu0 %vm63_vm1, %v57_v11  ;;  %4072 = vmatmul.msk.bf16.gmra.mxu1 %vm63_vm1, %v60_v14 }
  0x26   :  { %4070 = vmatmul.msk.bf16.gmra.mxu0 %vm63_vm1, %v58_v17 }
  0x83   :  { %v92_v19 = vpop.f32.mrf.mxu0  ;;  %v107_v35 = vpop.f32.mrf.mxu1 }
  0x84   :  { %v93_v21 = vadd.f32 %v5074_v20, %v92_v19  ;;  %v108_v43 = vadd.f32 %v5074_v20, %v107_v35 }
  0x86   :  { %v117_v24 = vmax.f32 %v93_v21, 0.0  ;;  %v123_v46 = vmax.f32 %v108_v43, 0.0 }
  0x8b   :  { %v94_v22 = vpop.f32.mrf.mxu0  ;;  %v109_v42 = vpop.f32.mrf.mxu1 }
  0x8c   :  { %v95_v23 = vadd.f32 %v5074_v20, %v94_v22  ;;  %v110_v44 = vadd.f32 %v5074_v20, %v109_v42 }
  0x8e   :  { %v118_v25 = vmax.f32 %v95_v23, 0.0  ;;  %v124_v47 = vmax.f32 %v110_v44, 0.0 }
  0x90   :  { %v131_v26 = vpack.c.bf16 %v118_v25, %v117_v24  ;;  %v134_v48 = vpack.c.bf16 %v124_v47, %v123_v46 }
  0x92   :  { %4081 = vmatmul.msk.bf16.vlgmr.msrb.gmra.mxu1 %vm150_vm2, %v131_v26 }
  0x93   :  { %v97_v27 = vpop.f32.mrf.mxu0  ;;  %v112_v45 = vpop.f32.mrf.mxu1 }
  0x94   :  { %v98_v28 = vadd.f32 %v5074_v20, %v97_v27  ;;  %v113_v50 = vadd.f32 %v5074_v20, %v112_v45 }
  0x96   :  { %v119_v31 = vmax.f32 %v98_v28, 0.0  ;;  %v125_v52 = vmax.f32 %v113_v50, 0.0 }
  0x9b   :  { %v99_v29 = vpop.f32.mrf.mxu0  ;;  %v114_v49 = vpop.f32.mrf.mxu1 }
  0x9c   :  { %v100_v30 = vadd.f32 %v5074_v20, %v99_v29  ;;  %v115_v51 = vadd.f32 %v5074_v20, %v114_v49  ;;  %v4898_v29 = vld [vmem:[%s7234_s6 + $0x8] sm:$0xff]  ;;  %v296_v49 = vld [vmem:[%s7235_s2 + $0x18] sm:$0xff] }
  0x9d   :  { %359 = vmatpush.bf16.msra.mxu3 %v4898_v29 }
  0x9e   :  { %v120_v32 = vmax.f32 %v100_v30, 0.0  ;;  %v126_v53 = vmax.f32 %v115_v51, 0.0  ;;  %v4897_v30 = vld [vmem:[%s7234_s6] sm:$0xff] }
  0xa0   :  { %v132_v33 = vpack.c.bf16 %v120_v32, %v119_v31  ;;  %v135_v54 = vpack.c.bf16 %v126_v53, %v125_v52  ;;  %v5076_v32 = vld [vmem:[%s7231_s5 + $0x2] ss:$0 sm:$0xff] }
  0xa1   :  { %360 = vmatpush.bf16.msra.mxu3 %v4897_v30 }
  0xa2   :  { %4082 = vmatmul.msk.bf16.gmra.mxu1 %vm150_vm2, %v132_v33 }
  0xa3   :  { %v102_v34 = vpop.f32.mrf.mxu0 }
  0xa4   :  { %v103_v36 = vadd.f32 %v5074_v20, %v102_v34 }
  0xa6   :  { %v121_v39 = vmax.f32 %v103_v36, 0.0 }
  0xab   :  { %v104_v37 = vpop.f32.mrf.mxu0 }
  0xac   :  { %v105_v38 = vadd.f32 %v5074_v20, %v104_v37  ;;  %v293_v37 = vld [vmem:[%s7235_s2] sm:$0xff] }
  0xae   :  { %v122_v40 = vmax.f32 %v105_v38, 0.0  ;;  %v294_v38 = vld [vmem:[%s7235_s2 + $0x8] sm:$0xff] }
  0xb0   :  { %v133_v41 = vpack.c.bf16 %v122_v40, %v121_v39 }
  0xb2   :  { %4083 = vmatmul.msk.bf16.gmra.mxu1 %vm150_vm2, %v133_v41 }
  0xc2   :  { %4084 = vmatmul.msk.bf16.gmra.mxu1 %vm150_vm2, %v134_v48  ;;  %v295_v48 = vld [vmem:[%s7235_s2 + $0x10] sm:$0xff] }
  0xd2   :  { %4085 = vmatmul.msk.bf16.gmra.mxu1 %vm150_vm2, %v135_v54 }
 0x10f   :  { %v175_v57 = vpop.f32.mrf.mxu1 }
 0x110   :  { %v176_v59 = vadd.f32 %v5075_v58, %v175_v57 }
 0x112   :  { %v200_v62 = vmax.f32 %v176_v59, 0.0  ;;  %v297_v59 = vld [vmem:[%s7235_s2 + $0x20] sm:$0xff] }
 0x117   :  { %v177_v60 = vpop.f32.mrf.mxu1 }
 0x118   :  { %v178_v61 = vadd.f32 %v5075_v58, %v177_v60  ;;  %v298_v60 = vld [vmem:[%s7235_s2 + $0x28] sm:$0xff] }
 0x11a   :  { %v201_v63 = vmax.f32 %v178_v61, 0.0 }
 0x11c   :  { %v215_v0 = vpack.c.bf16 %v201_v63, %v200_v62 }
 0x11e   :  { %4098 = vmatmul.msk.bf16.vlgmr.msra.gmra.mxu2 %vm150_vm2, %v215_v0 }
 0x11f   :  { %v180_v1 = vpop.f32.mrf.mxu1 }
 0x120   :  { %v181_v2 = vadd.f32 %v5075_v58, %v180_v1 }
 0x122   :  { %v202_v5 = vmax.f32 %v181_v2, 0.0 }
 0x127   :  { %v182_v3 = vpop.f32.mrf.mxu1 }
 0x128   :  { %v183_v4 = vadd.f32 %v5075_v58, %v182_v3 }
 0x12a   :  { %v203_v6 = vmax.f32 %v183_v4, 0.0 }
 0x12c   :  { %v216_v7 = vpack.c.bf16 %v203_v6, %v202_v5  ;;  %v299_v6 = vld [vmem:[%s7235_s2 + $0x30] sm:$0xff] }
 0x12e   :  { %4099 = vmatmul.msk.bf16.gmra.mxu2 %vm150_vm2, %v216_v7  ;;  %v300_v7 = vld [vmem:[%s7235_s2 + $0x38] sm:$0xff] }
 0x12f   :  { %v185_v8 = vpop.f32.mrf.mxu1 }
 0x130   :  { %v186_v9 = vadd.f32 %v5075_v58, %v185_v8 }
 0x132   :  { %v204_v12 = vmax.f32 %v186_v9, 0.0 }
 0x137   :  { %v187_v10 = vpop.f32.mrf.mxu1 }
 0x138   :  { %v188_v11 = vadd.f32 %v5075_v58, %v187_v10 }
 0x13a   :  { %v205_v13 = vmax.f32 %v188_v11, 0.0 }
 0x13c   :  { %v217_v14 = vpack.c.bf16 %v205_v13, %v204_v12 }
 0x13e   :  { %4100 = vmatmul.msk.bf16.gmra.mxu2 %vm150_vm2, %v217_v14  ;;  %v301_v14 = vld [vmem:[%s7235_s2 + $0x40] sm:$0xff] }
 0x13f   :  { %v190_v15 = vpop.f32.mrf.mxu1 }
 0x140   :  { %v191_v16 = vadd.f32 %v5075_v58, %v190_v15 }
 0x142   :  { %v206_v19 = vmax.f32 %v191_v16, 0.0 }
 0x147   :  { %v192_v17 = vpop.f32.mrf.mxu1 }
 0x148   :  { %v193_v18 = vadd.f32 %v5075_v58, %v192_v17 }
 0x14a   :  { %v207_v20 = vmax.f32 %v193_v18, 0.0 }
 0x14c   :  { %v218_v21 = vpack.c.bf16 %v207_v20, %v206_v19  ;;  %v302_v19 = vld [vmem:[%s7235_s2 + $0x48] sm:$0xff]  ;;  %s5170_s2 = smov 64  }
 0x14e   :  { %4101 = vmatmul.msk.bf16.gmra.mxu2 %vm150_vm2, %v218_v21 }
 0x14f   :  { %v195_v22 = vpop.f32.mrf.mxu1 }
 0x150   :  { %v196_v23 = vadd.f32 %v5075_v58, %v195_v22 }
 0x152   :  { %v208_v26 = vmax.f32 %v196_v23, 0.0 }
 0x157   :  { %v197_v24 = vpop.f32.mrf.mxu1 }
 0x158   :  { %v198_v25 = vadd.f32 %v5075_v58, %v197_v24  ;;  %v5077_v24 = vld [vmem:[%s7233_s7] ss:$0 sm:$0xff] }
 0x15a   :  { %v209_v27 = vmax.f32 %v198_v25, 0.0 }
 0x15c   :  { %v219_v28 = vpack.c.bf16 %v209_v27, %v208_v26 }
 0x15e   :  { %4102 = vmatmul.msk.bf16.gmra.mxu2 %vm150_vm2, %v219_v28 }
 0x1a1   :  { %v258_v31 = vpop.f32.mrf.mxu2 }
 0x1a2   :  { %v259_v33 = vadd.f32 %v5076_v32, %v258_v31 }
 0x1a4   :  { %v283_v35 = vmax.f32 %v259_v33, 0.0 }
 0x1a6   :  { %v5323_v40 = vadd.f32 %v293_v37, %v283_v35 }
 0x1a9   :  { %v260_v34 = vpop.f32.mrf.mxu2 }
 0x1aa   :  { %v261_v36 = vadd.f32 %v5076_v32, %v260_v34 }
 0x1ac   :  { %v284_v39 = vmax.f32 %v261_v36, 0.0 }
 0x1ae   :  { %v5325_v41 = vadd.f32 %v294_v38, %v284_v39 }
 0x1b0   :  { %v317_v42 = vpack.c.bf16 %v5325_v41, %v5323_v40 }
 0x1b1   :  { %v263_v43 = vpop.f32.mrf.mxu2 }
 0x1b2   :  { %4111 = vmatmul.msk.bf16.vlgmr.msra.gmra.mxu3 %vm150_vm2, %v317_v42  ;;  %v264_v44 = vadd.f32 %v5076_v32, %v263_v43 }
 0x1b4   :  { %v285_v46 = vmax.f32 %v264_v44, 0.0 }
 0x1b6   :  { %v5336_v51 = vadd.f32 %v295_v48, %v285_v46 }
 0x1b9   :  { %v265_v45 = vpop.f32.mrf.mxu2 }
 0x1ba   :  { %v266_v47 = vadd.f32 %v5076_v32, %v265_v45 }
 0x1bc   :  { %v286_v50 = vmax.f32 %v266_v47, 0.0 }
 0x1be   :  { %v5338_v52 = vadd.f32 %v296_v49, %v286_v50 }
 0x1c0   :  { %v318_v53 = vpack.c.bf16 %v5338_v52, %v5336_v51 }
 0x1c1   :  { %v268_v54 = vpop.f32.mrf.mxu2 }
 0x1c2   :  { %4112 = vmatmul.msk.bf16.gmra.mxu3 %vm150_vm2, %v318_v53  ;;  %v269_v55 = vadd.f32 %v5076_v32, %v268_v54 }
 0x1c4   :  { %v287_v57 = vmax.f32 %v269_v55, 0.0 }
 0x1c6   :  { %v5349_v62 = vadd.f32 %v297_v59, %v287_v57 }
 0x1c9   :  { %v270_v56 = vpop.f32.mrf.mxu2 }
 0x1ca   :  { %v271_v58 = vadd.f32 %v5076_v32, %v270_v56 }
 0x1cc   :  { %v288_v61 = vmax.f32 %v271_v58, 0.0 }
 0x1ce   :  { %v5351_v63 = vadd.f32 %v298_v60, %v288_v61 }
 0x1d0   :  { %v319_v0 = vpack.c.bf16 %v5351_v63, %v5349_v62 }
 0x1d1   :  { %v273_v1 = vpop.f32.mrf.mxu2 }
 0x1d2   :  { %4113 = vmatmul.msk.bf16.gmra.mxu3 %vm150_vm2, %v319_v0  ;;  %v274_v2 = vadd.f32 %v5076_v32, %v273_v1 }
 0x1d4   :  { %v289_v4 = vmax.f32 %v274_v2, 0.0  ;;  %v387_v2 = vld [vmem:[%s7236_s1] sm:$0xff] }
 0x1d6   :  { %v5362_v9 = vadd.f32 %v299_v6, %v289_v4  ;;  %v388_v6 = vld [vmem:[%s7236_s1 + $0x8] sm:$0xff] }
 0x1d9   :  { %v275_v3 = vpop.f32.mrf.mxu2 }
 0x1da   :  { %v276_v5 = vadd.f32 %v5076_v32, %v275_v3 }
 0x1dc   :  { %v290_v8 = vmax.f32 %v276_v5, 0.0 }
 0x1de   :  { %v5364_v10 = vadd.f32 %v300_v7, %v290_v8 }
 0x1e0   :  { %v320_v11 = vpack.c.bf16 %v5364_v10, %v5362_v9 }
 0x1e1   :  { %v278_v12 = vpop.f32.mrf.mxu2 }
 0x1e2   :  { %v279_v13 = vadd.f32 %v5076_v32, %v278_v12  ;;  %4114 = vmatmul.msk.bf16.gmra.mxu3 %vm150_vm2, %v320_v11  ;;  %v389_v12 = vld [vmem:[%s7236_s1 + $0x10] sm:$0xff] }
 0x1e4   :  { %v291_v15 = vmax.f32 %v279_v13, 0.0 }
 0x1e6   :  { %v5372_v16 = vadd.f32 %v301_v14, %v291_v15 }
 0x1e9   :  { %v280_v17 = vpop.f32.mrf.mxu2 }
 0x1ea   :  { %v281_v18 = vadd.f32 %v5076_v32, %v280_v17  ;;  %v390_v17 = vld [vmem:[%s7236_s1 + $0x18] sm:$0xff] }
 0x1ec   :  { %v292_v20 = vmax.f32 %v281_v18, 0.0 }
 0x1ee   :  { %v5377_v21 = vadd.f32 %v302_v19, %v292_v20 }
 0x1f0   :  { %v321_v22 = vpack.c.bf16 %v5377_v21, %v5372_v16 }
 0x1f2   :  { %4115 = vmatmul.msk.bf16.gmra.mxu3 %vm150_vm2, %v321_v22  ;;  %v391_v22 = vld [vmem:[%s7236_s1 + $0x20] sm:$0xff] }
 0x235   :  { %v362_v23 = vpop.f32.mrf.mxu3 }
 0x236   :  { %v363_v26 = vadd.f32 %v5077_v24, %v362_v23 }
 0x23d   :  { %v364_v25 = vpop.f32.mrf.mxu3 }
 0x23e   :  { %v365_v27 = vadd.f32 %v5077_v24, %v364_v25 }
 0x240   :  { %v5385_v28 = vpack.c.bf16 %v365_v27, %v363_v26  ;;  %v392_v26 = vld [vmem:[%s7236_s1 + $0x28] sm:$0xff] }
 0x242   :  { %407 = vrot.lane.b32.xlu2 %v5385_v28, %s5169_s30 }
 0x245   :  { %v367_v29 = vpop.f32.mrf.mxu3 }
 0x246   :  { %v368_v38 = vadd.f32 %v5077_v24, %v367_v29 }
 0x24d   :  { %v369_v30 = vpop.f32.mrf.mxu3 }
 0x24e   :  { %v370_v36 = vadd.f32 %v5077_v24, %v369_v30 }
 0x250   :  { %v5391_v39 = vpack.c.bf16 %v370_v36, %v368_v38  ;;  %v394_v36 = vld [vmem:[%s7236_s1 + $0x38] sm:$0xff] }
 0x255   :  { %v372_v31 = vpop.f32.mrf.mxu3 }
 0x256   :  { %v373_v33 = vadd.f32 %v5077_v24, %v372_v31  ;;  %v393_v31 = vld [vmem:[%s7236_s1 + $0x30] sm:$0xff] }
 0x25d   :  { %v374_v32 = vpop.f32.mrf.mxu3 }
 0x25e   :  { %v375_v34 = vadd.f32 %v5077_v24, %v374_v32 }
 0x260   :  { %v5388_v35 = vpack.c.bf16 %v375_v34, %v373_v33 }
 0x262   :  { %411 = vrot.lane.b32.xlu1 %v5388_v35, %s5169_s30 }
 0x265   :  { %v377_v37 = vpop.f32.mrf.mxu3 }
 0x266   :  { %v378_v49 = vadd.f32 %v5077_v24, %v377_v37 }
 0x26a   :  { %409 = vrot.lane.b32.xlu1 %v5391_v39, %s5169_s30 }
 0x26d   :  { %v379_v42 = vpop.f32.mrf.mxu3 }
 0x26e   :  { %v380_v48 = vadd.f32 %v5077_v24, %v379_v42 }
 0x270   :  { %v5395_v50 = vpack.c.bf16 %v380_v48, %v378_v49 }
 0x275   :  { %v382_v43 = vpop.f32.mrf.mxu3 }
 0x276   :  { %v383_v45 = vadd.f32 %v5077_v24, %v382_v43  ;;  %v396_v43 = vld [vmem:[%s7236_s1 + $0x48] sm:$0xff] }
 0x27d   :  { %v384_v44 = vpop.f32.mrf.mxu3 }
 0x27e   :  { %v385_v46 = vadd.f32 %v5077_v24, %v384_v44 }
 0x280   :  { %v401_v47 = vpack.c.bf16 %v385_v46, %v383_v45  ;;  %v395_v46 = vld [vmem:[%s7236_s1 + $0x40] sm:$0xff] }
 0x282   :  { %415 = vrot.lane.b32.xlu0 %v401_v47, %s5169_s30  ;;  %607 = vrot.lane.b32.xlu1 %v401_v47, %s5170_s2 }
 0x28a   :  { %413 = vrot.lane.b32.xlu0 %v5395_v50, %s5169_s30 }
 0x29c   :  { %v408_v0 = vpop.permute.xlu2 %407 }
 0x29d   :  { %v433_v1 = vsel %vm150_vm2, %v408_v0, 0 }
 0x2d4   :  { %v412_v53 = vpop.permute.xlu1 %411 }
 0x2d5   :  { %v439_v60 = vsel %vm150_vm2, %v412_v53, 0 }
 0x2dc   :  { %v410_v54 = vpop.permute.xlu1 %409 }
 0x2dd   :  { %v436_v61 = vsel %vm150_vm2, %v410_v54, 0 }
 0x2f4   :  { %v416_v55 = vpop.permute.xlu0 %415  ;;  %v608_v56 = vpop.permute.xlu1 %607 }
 0x2f5   :  { %632 = vmatpush.bf16.msra.mxu1 %v608_v56  ;;  %v445_v57 = vsel %vm150_vm2, %v416_v55, 0 }
 0x2f6   :  { %450 = vmatpush.bf16.xpose.msrb.mxu0 %v445_v57  ;;  %5066 = vmatpush.bf16.xpose.msrb.mxu2 %v445_v57 }
 0x2fc   :  { %v414_v58 = vpop.permute.xlu0 %413 }
 0x2fd   :  { %v442_v59 = vsel %vm150_vm2, %v414_v58, 0 }
 0x2fe   :  { %451 = vmatpush.bf16.xpose.msrb.mxu0 %v442_v59  ;;  %5067 = vmatpush.bf16.xpose.msrb.mxu2 %v442_v59 }
 0x306   :  { %452 = vmatpush.bf16.xpose.msrb.mxu0 %v439_v60  ;;  %5068 = vmatpush.bf16.xpose.msrb.mxu2 %v439_v60 }
 0x30e   :  { %453 = vmatpush.bf16.xpose.msrb.mxu0 %v436_v61  ;;  %5069 = vmatpush.bf16.xpose.msrb.mxu2 %v436_v61 }
 0x316   :  { %454 = vmatpush.bf16.xpose.msrb.mxu0 %v433_v1  ;;  %5070 = vmatpush.bf16.xpose.msrb.mxu2 %v433_v1 }
 0x31d   :  { %4116 = vmatmul.msk.bf16.vlgmr.msrb.gmra.mxu0 %vm150_vm2, %v5385_v28  ;;  %4120 = vmatmul.msk.bf16.vlgmr.msrb.gmra.mxu2 %vm150_vm2, %v401_v47 }
 0x32d   :  { %4117 = vmatmul.msk.bf16.gmra.mxu0 %vm150_vm2, %v5391_v39 }
 0x33d   :  { %4118 = vmatmul.msk.bf16.gmra.mxu0 %vm150_vm2, %v5388_v35 }
 0x34d   :  { %4119 = vmatmul.msk.bf16.gmra.mxu0 %vm150_vm2, %v5395_v50 }
 0x39a   :  { %v456_v3 = vpop.f32.mrf.mxu0 }
 0x39b   :  { %v457_v4 = vadd.f32 %v456_v3, %v387_v2 }
 0x39d   :  { %v482_v5 = vsel %vm481_vm3, %v457_v4, -inf }
 0x39e   :  { %483 = vmax.xlane.f32.xlu2 %v482_v5 }
 0x3a0   :  { %v476_v42 = vpop.f32.mrf.mxu2 }
 0x3a1   :  { %v5466_v47 = vadd.f32 %v476_v42, %v395_v46 }
 0x3a2   :  { %v458_v7 = vpop.f32.mrf.mxu0 }
 0x3a3   :  { %v459_v8 = vadd.f32 %v458_v7, %v388_v6  ;;  %v506_v48 = vsel %vm481_vm3, %v5466_v47, -inf }
 0x3a5   :  { %v485_v11 = vsel %vm481_vm3, %v459_v8, -inf }
 0x3a6   :  { %486 = vmax.xlane.f32.xlu0 %v485_v11 }
 0x3aa   :  { %v461_v13 = vpop.f32.mrf.mxu0 }
 0x3ab   :  { %v5423_v14 = vadd.f32 %v461_v13, %v389_v12 }
 0x3ad   :  { %v488_v15 = vsel %vm481_vm3, %v5423_v14, -inf }
 0x3ae   :  { %489 = vmax.xlane.f32.xlu1 %v488_v15 }
 0x3b2   :  { %v463_v18 = vpop.f32.mrf.mxu0 }
 0x3b3   :  { %v464_v19 = vadd.f32 %v463_v18, %v390_v17 }
 0x3b5   :  { %v491_v20 = vsel %vm481_vm3, %v464_v19, -inf }
 0x3b6   :  { %492 = vmax.xlane.f32.xlu2 %v491_v20 }
 0x3ba   :  { %v466_v23 = vpop.f32.mrf.mxu0 }
 0x3bb   :  { %v467_v24 = vadd.f32 %v466_v23, %v391_v22 }
 0x3bd   :  { %v494_v25 = vsel %vm481_vm3, %v467_v24, -inf }
 0x3be   :  { %495 = vmax.xlane.f32.xlu2 %v494_v25 }
 0x3c2   :  { %v468_v27 = vpop.f32.mrf.mxu0 }
 0x3c3   :  { %v469_v29 = vadd.f32 %v468_v27, %v392_v26 }
 0x3c5   :  { %v497_v30 = vsel %vm481_vm3, %v469_v29, -inf }
 0x3c6   :  { %498 = vmax.xlane.f32.xlu0 %v497_v30 }
 0x3c7   :  { %603 = vrot.lane.b32.xlu1 %v5388_v35, %s5170_s2 }
 0x3ca   :  { %v471_v32 = vpop.f32.mrf.mxu0 }
 0x3cb   :  { %v472_v33 = vadd.f32 %v471_v32, %v393_v31 }
 0x3cd   :  { %v500_v34 = vsel %vm481_vm3, %v472_v33, -inf }
 0x3ce   :  { %501 = vmax.xlane.f32.xlu2 %v500_v34 }
 0x3cf   :  { %599 = vrot.lane.b32.xlu1 %v5385_v28, %s5170_s2  ;;  %v478_v28 = vpop.f32.mrf.mxu2 }
 0x3d0   :  { %v5459_v44 = vadd.f32 %v478_v28, %v396_v43 }
 0x3d2   :  { %v473_v37 = vpop.f32.mrf.mxu0  ;;  %v509_v45 = vsel %vm481_vm3, %v5459_v44, -inf }
 0x3d3   :  { %v5450_v38 = vadd.f32 %v473_v37, %v394_v36 }
 0x3d5   :  { %v503_v35 = vsel %vm481_vm3, %v5450_v38, -inf }
 0x3d6   :  { %504 = vmax.xlane.f32.xlu0 %v503_v35 }
 0x3e6   :  { %605 = vrot.lane.b32.xlu2 %v5395_v50, %s5170_s2 }
 0x3f9   :  { %510 = vmax.xlane.f32.xlu1 %v509_v45 }
 0x40f   :  { %507 = vmax.xlane.f32.xlu2 %v506_v48 }
 0x411   :  { %v484_v49 = vpop.xlane.xlu2 %483 }
 0x412   :  { %v512_v50 = vsub.f32 %v457_v4, %v484_v49 }
 0x414   :  { %v522_v53 = vmul.f32 1.442695, %v512_v50 }
 0x416   :  { %5087 = vpow2.f32 %v522_v53 }
 0x419   :  { %v487_v54 = vpop.xlane.xlu0 %486 }
 0x41a   :  { %v513_v55 = vsub.f32 %v459_v8, %v487_v54 }
 0x41c   :  { %v5470_v56 = vpop.eup %5087  ;;  %v524_v57 = vmul.f32 1.442695, %v513_v55 }
 0x41d   :  { %v542_v58 = vsel %vm481_vm3, %v5470_v56, 0.0 }
 0x41e   :  { %5089 = vpow2.f32 %v524_v57  ;;  %543 = vadd.xlane.f32.xlu0 %v542_v58 }
 0x421   :  { %v490_v20 = vpop.xlane.xlu1 %489 }
 0x422   :  { %v514_v26 = vsub.f32 %v5423_v14, %v490_v20 }
 0x424   :  { %v5474_v59 = vpop.eup %5089  ;;  %v526_v27 = vmul.f32 1.442695, %v514_v26 }
 0x425   :  { %v545_v60 = vsel %vm481_vm3, %v5474_v59, 0.0 }
 0x426   :  { %546 = vadd.xlane.f32.xlu0 %v545_v60 }
 0x429   :  { %v493_v61 = vpop.xlane.xlu2 %492 }
 0x42a   :  { %v515_v0 = vsub.f32 %v464_v19, %v493_v61 }
 0x42c   :  { %v528_v1 = vmul.f32 1.442695, %v515_v0 }
 0x42e   :  { %5091 = vpow2.f32 %v528_v1 }
 0x431   :  { %v496_v2 = vpop.xlane.xlu2 %495 }
 0x432   :  { %v516_v3 = vsub.f32 %v467_v24, %v496_v2 }
 0x434   :  { %v5478_v4 = vpop.eup %5091  ;;  %v530_v5 = vmul.f32 1.442695, %v516_v3 }
 0x435   :  { %v551_v6 = vsel %vm481_vm3, %v5478_v4, 0.0 }
 0x436   :  { %5093 = vpow2.f32 %v530_v5  ;;  %552 = vadd.xlane.f32.xlu2 %v551_v6 }
 0x439   :  { %v499_v7 = vpop.xlane.xlu0 %498  ;;  %v604_v24 = vpop.permute.xlu1 %603 }
 0x43a   :  { %v517_v8 = vsub.f32 %v469_v29, %v499_v7  ;;  %601 = vrot.lane.b32.xlu0 %v5391_v39, %s5170_s2 }
 0x43c   :  { %v5484_v11 = vpop.eup %5093  ;;  %v532_v12 = vmul.f32 1.442695, %v517_v8 }
 0x43d   :  { %v554_v13 = vsel %vm481_vm3, %v5484_v11, 0.0 }
 0x43e   :  { %5095 = vpow2.f32 %v532_v12  ;;  %555 = vadd.xlane.f32.xlu1 %v554_v13 }
 0x441   :  { %v502_v15 = vpop.xlane.xlu2 %501  ;;  %v600_v34 = vpop.permute.xlu1 %599 }
 0x442   :  { %v518_v17 = vsub.f32 %v472_v33, %v502_v15 }
 0x444   :  { %v5488_v18 = vpop.eup %5095  ;;  %v534_v19 = vmul.f32 1.442695, %v518_v17 }
 0x445   :  { %v557_v22 = vsel %vm481_vm3, %v5488_v18, 0.0 }
 0x446   :  { %5097 = vpow2.f32 %v534_v19  ;;  %558 = vadd.xlane.f32.xlu2 %v557_v22 }
 0x447   :  { %5099 = vpow2.f32 %v526_v27 }
 0x449   :  { %v606_v39 = vpop.permute.xlu2 %605  ;;  %v505_v29 = vpop.xlane.xlu0 %504 }
 0x44a   :  { %633 = vmatpush.bf16.msra.mxu1 %v606_v39  ;;  %v519_v30 = vsub.f32 %v5450_v38, %v505_v29 }
 0x44c   :  { %v5492_v23 = vpop.eup %5097  ;;  %v536_v31 = vmul.f32 1.442695, %v519_v30  ;;  %v5518_v30 = vld [vmem:[%s7231_s5 + $0x3] ss:$0 sm:$0xff] }
 0x44d   :  { %v560_v25 = vsel %vm481_vm3, %v5492_v23, 0.0  ;;  %v5100_v32 = vpop.eup %5099 }
 0x44e   :  { %561 = vadd.xlane.f32.xlu1 %v560_v25  ;;  %634 = vmatpush.bf16.msra.mxu1 %v604_v24  ;;  %5101 = vpow2.f32 %v536_v31  ;;  %v548_v33 = vsel %vm481_vm3, %v5100_v32, 0.0 }
 0x454   :  { %v5102_v36 = vpop.eup %5101 }
 0x455   :  { %v563_v37 = vsel %vm481_vm3, %v5102_v36, 0.0 }
 0x464   :  { %549 = vadd.xlane.f32.xlu0 %v548_v33 }
 0x46c   :  { %v511_v35 = vpop.xlane.xlu1 %510  ;;  %564 = vadd.xlane.f32.xlu0 %v563_v37 }
 0x46d   :  { %v521_v42 = vsub.f32 %v5459_v44, %v511_v35 }
 0x46f   :  { %v540_v14 = vmul.f32 1.442695, %v521_v42 }
 0x471   :  { %5103 = vpow2.f32 %v540_v14 }
 0x477   :  { %v5104_v43 = vpop.eup %5103 }
 0x478   :  { %v569_v28 = vsel %vm481_vm3, %v5104_v43, 0.0 }
 0x479   :  { %570 = vadd.xlane.f32.xlu1 %v569_v28 }
 0x482   :  { %v508_v38 = vpop.xlane.xlu2 %507 }
 0x483   :  { %v520_v45 = vsub.f32 %v5466_v47, %v508_v38 }
 0x485   :  { %v538_v46 = vmul.f32 1.442695, %v520_v45 }
 0x487   :  { %5105 = vpow2.f32 %v538_v46 }
 0x48d   :  { %v5106_v48 = vpop.eup %5105 }
 0x48e   :  { %v566_v49 = vsel %vm481_vm3, %v5106_v48, 0.0 }
 0x48f   :  { %567 = vadd.xlane.f32.xlu2 %v566_v49 }
 0x491   :  { %v544_v50 = vpop.xlane.xlu0 %543 }
 0x499   :  { %v547_v53 = vpop.xlane.xlu0 %546 }
 0x49a   :  { %5107 = vrcp.f32 %v547_v53 }
 0x49b   :  { %5109 = vrcp.f32 %v544_v50 }
 0x4a0   :  { %v5108_v44 = vpop.eup %5107 }
 0x4a1   :  { %v5110_v55 = vpop.eup %5109  ;;  %v583_v57 = vmul.f32 %v5108_v44, %v5474_v59 }
 0x4a2   :  { %v582_v58 = vmul.f32 %v5110_v55, %v5470_v56 }
 0x4a4   :  { %v592_v47 = vpack.c.bf16 %v583_v57, %v582_v58  ;;  %v5171_v58 = vmov 32.0  }
 0x4a9   :  { %v553_v60 = vpop.xlane.xlu2 %552 }
 0x4aa   :  { %5111 = vrcp.f32 %v553_v60 }
 0x4ac   :  { %v602_v54 = vpop.permute.xlu0 %601 }
 0x4ad   :  { %635 = vmatpush.bf16.msra.mxu1 %v602_v54 }
 0x4b0   :  { %v5112_v0 = vpop.eup %5111 }
 0x4b1   :  { %636 = vmatpush.bf16.msra.mxu1 %v600_v34  ;;  %v585_v3 = vmul.f32 %v5112_v0, %v5478_v4  ;;  %v556_v7 = vpop.xlane.xlu1 %555 }
 0x4b4   :  { %4121 = vmatmul.msk.bf16.vlgmr.msra.gmra.mxu1 %vm481_vm3, %v592_v47 }
 0x4b9   :  { %v559_v5 = vpop.xlane.xlu2 %558 }
 0x4c1   :  { %v562_v17 = vpop.xlane.xlu1 %561 }
 0x4d7   :  { %v550_v61 = vpop.xlane.xlu0 %549 }
 0x4d8   :  { %5113 = vrcp.f32 %v550_v61 }
 0x4d9   :  { %5115 = vrcp.f32 %v559_v5 }
 0x4da   :  { %5117 = vrcp.f32 %v556_v7 }
 0x4de   :  { %v5114_v1 = vpop.eup %5113 }
 0x4df   :  { %v584_v2 = vmul.f32 %v5114_v1, %v5100_v32  ;;  %v5116_v56 = vpop.eup %5115  ;;  %v565_v13 = vpop.xlane.xlu0 %564 }
 0x4e0   :  { %v5118_v59 = vpop.eup %5117  ;;  %v587_v8 = vmul.f32 %v5116_v56, %v5488_v18  ;;  %5119 = vrcp.f32 %v565_v13 }
 0x4e1   :  { %v593_v6 = vpack.c.bf16 %v585_v3, %v584_v2  ;;  %v586_v12 = vmul.f32 %v5118_v59, %v5484_v11  ;;  %5121 = vrcp.f32 %v562_v17 }
 0x4e3   :  { %4122 = vmatmul.msk.bf16.gmra.mxu1 %vm481_vm3, %v593_v6  ;;  %v594_v15 = vpack.c.bf16 %v587_v8, %v586_v12 }
 0x4e6   :  { %v5120_v4 = vpop.eup %5119 }
 0x4e7   :  { %v5122_v19 = vpop.eup %5121  ;;  %v589_v20 = vmul.f32 %v5120_v4, %v5102_v36 }
 0x4e8   :  { %v588_v22 = vmul.f32 %v5122_v19, %v5492_v23 }
 0x4ea   :  { %v595_v39 = vpack.c.bf16 %v589_v20, %v588_v22 }
 0x4ec   :  { %v571_v25 = vpop.xlane.xlu1 %570 }
 0x4f3   :  { %4123 = vmatmul.msk.bf16.gmra.mxu1 %vm481_vm3, %v594_v15 }
 0x502   :  { %v568_v24 = vpop.xlane.xlu2 %567 }
 0x503   :  { %4124 = vmatmul.msk.bf16.gmra.mxu1 %vm481_vm3, %v595_v39  ;;  %5123 = vrcp.f32 %v568_v24 }
 0x504   :  { %5125 = vrcp.f32 %v571_v25 }
 0x505   :  { %5127 = vrcp.f32 %v5171_v58  ;;  %v4154_v58 = vld [vmem:[%s7237_s8 + $0xc8] sm:$0xf0] }
 0x509   :  { %v5124_v11 = vpop.eup %5123 }
 0x50a   :  { %v5126_v18 = vpop.eup %5125  ;;  %v590_v26 = vmul.f32 %v5124_v11, %v5106_v48 }
 0x50b   :  { %v591_v27 = vmul.f32 %v5126_v18, %v5104_v43  ;;  %v5128_v47 = vpop.eup %5127 }
 0x50c   :  { %v706_v60 = vmul.f32 32.0, %v5128_v47  ;;  %vm710_vm4 = vweird.f32 %v5128_v47 }
 0x50d   :  { %v596_v29 = vpack.c.bf16 %v591_v27, %v590_v26 }
 0x513   :  { %4125 = vmatmul.msk.bf16.gmra.mxu1 %vm481_vm3, %v596_v29 }
 0x531   :  { %v638_v23 = vpop.f32.mrf.mxu1 }
 0x532   :  { %v639_v31 = vadd.f32 %v5518_v30, %v638_v23 }
 0x534   :  { %v663_v32 = vadd.f32 %v639_v31, %v5323_v40 }
 0x536   :  { %v675_v33 = vsel %vm150_vm2, %v663_v32, 0.0 }
 0x537   :  { %676 = vadd.xlane.f32.xlu0 %v675_v33 }
 0x539   :  { %v640_v34 = vpop.f32.mrf.mxu1 }
 0x53a   :  { %v641_v36 = vadd.f32 %v5518_v30, %v640_v34 }
 0x53c   :  { %v664_v37 = vadd.f32 %v641_v36, %v5325_v41 }
 0x53e   :  { %v678_v35 = vsel %vm150_vm2, %v664_v37, 0.0 }
 0x53f   :  { %679 = vadd.xlane.f32.xlu2 %v678_v35 }
 0x560   :  { %v643_v42 = vpop.f32.mrf.mxu1 }
 0x561   :  { %v644_v14 = vadd.f32 %v5518_v30, %v643_v42 }
 0x563   :  { %v665_v43 = vadd.f32 %v644_v14, %v5336_v51 }
 0x565   :  { %v681_v28 = vsel %vm150_vm2, %v665_v43, 0.0 }
 0x566   :  { %682 = vadd.xlane.f32.xlu1 %v681_v28 }
 0x568   :  { %v645_v40 = vpop.f32.mrf.mxu1 }
 0x569   :  { %v646_v38 = vadd.f32 %v5518_v30, %v645_v40 }
 0x56b   :  { %v666_v45 = vadd.f32 %v646_v38, %v5338_v52 }
 0x56d   :  { %v684_v46 = vsel %vm150_vm2, %v666_v45, 0.0 }
 0x56e   :  { %685 = vadd.xlane.f32.xlu0 %v684_v46 }
 0x570   :  { %v648_v41 = vpop.f32.mrf.mxu1 }
 0x571   :  { %v649_v48 = vadd.f32 %v5518_v30, %v648_v41 }
 0x573   :  { %v5534_v49 = vadd.f32 %v649_v48, %v5349_v62 }
 0x575   :  { %v687_v51 = vsel %vm150_vm2, %v5534_v49, 0.0 }
 0x576   :  { %688 = vadd.xlane.f32.xlu2 %v687_v51  ;;  %v4905_v51 = vld [vmem:[%s7237_s8 + $0xbc] sm:$0xf0] }
 0x578   :  { %v650_v50 = vpop.f32.mrf.mxu1 }
 0x579   :  { %v651_v53 = vadd.f32 %v5518_v30, %v650_v50  ;;  %v4903_v50 = vld [vmem:[%s7237_s8 + $0x84] sm:$0xf] }
 0x57b   :  { %v5540_v44 = vadd.f32 %v651_v53, %v5351_v63  ;;  %v707_v63 = vsub.f32 1.0, %v706_v60 }
 0x57d   :  { %v690_v52 = vsel %vm150_vm2, %v5540_v44, 0.0  ;;  %v708_v61 = vmul.f32 %v5128_v47, %v707_v63 }
 0x57e   :  { %691 = vadd.xlane.f32.xlu1 %v690_v52  ;;  %v4152_v52 = vld [vmem:[%s7237_s8 + $0x88] sm:$0xf] }
 0x57f   :  { %v709_v0 = vadd.f32 %v5128_v47, %v708_v61  ;;  %v4128_v61 = vld [vmem:[%s7237_s8] sm:$0xf] }
 0x580   :  { %v653_v54 = vpop.f32.mrf.mxu1 }
 0x581   :  { %v654_v55 = vadd.f32 %v5518_v30, %v653_v54  ;;  %v5550_v1 = vsel %vm710_vm4, %v5128_v47, %v709_v0  ;;  %v4906_v54 = vld [vmem:[%s7237_s8 + $0xc4] sm:$0xf0]  ;;  %v4901_v0 = vld [vmem:[%s7237_s8 + $0x3c] sm:$0xf0] }
 0x582   :  { %7265 = vst [vmem:[#allocation2_spill] sm:$0xff] %v5550_v1 }
 0x583   :  { %v5546_v62 = vadd.f32 %v654_v55, %v5362_v9 }
 0x585   :  { %v693_v57 = vsel %vm150_vm2, %v5546_v62, 0.0 }
 0x586   :  { %694 = vadd.xlane.f32.xlu1 %v693_v57  ;;  %v4904_v57 = vld [vmem:[%s7237_s8 + $0x8c] sm:$0xf] }
 0x587   :  { %v4157_v60 = vor.u32 %v4904_v57, %v4154_v58 }
 0x588   :  { %v655_v5 = vpop.f32.mrf.mxu1 }
 0x589   :  { %v656_v7 = vadd.f32 %v5518_v30, %v655_v5  ;;  %1110 = vmatpush.bf16.msrb.mxu1 %v4157_v60  ;;  %v4130_v5 = vld [vmem:[%s7237_s8 + $0x40] sm:$0xf0] }
 0x58b   :  { %v5563_v13 = vadd.f32 %v656_v7, %v5364_v10  ;;  %v4902_v7 = vld [vmem:[%s7237_s8 + $0x44] sm:$0xf0] }
 0x58d   :  { %v696_v19 = vsel %vm150_vm2, %v5563_v13, 0.0 }
 0x590   :  { %v658_v15 = vpop.f32.mrf.mxu1 }
 0x591   :  { %v659_v4 = vadd.f32 %v5518_v30, %v658_v15  ;;  %v4900_v15 = vld [vmem:[%s7237_s8 + $0xc] sm:$0xf] }
 0x593   :  { %v5572_v22 = vadd.f32 %v659_v4, %v5372_v16 }
 0x595   :  { %v699_v10 = vsel %vm150_vm2, %v5572_v22, 0.0 }
 0x598   :  { %v660_v11 = vpop.f32.mrf.mxu1 }
 0x599   :  { %v661_v26 = vadd.f32 %v5518_v30, %v660_v11 }
 0x59b   :  { %v5587_v31 = vadd.f32 %v661_v26, %v5377_v21 }
 0x59d   :  { %v702_v34 = vsel %vm150_vm2, %v5587_v31, 0.0 }
 0x5aa   :  { %v677_v2 = vpop.xlane.xlu0 %676 }
 0x5ab   :  { %v712_v3 = vmul.f32 %v5550_v1, %v677_v2  ;;  %v4899_v2 = vld [vmem:[%s7237_s8 + $0x4] sm:$0xf] }
 0x5ad   :  { %v5553_v9 = vsub.f32 %v663_v32, %v712_v3  ;;  %v4129_v3 = vor.u32 %v4901_v0, %v4128_v61 }
 0x5af   :  { %v732_v6 = vmul.f32 %v5553_v9, %v5553_v9 }
 0x5b1   :  { %v742_v56 = vsel %vm150_vm2, %v732_v6, 0.0  ;;  %v4136_v6 = vld [vmem:[%s7237_s8 + $0x8] sm:$0xf] }
 0x5b2   :  { %743 = vadd.xlane.f32.xlu0 %v742_v56  ;;  %v680_v59 = vpop.xlane.xlu2 %679 }
 0x5b3   :  { %v713_v8 = vmul.f32 %v5550_v1, %v680_v59  ;;  %v4133_v59 = vor.u32 %v4899_v2, %v4130_v5 }
 0x5b5   :  { %v5560_v12 = vsub.f32 %v664_v37, %v713_v8  ;;  %v4137_v8 = vor.u32 %v4902_v7, %v4136_v6 }
 0x5b7   :  { %v733_v17 = vmul.f32 %v5560_v12, %v5560_v12 }
 0x5b9   :  { %v745_v20 = vsel %vm150_vm2, %v733_v17, 0.0  ;;  %v4138_v17 = vld [vmem:[%s7237_s8 + $0x48] sm:$0xf0] }
 0x5ba   :  { %697 = vadd.xlane.f32.xlu0 %v696_v19  ;;  %746 = vadd.xlane.f32.xlu2 %v745_v20  ;;  %v4141_v4 = vor.u32 %v4900_v15, %v4138_v17 }
 0x5bc   :  { %1111 = vmatpush.bf16.msrb.mxu1 %v4141_v4 }
 0x5c2   :  { %700 = vadd.xlane.f32.xlu0 %v699_v10 }
 0x5d9   :  { %v683_v39 = vpop.xlane.xlu1 %682 }
 0x5da   :  { %v714_v24 = vmul.f32 %v5550_v1, %v683_v39 }
 0x5dc   :  { %v5577_v25 = vsub.f32 %v665_v43, %v714_v24 }
 0x5de   :  { %v734_v18 = vmul.f32 %v5577_v25, %v5577_v25 }
 0x5e0   :  { %v748_v27 = vsel %vm150_vm2, %v734_v18, 0.0 }
 0x5e1   :  { %v686_v29 = vpop.xlane.xlu0 %685  ;;  %749 = vadd.xlane.f32.xlu2 %v748_v27 }
 0x5e2   :  { %v715_v16 = vmul.f32 %v5550_v1, %v686_v29 }
 0x5e4   :  { %v5584_v23 = vsub.f32 %v666_v45, %v715_v16 }
 0x5e6   :  { %v735_v32 = vmul.f32 %v5584_v23, %v5584_v23 }
 0x5e8   :  { %v751_v33 = vsel %vm150_vm2, %v735_v32, 0.0 }
 0x5e9   :  { %752 = vadd.xlane.f32.xlu1 %v751_v33  ;;  %703 = vadd.xlane.f32.xlu2 %v702_v34  ;;  %v689_v30 = vpop.xlane.xlu2 %688 }
 0x5ea   :  { %v716_v36 = vmul.f32 %v5550_v1, %v689_v30 }
 0x5ec   :  { %v5596_v37 = vsub.f32 %v5534_v49, %v716_v36  ;;  %v4144_v49 = vld [vmem:[%s7237_s8 + $0x80] sm:$0xf] }
 0x5ed   :  { %v4145_v53 = vor.u32 %v4905_v51, %v4144_v49  ;;  %v5688_v51 = vld [vmem:[%s7231_s5 + $0x5] ss:$0 sm:$0xff] }
 0x5ee   :  { %v736_v21 = vmul.f32 %v5596_v37, %v5596_v37 }
 0x5ef   :  { %1008 = vmatpush.bf16.msra.mxu2 %v4145_v53 }
 0x5f0   :  { %v754_v35 = vsel %vm150_vm2, %v736_v21, 0.0 }
 0x5f1   :  { %v692_v42 = vpop.xlane.xlu1 %691  ;;  %755 = vadd.xlane.f32.xlu1 %v754_v35 }
 0x5f2   :  { %v717_v14 = vmul.f32 %v5550_v1, %v692_v42 }
 0x5f3   :  { %1009 = vmatpush.bf16.msra.mxu2 %v4129_v3 }
 0x5f4   :  { %v5603_v43 = vsub.f32 %v5540_v44, %v717_v14  ;;  %v4146_v44 = vld [vmem:[%s7237_s8 + $0xc0] sm:$0xf0] }
 0x5f5   :  { %v4149_v55 = vor.u32 %v4903_v50, %v4146_v44 }
 0x5f6   :  { %v737_v28 = vmul.f32 %v5603_v43, %v5603_v43 }
 0x5f7   :  { %1042 = vmatpush.bf16.msrb.mxu3 %v4149_v55 }
 0x5f8   :  { %v757_v40 = vsel %vm150_vm2, %v737_v28, 0.0 }
 0x5f9   :  { %v695_v38 = vpop.xlane.xlu1 %694  ;;  %758 = vadd.xlane.f32.xlu0 %v757_v40 }
 0x5fa   :  { %v718_v45 = vmul.f32 %v5550_v1, %v695_v38 }
 0x5fb   :  { %1043 = vmatpush.bf16.msrb.mxu3 %v4133_v59 }
 0x5fc   :  { %v5610_v46 = vsub.f32 %v5546_v62, %v718_v45  ;;  %v4153_v62 = vor.u32 %v4906_v54, %v4152_v52 }
 0x5fe   :  { %v738_v41 = vmul.f32 %v5610_v46, %v5610_v46  ;;  %1076 = vmatpush.bf16.msra.mxu0 %v4153_v62 }
 0x600   :  { %v760_v48 = vsel %vm150_vm2, %v738_v41, 0.0 }
 0x601   :  { %761 = vadd.xlane.f32.xlu2 %v760_v48 }
 0x602   :  { %1077 = vmatpush.bf16.msra.mxu0 %v4137_v8 }
 0x625   :  { %v744_v47 = vpop.xlane.xlu0 %743 }
 0x626   :  { %v772_v63 = vmul.f32 %v744_v47, %v5550_v1 }
 0x628   :  { %v782_v56 = vadd.f32 1e-05, %v772_v63 }
 0x62a   :  { %5129 = vrsqrt.f32 %v782_v56  ;;  %vm798_vm6 = vweird.f32 %v782_v56 }
 0x62d   :  { %v698_v19 = vpop.xlane.xlu0 %697  ;;  %v747_v20 = vpop.xlane.xlu2 %746 }
 0x62e   :  { %v719_v10 = vmul.f32 %v5550_v1, %v698_v19  ;;  %v773_v39 = vmul.f32 %v747_v20, %v5550_v1 }
 0x630   :  { %v5130_v24 = vpop.eup %5129  ;;  %v5667_v11 = vsub.f32 %v5563_v13, %v719_v10  ;;  %v783_v18 = vadd.f32 1e-05, %v773_v39 }
 0x631   :  { %v793_v26 = vmul.f32 %v5130_v24, %v782_v56  ;;  %vm799_vm5 = vweird.f32 %v5130_v24 }
 0x632   :  { %5131 = vrsqrt.f32 %v783_v18  ;;  %v739_v27 = vmul.f32 %v5667_v11, %v5667_v11  ;;  %vm800_vm7 = vmor %vm798_vm6, %vm799_vm5  ;;  %vm808_vm9 = vweird.f32 %v783_v18 }
 0x633   :  { %v794_v29 = vmul.f32 %v5130_v24, %v793_v26 }
 0x634   :  { %v763_v16 = vsel %vm150_vm2, %v739_v27, 0.0 }
 0x635   :  { %v795_v32 = vmul.f32 0.5, %v794_v29  ;;  %v701_v33 = vpop.xlane.xlu0 %700  ;;  %764 = vadd.xlane.f32.xlu1 %v763_v16 }
 0x636   :  { %v720_v34 = vmul.f32 %v5550_v1, %v701_v33 }
 0x637   :  { %v796_v30 = vsub.f32 1.5, %v795_v32 }
 0x638   :  { %v5132_v36 = vpop.eup %5131  ;;  %v5674_v21 = vsub.f32 %v5572_v22, %v720_v34  ;;  %v5682_v22 = vld [vmem:[%s7231_s5 + $0x4] ss:$0 sm:$0xff] }
 0x639   :  { %v797_v13 = vmul.f32 %v5130_v24, %v796_v30  ;;  %v803_v35 = vmul.f32 %v5132_v36, %v783_v18  ;;  %vm809_vm8 = vweird.f32 %v5132_v36 }
 0x63a   :  { %v740_v42 = vmul.f32 %v5674_v21, %v5674_v21  ;;  %vm810_vm10 = vmor %vm808_vm9, %vm809_vm8 }
 0x63b   :  { %v804_v14 = vmul.f32 %v5132_v36, %v803_v35  ;;  %v801_v40 = vsel %vm800_vm7, %v5130_v24, %v797_v13 }
 0x63c   :  { %v766_v28 = vsel %vm150_vm2, %v740_v42, 0.0  ;;  %v892_v41 = vmul.f32 %v801_v40, %v5553_v9 }
 0x63d   :  { %v805_v38 = vmul.f32 0.5, %v804_v14  ;;  %767 = vadd.xlane.f32.xlu0 %v766_v28 }
 0x63e   :  { %v903_v50 = vmul.f32 %v5682_v22, %v892_v41 }
 0x63f   :  { %v806_v45 = vsub.f32 1.5, %v805_v38 }
 0x640   :  { %v5694_v52 = vadd.f32 %v5688_v51, %v903_v50 }
 0x641   :  { %v807_v48 = vmul.f32 %v5132_v36, %v806_v45 }
 0x642   :  { %7266 = vst [vmem:[#allocation3_spill] sm:$0xff] %v5694_v52 }
 0x643   :  { %v811_v49 = vsel %vm810_vm10, %v5132_v36, %v807_v48 }
 0x644   :  { %v893_v53 = vmul.f32 %v811_v49, %v5560_v12 }
 0x646   :  { %v904_v44 = vmul.f32 %v5682_v22, %v893_v53 }
 0x648   :  { %v5697_v9 = vadd.f32 %v5688_v51, %v904_v44 }
 0x64a   :  { %7267 = vst [vmem:[#allocation4_spill] sm:$0xff] %v5697_v9  ;;  %v5701_v54 = vpack.c.bf16 %v5697_v9, %v5694_v52 }
 0x64c   :  { %7268 = vst [vmem:[#allocation5_spill] sm:$0xff] %v5701_v54  ;;  %4158 = vmatmul.msk.bf16.vlgmr.msra.gmra.mxu2 %vm150_vm2, %v5701_v54  ;;  %4163 = vmatmul.msk.bf16.vlgmr.msrb.gmra.mxu3 %vm150_vm2, %v5701_v54 }
 0x64d   :  { %4168 = vmatmul.msk.bf16.vlgmr.msra.gmra.mxu0 %vm150_vm2, %v5701_v54  ;;  %4173 = vmatmul.msk.bf16.vlgmr.msrb.gmra.mxu1 %vm150_vm2, %v5701_v54 }
 0x654   :  { %v750_v12 = vpop.xlane.xlu2 %749 }
 0x655   :  { %v774_v55 = vmul.f32 %v750_v12, %v5550_v1 }
 0x657   :  { %v784_v62 = vadd.f32 1e-05, %v774_v55 }
 0x659   :  { %5133 = vrsqrt.f32 %v784_v62  ;;  %vm818_vm12 = vweird.f32 %v784_v62 }
 0x65c   :  { %v753_v57 = vpop.xlane.xlu1 %752  ;;  %v704_v58 = vpop.xlane.xlu2 %703 }
 0x65d   :  { %v775_v47 = vmul.f32 %v753_v57, %v5550_v1  ;;  %v721_v60 = vmul.f32 %v5550_v1, %v704_v58 }
 0x65f   :  { %v5134_v63 = vpop.eup %5133  ;;  %v785_v61 = vadd.f32 1e-05, %v775_v47  ;;  %v5715_v0 = vsub.f32 %v5587_v31, %v721_v60 }
 0x660   :  { %v813_v2 = vmul.f32 %v5134_v63, %v784_v62  ;;  %vm819_vm11 = vweird.f32 %v5134_v63 }
 0x661   :  { %5135 = vrsqrt.f32 %v785_v61  ;;  %v741_v3 = vmul.f32 %v5715_v0, %v5715_v0  ;;  %vm820_vm13 = vmor %vm818_vm12, %vm819_vm11  ;;  %vm828_vm15 = vweird.f32 %v785_v61 }
 0x662   :  { %v814_v5 = vmul.f32 %v5134_v63, %v813_v2 }
 0x663   :  { %v769_v6 = vsel %vm150_vm2, %v741_v3, 0.0 }
 0x664   :  { %v815_v7 = vmul.f32 0.5, %v814_v5  ;;  %v756_v56 = vpop.xlane.xlu1 %755  ;;  %770 = vadd.xlane.f32.xlu2 %v769_v6 }
 0x665   :  { %v776_v59 = vmul.f32 %v756_v56, %v5550_v1  ;;  %v4945_v56 = vld [vmem:[%s7237_s8 + $0xcc] sm:$0xf0] }
 0x666   :  { %v816_v8 = vsub.f32 1.5, %v815_v7  ;;  %v4196_v7 = vld [vmem:[%s7237_s8 + $0x90] sm:$0xf] }
 0x667   :  { %v5136_v15 = vpop.eup %5135  ;;  %v786_v17 = vadd.f32 1e-05, %v776_v59 }
 0x668   :  { %v817_v4 = vmul.f32 %v5134_v63, %v816_v8  ;;  %v823_v31 = vmul.f32 %v5136_v15, %v785_v61  ;;  %vm829_vm14 = vweird.f32 %v5136_v15  ;;  %v4197_v8 = vor.u32 %v4945_v56, %v4196_v7 }
 0x669   :  { %5137 = vrsqrt.f32 %v786_v17  ;;  %vm830_vm0 = vmor %vm828_vm15, %vm829_vm14  ;;  %vm838_vm3 = vweird.f32 %v786_v17 }
 0x66a   :  { %v824_v19 = vmul.f32 %v5136_v15, %v823_v31  ;;  %v821_v20 = vsel %vm820_vm13, %v5134_v63, %v817_v4  ;;  %1326 = vmatpush.bf16.msrb.mxu2 %v4197_v8 }
 0x66b   :  { %v894_v27 = vmul.f32 %v821_v20, %v5577_v25 }
 0x66c   :  { %v825_v10 = vmul.f32 0.5, %v824_v19  ;;  %v759_v39 = vpop.xlane.xlu0 %758 }
 0x66d   :  { %v777_v24 = vmul.f32 %v759_v39, %v5550_v1  ;;  %v905_v30 = vmul.f32 %v5682_v22, %v894_v27 }
 0x66e   :  { %v826_v18 = vsub.f32 1.5, %v825_v10 }
 0x66f   :  { %v5138_v26 = vpop.eup %5137  ;;  %v787_v29 = vadd.f32 1e-05, %v777_v24  ;;  %v5727_v28 = vadd.f32 %v5688_v51, %v905_v30 }
 0x670   :  { %v827_v16 = vmul.f32 %v5136_v15, %v826_v18  ;;  %v833_v32 = vmul.f32 %v5138_v26, %v786_v17  ;;  %vm839_vm1 = vweird.f32 %v5138_v26  ;;  %v4198_v17 = vld [vmem:[%s7237_s8 + $0xd0] sm:$0xf0] }
 0x671   :  { %5139 = vrsqrt.f32 %v787_v29  ;;  %7269 = vst [vmem:[#allocation6_spill] sm:$0xff] %v5727_v28  ;;  %vm840_vm4 = vmor %vm838_vm3, %vm839_vm1  ;;  %vm848_vm6 = vweird.f32 %v787_v29 }
 0x672   :  { %v831_v33 = vsel %vm830_vm0, %v5136_v15, %v827_v16  ;;  %v834_v34 = vmul.f32 %v5138_v26, %v833_v32  ;;  %v4943_v15 = vld [vmem:[%s7237_s8 + $0x94] sm:$0xf] }
 0x673   :  { %v895_v36 = vmul.f32 %v831_v33, %v5584_v23  ;;  %v4201_v4 = vor.u32 %v4943_v15, %v4198_v17 }
 0x674   :  { %v835_v13 = vmul.f32 0.5, %v834_v34 }
 0x675   :  { %v906_v35 = vmul.f32 %v5682_v22, %v895_v36  ;;  %1360 = vmatpush.bf16.msra.mxu3 %v4201_v4 }
 0x676   :  { %v836_v42 = vsub.f32 1.5, %v835_v13 }
 0x677   :  { %v5140_v14 = vpop.eup %5139  ;;  %v5730_v25 = vadd.f32 %v5688_v51, %v906_v35 }
 0x678   :  { %v837_v40 = vmul.f32 %v5138_v26, %v836_v42  ;;  %v843_v38 = vmul.f32 %v5140_v14, %v787_v29  ;;  %vm849_vm5 = vweird.f32 %v5140_v14 }
 0x679   :  { %7270 = vst [vmem:[#allocation7_spill] sm:$0xff] %v5730_v25  ;;  %v5734_v45 = vpack.c.bf16 %v5730_v25, %v5727_v28  ;;  %vm850_vm7 = vmor %vm848_vm6, %vm849_vm5 }
 0x67a   :  { %v844_v23 = vmul.f32 %v5140_v14, %v843_v38  ;;  %v841_v41 = vsel %vm840_vm4, %v5138_v26, %v837_v40  ;;  %v4204_v40 = vld [vmem:[%s7237_s8 + $0x98] sm:$0xf] }
 0x67b   :  { %7271 = vst [vmem:[#allocation8_spill] sm:$0xff] %v5734_v45  ;;  %4159 = vmatmul.msk.bf16.gmra.mxu2 %vm150_vm2, %v5734_v45  ;;  %4164 = vmatmul.msk.bf16.gmra.mxu3 %vm150_vm2, %v5734_v45  ;;  %v896_v50 = vmul.f32 %v841_v41, %v5596_v37  ;;  %v762_v37 = vpop.xlane.xlu2 %761  ;;  %v4946_v38 = vld [vmem:[%s7237_s8 + $0xd4] sm:$0xf0]  ;;  %v4944_v41 = vld [vmem:[%s7237_s8 + $0x9c] sm:$0xf] }
 0x67c   :  { %v845_v48 = vmul.f32 0.5, %v844_v23  ;;  %4169 = vmatmul.msk.bf16.gmra.mxu0 %vm150_vm2, %v5734_v45  ;;  %4174 = vmatmul.msk.bf16.gmra.mxu1 %vm150_vm2, %v5734_v45  ;;  %v4205_v23 = vor.u32 %v4946_v38, %v4204_v40  ;;  %v4978_v40 = vld [vmem:[%s7238_s10 + $0x1f8] sm:$0xff]  ;;  %v4952_v38 = vld [vmem:[%s7238_s10 + $0x128] sm:$0xff] }
 0x67d   :  { %v907_v12 = vmul.f32 %v5682_v22, %v896_v50 }
 0x67e   :  { %v846_v49 = vsub.f32 1.5, %v845_v48  ;;  %v4206_v48 = vld [vmem:[%s7237_s8 + $0xd8] sm:$0xf0]  ;;  %1394 = vmatpush.bf16.msrb.mxu0 %v4205_v23  ;;  %v4960_v23 = vld [vmem:[%s7238_s10 + $0x168] sm:$0xff] }
 0x67f   :  { %v5749_v57 = vadd.f32 %v5688_v51, %v907_v12  ;;  %v4209_v50 = vor.u32 %v4944_v41, %v4206_v48  ;;  %v4182_v12 = vld [vmem:[%s7237_s8 + $0x50] sm:$0xf0] }
 0x680   :  { %v847_v53 = vmul.f32 %v5140_v14, %v846_v49  ;;  %v4180_v49 = vld [vmem:[%s7237_s8 + $0x10] sm:$0xf] }
 0x681   :  { %7272 = vst [vmem:[#allocation9_spill] sm:$0xff] %v5749_v57  ;;  %1428 = vmatpush.bf16.msra.mxu1 %v4209_v50  ;;  %v4977_v50 = vld [vmem:[%s7238_s10 + $0x1f0] sm:$0xff] }
 0x682   :  { %v851_v44 = vsel %vm850_vm7, %v5140_v14, %v847_v53  ;;  %v4941_v53 = vld [vmem:[%s7237_s8 + $0x4c] sm:$0xf0] }
 0x683   :  { %v897_v55 = vmul.f32 %v851_v44, %v5603_v43  ;;  %v778_v43 = vmul.f32 %v762_v37, %v5550_v1  ;;  %v4939_v44 = vld [vmem:[%s7237_s8 + $0x14] sm:$0xf]  ;;  %v4181_v37 = vor.u32 %v4941_v53, %v4180_v49 }
 0x684   :  { %v4969_v49 = vld [vmem:[%s7238_s10 + $0x1b0] sm:$0xff] }
 0x685   :  { %v908_v62 = vmul.f32 %v5682_v22, %v897_v55  ;;  %v788_v60 = vadd.f32 1e-05, %v778_v43  ;;  %v4185_v43 = vor.u32 %v4939_v44, %v4182_v12  ;;  %1327 = vmatpush.bf16.msrb.mxu2 %v4181_v37  ;;  %v4951_v12 = vld [vmem:[%s7238_s10 + $0x120] sm:$0xff] }
 0x687   :  { %v5752_v58 = vadd.f32 %v5688_v51, %v908_v62  ;;  %5141 = vrsqrt.f32 %v788_v60  ;;  %vm858_vm9 = vweird.f32 %v788_v60  ;;  %1361 = vmatpush.bf16.msra.mxu3 %v4185_v43 }
 0x689   :  { %7273 = vst [vmem:[#allocation10_spill] sm:$0xff] %v5752_v58  ;;  %v5756_v47 = vpack.c.bf16 %v5752_v58, %v5749_v57 }
 0x68b   :  { %7274 = vst [vmem:[#allocation11_spill] sm:$0xff] %v5756_v47  ;;  %4160 = vmatmul.msk.bf16.gmra.mxu2 %vm150_vm2, %v5756_v47  ;;  %4165 = vmatmul.msk.bf16.gmra.mxu3 %vm150_vm2, %v5756_v47 }
 0x68c   :  { %4170 = vmatmul.msk.bf16.gmra.mxu0 %vm150_vm2, %v5756_v47  ;;  %4175 = vmatmul.msk.bf16.gmra.mxu1 %vm150_vm2, %v5756_v47 }
 0x68d   :  { %v5142_v63 = vpop.eup %5141 }
 0x68e   :  { %v853_v61 = vmul.f32 %v5142_v63, %v788_v60  ;;  %vm859_vm8 = vweird.f32 %v5142_v63 }
 0x68f   :  { %vm860_vm10 = vmor %vm858_vm9, %vm859_vm8 }
 0x690   :  { %v854_v2 = vmul.f32 %v5142_v63, %v853_v61 }
 0x692   :  { %v855_v59 = vmul.f32 0.5, %v854_v2 }
 0x694   :  { %v856_v31 = vsub.f32 1.5, %v855_v59  ;;  %v4190_v59 = vld [vmem:[%s7237_s8 + $0x58] sm:$0xf0] }
 0x696   :  { %v857_v20 = vmul.f32 %v5142_v63, %v856_v31 }
 0x698   :  { %v861_v24 = vsel %vm860_vm10, %v5142_v63, %v857_v20 }
 0x699   :  { %v898_v27 = vmul.f32 %v861_v24, %v5610_v46 }
 0x69b   :  { %v909_v32 = vmul.f32 %v5682_v22, %v898_v27 }
 0x69d   :  { %v5785_v36 = vadd.f32 %v5688_v51, %v909_v32 }
 0x69f   :  { %7275 = vst [vmem:[#allocation12_spill] sm:$0xff] %v5785_v36 }
 0x6a8   :  { %v765_v3 = vpop.xlane.xlu1 %764 }
 0x6a9   :  { %v779_v5 = vmul.f32 %v765_v3, %v5550_v1  ;;  %v4188_v3 = vld [vmem:[%s7237_s8 + $0x18] sm:$0xf] }
 0x6ab   :  { %v789_v6 = vadd.f32 1e-05, %v779_v5  ;;  %v4942_v5 = vld [vmem:[%s7237_s8 + $0x54] sm:$0xf0] }
 0x6ac   :  { %v4189_v56 = vor.u32 %v4942_v5, %v4188_v3 }
 0x6ad   :  { %5143 = vrsqrt.f32 %v789_v6  ;;  %vm868_vm12 = vweird.f32 %v789_v6 }
 0x6ae   :  { %1395 = vmatpush.bf16.msrb.mxu0 %v4189_v56 }
 0x6b0   :  { %v768_v34 = vpop.xlane.xlu0 %767 }
 0x6b1   :  { %v780_v35 = vmul.f32 %v768_v34, %v5550_v1  ;;  %v4962_v34 = vld [vmem:[%s7238_s10 + $0x178] sm:$0xff] }
 0x6b2   :  { %1806 = vmatpush.bf16.msrb.mxu3 %v4962_v34 }
 0x6b3   :  { %v5144_v19 = vpop.eup %5143  ;;  %v790_v42 = vadd.f32 1e-05, %v780_v35 }
 0x6b4   :  { %v863_v10 = vmul.f32 %v5144_v19, %v789_v6  ;;  %vm869_vm11 = vweird.f32 %v5144_v19  ;;  %v4940_v6 = vld [vmem:[%s7237_s8 + $0x1c] sm:$0xf] }
 0x6b5   :  { %vm870_vm13 = vmor %vm868_vm12, %vm869_vm11  ;;  %5145 = vrsqrt.f32 %v790_v42  ;;  %v4193_v17 = vor.u32 %v4940_v6, %v4190_v59  ;;  %vm878_vm15 = vweird.f32 %v790_v42  ;;  %v4968_v59 = vld [vmem:[%s7238_s10 + $0x1a8] sm:$0xff] }
 0x6b6   :  { %v864_v39 = vmul.f32 %v5144_v19, %v863_v10 }
 0x6b7   :  { %1429 = vmatpush.bf16.msra.mxu1 %v4193_v17  ;;  %v4958_v17 = vld [vmem:[%s7238_s10 + $0x158] sm:$0xff] }
 0x6b8   :  { %v865_v18 = vmul.f32 0.5, %v864_v39 }
 0x6ba   :  { %v866_v26 = vsub.f32 1.5, %v865_v18 }
 0x6bb   :  { %1874 = vmatpush.bf16.msrb.mxu1 %v4978_v40  ;;  %v4972_v40 = vld [vmem:[%s7238_s10 + $0x1c8] sm:$0xff] }
 0x6bc   :  { %v867_v29 = vmul.f32 %v5144_v19, %v866_v26 }
 0x6be   :  { %v871_v16 = vsel %vm870_vm13, %v5144_v19, %v867_v29 }
 0x6bf   :  { %v899_v33 = vmul.f32 %v871_v16, %v5667_v11  ;;  %v5146_v11 = vpop.eup %5145  ;;  %1875 = vmatpush.bf16.msrb.mxu1 %v4977_v50  ;;  %v4971_v50 = vld [vmem:[%s7238_s10 + $0x1c0] sm:$0xff] }
 0x6c0   :  { %v873_v14 = vmul.f32 %v5146_v11, %v790_v42  ;;  %vm879_vm14 = vweird.f32 %v5146_v11  ;;  %v4953_v42 = vld [vmem:[%s7238_s10 + $0x130] sm:$0xff] }
 0x6c1   :  { %v910_v30 = vmul.f32 %v5682_v22, %v899_v33  ;;  %vm880_vm0 = vmor %vm878_vm15, %vm879_vm14  ;;  %v4954_v33 = vld [vmem:[%s7238_s10 + $0x138] sm:$0xff] }
 0x6c2   :  { %v874_v55 = vmul.f32 %v5146_v11, %v873_v14  ;;  %1772 = vmatpush.bf16.msra.mxu2 %v4954_v33  ;;  %v4970_v14 = vld [vmem:[%s7238_s10 + $0x1b8] sm:$0xff] }
 0x6c3   :  { %v5788_v13 = vadd.f32 %v5688_v51, %v910_v30  ;;  %1840 = vmatpush.bf16.msra.mxu0 %v4970_v14  ;;  %v4964_v14 = vld [vmem:[%s7238_s10 + $0x188] sm:$0xff] }
 0x6c4   :  { %v875_v61 = vmul.f32 0.5, %v874_v55  ;;  %v4959_v55 = vld [vmem:[%s7238_s10 + $0x160] sm:$0xff] }
 0x6c5   :  { %7276 = vst [vmem:[#allocation13_spill] sm:$0xff] %v5788_v13  ;;  %v5793_v46 = vpack.c.bf16 %v5788_v13, %v5785_v36 }
 0x6c6   :  { %v876_v2 = vsub.f32 1.5, %v875_v61  ;;  %1773 = vmatpush.bf16.msra.mxu2 %v4953_v42  ;;  %v4949_v42 = vld [vmem:[%s7238_s10 + $0x110] sm:$0xff] }
 0x6c7   :  { %7277 = vst [vmem:[#allocation14_spill] sm:$0xff] %v5793_v46  ;;  %4161 = vmatmul.msk.bf16.gmra.mxu2 %vm150_vm2, %v5793_v46  ;;  %4166 = vmatmul.msk.bf16.gmra.mxu3 %vm150_vm2, %v5793_v46 }
 0x6c8   :  { %4171 = vmatmul.msk.bf16.gmra.mxu0 %vm150_vm2, %v5793_v46  ;;  %4176 = vmatmul.msk.bf16.gmra.mxu1 %vm150_vm2, %v5793_v46  ;;  %v877_v8 = vmul.f32 %v5146_v11, %v876_v2 }
 0x6c9   :  { %1841 = vmatpush.bf16.msra.mxu0 %v4969_v49  ;;  %v4963_v49 = vld [vmem:[%s7238_s10 + $0x180] sm:$0xff] }
 0x6ca   :  { %v881_v31 = vsel %vm880_vm0, %v5146_v11, %v877_v8  ;;  %v4961_v11 = vld [vmem:[%s7238_s10 + $0x170] sm:$0xff]  ;;  %1774 = vmatpush.bf16.msra.mxu2 %v4952_v38  ;;  %v4976_v8 = vld [vmem:[%s7238_s10 + $0x1e8] sm:$0xff] }
 0x6cb   :  { %v900_v10 = vmul.f32 %v881_v31, %v5674_v21  ;;  %v5886_v21 = vpop.f32.mrf.mxu0  ;;  %1807 = vmatpush.bf16.msrb.mxu3 %v4961_v11  ;;  %1876 = vmatpush.bf16.msrb.mxu1 %v4976_v8  ;;  %v4975_v31 = vld [vmem:[%s7238_s10 + $0x1e0] sm:$0xff]  ;;  %v4957_v11 = vld [vmem:[%s7238_s10 + $0x150] sm:$0xff] }
 0x6cd   :  { %v911_v18 = vmul.f32 %v5682_v22, %v900_v10  ;;  %1842 = vmatpush.bf16.msra.mxu0 %v4968_v59  ;;  %v4956_v59 = vld [vmem:[%s7238_s10 + $0x148] sm:$0xff] }
 0x6ce   :  { %1775 = vmatpush.bf16.msra.mxu2 %v4951_v12  ;;  %v937_v12 = vld [vmem:[%s7239_s9] sm:$0xf] }
 0x6cf   :  { %v5845_v29 = vadd.f32 %v5688_v51, %v911_v18  ;;  %1808 = vmatpush.bf16.msrb.mxu3 %v4960_v23  ;;  %1877 = vmatpush.bf16.msrb.mxu1 %v4975_v31  ;;  %v4974_v18 = vld [vmem:[%s7238_s10 + $0x1d8] sm:$0xff] }
 0x6d1   :  { %7278 = vst [vmem:[#allocation15_spill] sm:$0xff] %v5845_v29 }
 0x6d3   :  { %v5900_v30 = vpop.f32.mrf.mxu0  ;;  %1809 = vmatpush.bf16.msrb.mxu3 %v4959_v55  ;;  %1878 = vmatpush.bf16.msrb.mxu1 %v4974_v18  ;;  %v4948_v55 = vld [vmem:[%s7238_s10 + $0x108] sm:$0xff]  ;;  %v4947_v18 = vld [vmem:[%s7238_s10 + $0x100] sm:$0xff] }
 0x6d7   :  { %v771_v62 = vpop.xlane.xlu2 %770  ;;  %1810 = vmatpush.bf16.msrb.mxu3 %v4958_v17  ;;  %v6059_v17 = vperm.slane %v937_v12, 2 }
 0x6d8   :  { %v781_v60 = vmul.f32 %v771_v62, %v5550_v1 }
 0x6da   :  { %v791_v63 = vadd.f32 1e-05, %v781_v60 }
 0x6db   :  { %1811 = vmatpush.bf16.msrb.mxu3 %v4957_v11  ;;  %v6071_v11 = vperm.slane %v937_v12, 0 }
 0x6dc   :  { %5147 = vrsqrt.f32 %v791_v63  ;;  %vm888_vm3 = vweird.f32 %v791_v63 }
 0x6df   :  { %1812 = vmatpush.bf16.msrb.mxu3 %v4956_v59 }
 0x6e2   :  { %v5148_v7 = vpop.eup %5147 }
 0x6e3   :  { %v883_v15 = vmul.f32 %v5148_v7, %v791_v63  ;;  %vm889_vm1 = vweird.f32 %v5148_v7 }
 0x6e4   :  { %vm890_vm4 = vmor %vm888_vm3, %vm889_vm1 }
 0x6e5   :  { %v884_v4 = vmul.f32 %v5148_v7, %v883_v15  ;;  %v4950_v15 = vld [vmem:[%s7238_s10 + $0x118] sm:$0xff] }
 0x6e6   :  { %1776 = vmatpush.bf16.msra.mxu2 %v4950_v15 }
 0x6e7   :  { %v885_v19 = vmul.f32 0.5, %v884_v4  ;;  %v4967_v4 = vld [vmem:[%s7238_s10 + $0x1a0] sm:$0xff] }
 0x6e8   :  { %1843 = vmatpush.bf16.msra.mxu0 %v4967_v4  ;;  %v6061_v4 = vperm.slane %v937_v12, 3 }
 0x6e9   :  { %v886_v20 = vsub.f32 1.5, %v885_v19 }
 0x6ea   :  { %1777 = vmatpush.bf16.msra.mxu2 %v4949_v42 }
 0x6eb   :  { %v887_v39 = vmul.f32 %v5148_v7, %v886_v20 }
 0x6ed   :  { %v891_v24 = vsel %vm890_vm4, %v5148_v7, %v887_v39 }
 0x6ee   :  { %v901_v26 = vmul.f32 %v891_v24, %v5715_v0  ;;  %v5892_v0 = vpop.f32.mrf.mxu3  ;;  %v4966_v24 = vld [vmem:[%s7238_s10 + $0x198] sm:$0xff]  ;;  %1778 = vmatpush.bf16.msra.mxu2 %v4948_v55 }
 0x6ef   :  { %1844 = vmatpush.bf16.msra.mxu0 %v4966_v24 }
 0x6f0   :  { %v912_v27 = vmul.f32 %v5682_v22, %v901_v26  ;;  %v5888_v22 = vpop.f32.mrf.mxu1  ;;  %v4965_v26 = vld [vmem:[%s7238_s10 + $0x190] sm:$0xff] }
 0x6f2   :  { %v5848_v16 = vadd.f32 %v5688_v51, %v912_v27  ;;  %v5890_v51 = vpop.f32.mrf.mxu2  ;;  %v4973_v27 = vld [vmem:[%s7238_s10 + $0x1d0] sm:$0xff]  ;;  %1779 = vmatpush.bf16.msra.mxu2 %v4947_v18 }
 0x6f3   :  { %1845 = vmatpush.bf16.msra.mxu0 %v4965_v26  ;;  %1879 = vmatpush.bf16.msrb.mxu1 %v4973_v27  ;;  %v4955_v26 = vld [vmem:[%s7238_s10 + $0x140] sm:$0xff] }
 0x6f4   :  { %7279 = vst [vmem:[#allocation16_spill] sm:$0xff] %v5848_v16  ;;  %v5852_v32 = vpack.c.bf16 %v5848_v16, %v5845_v29  ;;  %1813 = vmatpush.bf16.msrb.mxu3 %v4955_v26 }
 0x6f6   :  { %7280 = vst [vmem:[#allocation17_spill] sm:$0xff] %v5852_v32  ;;  %4162 = vmatmul.msk.bf16.gmra.mxu2 %vm150_vm2, %v5852_v32  ;;  %4167 = vmatmul.msk.bf16.gmra.mxu3 %vm150_vm2, %v5852_v32  ;;  %v5932_v48 = vpop.f32.mrf.mxu3 }
 0x6f7   :  { %4172 = vmatmul.msk.bf16.gmra.mxu0 %vm150_vm2, %v5852_v32  ;;  %4177 = vmatmul.msk.bf16.gmra.mxu1 %vm150_vm2, %v5852_v32 }
 0x6f8   :  { %v5902_v35 = vpop.f32.mrf.mxu1  ;;  %1846 = vmatpush.bf16.msra.mxu0 %v4964_v14  ;;  %1880 = vmatpush.bf16.msrb.mxu1 %v4972_v40  ;;  %v6073_v14 = vperm.slane %v937_v12, 1 }
 0x6f9   :  { %v5940_v53 = vpop.f32.mrf.mxu0 }
 0x6fa   :  { %v5930_v41 = vpop.f32.mrf.mxu2 }
 0x6fc   :  { %1847 = vmatpush.bf16.msra.mxu0 %v4963_v49  ;;  %1881 = vmatpush.bf16.msrb.mxu1 %v4971_v50 }
 0x6fe   :  { %v5952_v37 = vpop.f32.mrf.mxu3 }
 0x700   :  { %v5942_v44 = vpop.f32.mrf.mxu1 }
 0x701   :  { %v5954_v43 = vpop.f32.mrf.mxu0 }
 0x702   :  { %v5950_v62 = vpop.f32.mrf.mxu2 }
 0x706   :  { %4210 = vmatmul.msk.bf16.vlgmr.msrb.gmra.mxu2 %vm150_vm2, %v5701_v54  ;;  %4215 = vmatmul.msk.bf16.vlgmr.msra.gmra.mxu3 %vm150_vm2, %v5701_v54  ;;  %v5968_v61 = vpop.f32.mrf.mxu3 }
 0x707   :  { %4220 = vmatmul.msk.bf16.vlgmr.msrb.gmra.mxu0 %vm150_vm2, %v5701_v54  ;;  %4225 = vmatmul.msk.bf16.vlgmr.msra.gmra.mxu1 %vm150_vm2, %v5701_v54 }
 0x708   :  { %v5956_v60 = vpop.f32.mrf.mxu1 }
 0x709   :  { %v5970_v2 = vpop.f32.mrf.mxu0 }
 0x70a   :  { %v5966_v63 = vpop.f32.mrf.mxu2 }
 0x70e   :  { %v5976_v6 = vpop.f32.mrf.mxu3 }
 0x710   :  { %v5972_v3 = vpop.f32.mrf.mxu1 }
 0x711   :  { %v5978_v7 = vpop.f32.mrf.mxu0 }
 0x712   :  { %v5974_v5 = vpop.f32.mrf.mxu2 }
 0x716   :  { %4211 = vmatmul.msk.bf16.gmra.mxu2 %vm150_vm2, %v5734_v45  ;;  %4216 = vmatmul.msk.bf16.gmra.mxu3 %vm150_vm2, %v5734_v45  ;;  %v6002_v20 = vpop.f32.mrf.mxu3 }
 0x717   :  { %4221 = vmatmul.msk.bf16.gmra.mxu0 %vm150_vm2, %v5734_v45  ;;  %4226 = vmatmul.msk.bf16.gmra.mxu1 %vm150_vm2, %v5734_v45 }
 0x718   :  { %v5980_v56 = vpop.f32.mrf.mxu1 }
 0x71a   :  { %v6000_v19 = vpop.f32.mrf.mxu2 }
 0x726   :  { %4212 = vmatmul.msk.bf16.gmra.mxu2 %vm150_vm2, %v5756_v47  ;;  %4217 = vmatmul.msk.bf16.gmra.mxu3 %vm150_vm2, %v5756_v47 }
 0x727   :  { %4222 = vmatmul.msk.bf16.gmra.mxu0 %vm150_vm2, %v5756_v47  ;;  %4227 = vmatmul.msk.bf16.gmra.mxu1 %vm150_vm2, %v5756_v47 }
 0x736   :  { %4213 = vmatmul.msk.bf16.gmra.mxu2 %vm150_vm2, %v5793_v46  ;;  %4218 = vmatmul.msk.bf16.gmra.mxu3 %vm150_vm2, %v5793_v46 }
 0x737   :  { %4223 = vmatmul.msk.bf16.gmra.mxu0 %vm150_vm2, %v5793_v46  ;;  %4228 = vmatmul.msk.bf16.gmra.mxu1 %vm150_vm2, %v5793_v46 }
 0x745   :  { %v6004_v10 = vpop.f32.mrf.mxu0  ;;  %v6006_v39 = vpop.f32.mrf.mxu1 }
 0x746   :  { %4214 = vmatmul.msk.bf16.gmra.mxu2 %vm150_vm2, %v5852_v32  ;;  %4219 = vmatmul.msk.bf16.gmra.mxu3 %vm150_vm2, %v5852_v32 }
 0x747   :  { %4224 = vmatmul.msk.bf16.gmra.mxu0 %vm150_vm2, %v5852_v32  ;;  %4229 = vmatmul.msk.bf16.gmra.mxu1 %vm150_vm2, %v5852_v32 }
 0x74a   :  { %v6020_v33 = vpop.f32.mrf.mxu2  ;;  %v6022_v34 = vpop.f32.mrf.mxu3 }
 0x74d   :  { %v6036_v38 = vpop.f32.mrf.mxu0  ;;  %v6038_v23 = vpop.f32.mrf.mxu1 }
 0x752   :  { %v6055_v8 = vpop.f32.mrf.mxu2  ;;  %v6057_v15 = vpop.f32.mrf.mxu3 }
 0x774   :  { %v1099_v31 = vpop.f32.mrf.mxu0  ;;  %v1133_v24 = vpop.f32.mrf.mxu1 }
 0x775   :  { %v1100_v27 = vadd.f32 %v1099_v31, %v6059_v17  ;;  %v1134_v42 = vadd.f32 %v1133_v24, %v6061_v4 }
 0x777   :  { %v1172_v13 = vmax.f32 %v1100_v27, 0.0  ;;  %v1173_v24 = vmax.f32 %v1134_v42, 0.0 }
 0x779   :  { %v1031_v40 = vpop.f32.mrf.mxu2  ;;  %v1065_v49 = vpop.f32.mrf.mxu3 }
 0x77a   :  { %v1032_v50 = vadd.f32 %v1031_v40, %v6071_v11  ;;  %v1066_v55 = vadd.f32 %v1065_v49, %v6073_v14 }
 0x77c   :  { %v1101_v59 = vpop.f32.mrf.mxu0  ;;  %v1135_v16 = vpop.f32.mrf.mxu1  ;;  %v1170_v57 = vmax.f32 %v1032_v50, 0.0 }
 0x77d   :  { %v1102_v29 = vadd.f32 %v1101_v59, %v6059_v17  ;;  %v1136_v31 = vadd.f32 %v1135_v16, %v6061_v4  ;;  %v1270_v59 = vld [vmem:[%s7239_s9 + $0x4] sm:$0xf]  ;;  %v1171_v16 = vmax.f32 %v1066_v55, 0.0 }
 0x77e   :  { %v6098_v50 = vperm.slane %v1270_v59, 2  ;;  %v6100_v55 = vperm.slane %v1270_v59, 3  ;;  %v6104_v25 = vperm.slane %v1270_v59, 0  ;;  %v6106_v28 = vperm.slane %v1270_v59, 1 }
 0x77f   :  { %v1176_v18 = vmax.f32 %v1102_v29, 0.0  ;;  %v1177_v26 = vmax.f32 %v1136_v31, 0.0 }
 0x781   :  { %v1033_v1 = vpop.f32.mrf.mxu2  ;;  %v1067_v36 = vpop.f32.mrf.mxu3  ;;  %v6079_v12 = vpack.c.bf16 %v1176_v18, %v1172_v13  ;;  %v6081_v58 = vpack.c.bf16 %v1177_v26, %v1173_v24  ;;  %v4914_v13 = vld [vmem:[%s7238_s10 + $0x38] sm:$0xff] }
 0x782   :  { %v1034_v40 = vadd.f32 %v1033_v1, %v6071_v11  ;;  %v1068_v49 = vadd.f32 %v1067_v36, %v6073_v14  ;;  %v4922_v1 = vld [vmem:[%s7238_s10 + $0x78] sm:$0xff]  ;;  %2100 = vmatpush.bf16.msrb.mxu2 %v4914_v13 }
 0x783   :  { %2134 = vmatpush.bf16.msra.mxu3 %v4922_v1 }
 0x784   :  { %v1174_v27 = vmax.f32 %v1034_v40, 0.0  ;;  %v1175_v42 = vmax.f32 %v1068_v49, 0.0  ;;  %v1397_v29 = vpop.f32.mrf.mxu0  ;;  %v1431_v31 = vpop.f32.mrf.mxu1 }
 0x785   :  { %v1398_v40 = vadd.f32 %v1397_v29, %v6098_v50  ;;  %v1432_v49 = vadd.f32 %v1431_v31, %v6100_v55  ;;  %v4913_v29 = vld [vmem:[%s7238_s10 + $0x30] sm:$0xff] }
 0x786   :  { %v6094_v36 = vpack.c.bf16 %v1174_v27, %v1170_v57  ;;  %v6096_v24 = vpack.c.bf16 %v1175_v42, %v1171_v16  ;;  %v4921_v31 = vld [vmem:[%s7238_s10 + $0x70] sm:$0xff]  ;;  %2101 = vmatpush.bf16.msrb.mxu2 %v4913_v29 }
 0x787   :  { %v1458_v27 = vmax.f32 %v1398_v40, 0.0  ;;  %v1459_v42 = vmax.f32 %v1432_v49, 0.0  ;;  %2135 = vmatpush.bf16.msra.mxu3 %v4921_v31 }
 0x788   :  { %7281 = vst [vmem:[#allocation18_spill] sm:$0xff] %v6094_v36 }
 0x789   :  { %7282 = vst [vmem:[#allocation19_spill] sm:$0xff] %v6096_v24  ;;  %v1329_v18 = vpop.f32.mrf.mxu2  ;;  %v1363_v26 = vpop.f32.mrf.mxu3 }
 0x78a   :  { %v1330_v59 = vadd.f32 %v1329_v18, %v6104_v25  ;;  %v1364_v32 = vadd.f32 %v1363_v26, %v6106_v28 }
 0x78c   :  { %v1399_v13 = vpop.f32.mrf.mxu0  ;;  %v1433_v1 = vpop.f32.mrf.mxu1 }
 0x78d   :  { %v1400_v57 = vadd.f32 %v1399_v13, %v6098_v50  ;;  %v1434_v16 = vadd.f32 %v1433_v1, %v6100_v55 }
 0x78f   :  { %v1462_v9 = vmax.f32 %v1400_v57, 0.0  ;;  %v1463_v52 = vmax.f32 %v1434_v16, 0.0  ;;  %v1456_v57 = vmax.f32 %v1330_v59, 0.0  ;;  %v1457_v16 = vmax.f32 %v1364_v32, 0.0 }
 0x791   :  { %v1498_v46 = vpack.c.bf16 %v1462_v9, %v1458_v27  ;;  %v1499_v13 = vpack.c.bf16 %v1463_v52, %v1459_v42  ;;  %v1331_v47 = vpop.f32.mrf.mxu2  ;;  %v1365_v1 = vpop.f32.mrf.mxu3  ;;  %v4912_v52 = vld [vmem:[%s7238_s10 + $0x28] sm:$0xff] }
 0x792   :  { %v1332_v40 = vadd.f32 %v1331_v47, %v6104_v25  ;;  %v1366_v49 = vadd.f32 %v1365_v1, %v6106_v28  ;;  %v4920_v9 = vld [vmem:[%s7238_s10 + $0x68] sm:$0xff]  ;;  %v4930_v47 = vld [vmem:[%s7238_s10 + $0xb8] sm:$0xff]  ;;  %2102 = vmatpush.bf16.msrb.mxu2 %v4912_v52 }
 0x793   :  { %1848 = vmatmul.bf16.vlgmr.msra.gmra.mxu0 %v1498_v46  ;;  %1882 = vmatmul.bf16.vlgmr.msrb.gmra.mxu1 %v1499_v13  ;;  %v4938_v46 = vld [vmem:[%s7238_s10 + $0xf8] sm:$0xff] }
 0x794   :  { %v1460_v45 = vmax.f32 %v1332_v40, 0.0  ;;  %v1461_v54 = vmax.f32 %v1366_v49, 0.0  ;;  %v1402_v24 = vpop.f32.mrf.mxu0  ;;  %v1436_v18 = vpop.f32.mrf.mxu1  ;;  %2136 = vmatpush.bf16.msra.mxu3 %v4920_v9  ;;  %2168 = vmatpush.bf16.msrb.mxu0 %v4930_v47  ;;  %v4911_v49 = vld [vmem:[%s7238_s10 + $0x20] sm:$0xff] }
 0x795   :  { %v1403_v32 = vadd.f32 %v1402_v24, %v6098_v50  ;;  %2202 = vmatpush.bf16.msra.mxu1 %v4938_v46  ;;  %v1437_v27 = vadd.f32 %v1436_v18, %v6100_v55  ;;  %v4919_v24 = vld [vmem:[%s7238_s10 + $0x60] sm:$0xff] }
 0x796   :  { %v1496_v36 = vpack.c.bf16 %v1460_v45, %v1456_v57  ;;  %v1497_v26 = vpack.c.bf16 %v1461_v54, %v1457_v16  ;;  %v4929_v57 = vld [vmem:[%s7238_s10 + $0xb0] sm:$0xff]  ;;  %2103 = vmatpush.bf16.msrb.mxu2 %v4911_v49  ;;  %v4928_v49 = vld [vmem:[%s7238_s10 + $0xa8] sm:$0xff] }
 0x797   :  { %v1466_v59 = vmax.f32 %v1403_v32, 0.0  ;;  %v1467_v13 = vmax.f32 %v1437_v27, 0.0 }
 0x798   :  { %1780 = vmatmul.bf16.vlgmr.msra.gmra.mxu2 %v1496_v36  ;;  %1814 = vmatmul.bf16.vlgmr.msrb.gmra.mxu3 %v1497_v26 }
 0x799   :  { %v1334_v45 = vpop.f32.mrf.mxu2  ;;  %v1368_v54 = vpop.f32.mrf.mxu3  ;;  %2137 = vmatpush.bf16.msra.mxu3 %v4919_v24  ;;  %2169 = vmatpush.bf16.msrb.mxu0 %v4929_v57  ;;  %v4936_v24 = vld [vmem:[%s7238_s10 + $0xe8] sm:$0xff] }
 0x79a   :  { %v1335_v16 = vadd.f32 %v1334_v45, %v6104_v25  ;;  %v1369_v18 = vadd.f32 %v1368_v54, %v6106_v28  ;;  %v4937_v54 = vld [vmem:[%s7238_s10 + $0xf0] sm:$0xff] }
 0x79b   :  { %2203 = vmatpush.bf16.msra.mxu1 %v4937_v54 }
 0x79c   :  { %v1404_v42 = vpop.f32.mrf.mxu0  ;;  %v1438_v29 = vpop.f32.mrf.mxu1  ;;  %v1464_v27 = vmax.f32 %v1335_v16, 0.0 }
 0x79d   :  { %v1405_v31 = vadd.f32 %v1404_v42, %v6098_v50  ;;  %v1439_v36 = vadd.f32 %v1438_v29, %v6100_v55  ;;  %v1465_v42 = vmax.f32 %v1369_v18, 0.0  ;;  %2170 = vmatpush.bf16.msrb.mxu0 %v4928_v49 }
 0x79f   :  { %v1470_v1 = vmax.f32 %v1405_v31, 0.0  ;;  %v1471_v40 = vmax.f32 %v1439_v36, 0.0  ;;  %2204 = vmatpush.bf16.msra.mxu1 %v4936_v24 }
 0x7a1   :  { %v1336_v26 = vpop.f32.mrf.mxu2  ;;  %v1370_v52 = vpop.f32.mrf.mxu3  ;;  %v1502_v9 = vpack.c.bf16 %v1470_v1, %v1466_v59  ;;  %v1503_v47 = vpack.c.bf16 %v1471_v40, %v1467_v13 }
 0x7a2   :  { %v1337_v46 = vadd.f32 %v1336_v26, %v6104_v25  ;;  %v1371_v32 = vadd.f32 %v1370_v52, %v6106_v28  ;;  %v4910_v52 = vld [vmem:[%s7238_s10 + $0x18] sm:$0xff] }
 0x7a3   :  { %1853 = vmatmul.bf16.gmra.mxu0 %v1502_v9  ;;  %1887 = vmatmul.bf16.gmra.mxu1 %v1503_v47  ;;  %v4918_v9 = vld [vmem:[%s7238_s10 + $0x58] sm:$0xff] }
 0x7a4   :  { %v1468_v29 = vmax.f32 %v1337_v46, 0.0  ;;  %v1469_v31 = vmax.f32 %v1371_v32, 0.0  ;;  %v1407_v45 = vpop.f32.mrf.mxu0  ;;  %v1441_v36 = vpop.f32.mrf.mxu1  ;;  %2104 = vmatpush.bf16.msrb.mxu2 %v4910_v52  ;;  %2138 = vmatpush.bf16.msra.mxu3 %v4918_v9  ;;  %v4927_v32 = vld [vmem:[%s7238_s10 + $0xa0] sm:$0xff] }
 0x7a5   :  { %v1408_v57 = vadd.f32 %v1407_v45, %v6098_v50  ;;  %v1442_v16 = vadd.f32 %v1441_v36, %v6100_v55  ;;  %2171 = vmatpush.bf16.msrb.mxu0 %v4927_v32  ;;  %v4909_v32 = vld [vmem:[%s7238_s10 + $0x10] sm:$0xff] }
 0x7a6   :  { %v1500_v59 = vpack.c.bf16 %v1468_v29, %v1464_v27  ;;  %v1501_v13 = vpack.c.bf16 %v1469_v31, %v1465_v42  ;;  %v4935_v27 = vld [vmem:[%s7238_s10 + $0xe0] sm:$0xff] }
 0x7a7   :  { %v1474_v42 = vmax.f32 %v1408_v57, 0.0  ;;  %v1475_v29 = vmax.f32 %v1442_v16, 0.0  ;;  %2205 = vmatpush.bf16.msra.mxu1 %v4935_v27  ;;  %v4926_v57 = vld [vmem:[%s7238_s10 + $0x98] sm:$0xff]  ;;  %v4917_v27 = vld [vmem:[%s7238_s10 + $0x50] sm:$0xff] }
 0x7a8   :  { %1785 = vmatmul.bf16.gmra.mxu2 %v1500_v59  ;;  %1819 = vmatmul.bf16.gmra.mxu3 %v1501_v13 }
 0x7a9   :  { %v1339_v1 = vpop.f32.mrf.mxu2  ;;  %v1373_v40 = vpop.f32.mrf.mxu3  ;;  %2172 = vmatpush.bf16.msrb.mxu0 %v4926_v57  ;;  %2105 = vmatpush.bf16.msrb.mxu2 %v4909_v32 }
 0x7aa   :  { %v1340_v36 = vadd.f32 %v1339_v1, %v6104_v25  ;;  %v1374_v54 = vadd.f32 %v1373_v40, %v6106_v28  ;;  %v4934_v1 = vld [vmem:[%s7238_s10 + $0xd8] sm:$0xff]  ;;  %2139 = vmatpush.bf16.msra.mxu3 %v4917_v27 }
 0x7ab   :  { %2206 = vmatpush.bf16.msra.mxu1 %v4934_v1 }
 0x7ac   :  { %v1409_v18 = vpop.f32.mrf.mxu0  ;;  %v1443_v26 = vpop.f32.mrf.mxu1  ;;  %v1472_v40 = vmax.f32 %v1340_v36, 0.0  ;;  %v1473_v16 = vmax.f32 %v1374_v54, 0.0  ;;  %v4908_v36 = vld [vmem:[%s7238_s10 + $0x8] sm:$0xff] }
 0x7ad   :  { %v1410_v47 = vadd.f32 %v1409_v18, %v6098_v50  ;;  %v1444_v46 = vadd.f32 %v1443_v26, %v6100_v55  ;;  %2106 = vmatpush.bf16.msrb.mxu2 %v4908_v36 }
 0x7af   :  { %v1478_v31 = vmax.f32 %v1410_v47, 0.0  ;;  %v1479_v45 = vmax.f32 %v1444_v46, 0.0 }
 0x7b1   :  { %v1341_v59 = vpop.f32.mrf.mxu2  ;;  %v1375_v13 = vpop.f32.mrf.mxu3  ;;  %v1506_v49 = vpack.c.bf16 %v1478_v31, %v1474_v42  ;;  %v1507_v24 = vpack.c.bf16 %v1479_v45, %v1475_v29  ;;  %v4925_v42 = vld [vmem:[%s7238_s10 + $0x90] sm:$0xff] }
 0x7b2   :  { %v1342_v18 = vadd.f32 %v1341_v59, %v6104_v25  ;;  %v1376_v26 = vadd.f32 %v1375_v13, %v6106_v28  ;;  %v4933_v29 = vld [vmem:[%s7238_s10 + $0xd0] sm:$0xff]  ;;  %2173 = vmatpush.bf16.msrb.mxu0 %v4925_v42  ;;  %v4924_v13 = vld [vmem:[%s7238_s10 + $0x88] sm:$0xff] }
 0x7b3   :  { %1858 = vmatmul.bf16.gmra.mxu0 %v1506_v49  ;;  %1892 = vmatmul.bf16.gmra.mxu1 %v1507_v24  ;;  %v4932_v49 = vld [vmem:[%s7238_s10 + $0xc8] sm:$0xff] }
 0x7b4   :  { %v1476_v52 = vmax.f32 %v1342_v18, 0.0  ;;  %v1477_v9 = vmax.f32 %v1376_v26, 0.0  ;;  %v1412_v47 = vpop.f32.mrf.mxu0  ;;  %v1446_v46 = vpop.f32.mrf.mxu1  ;;  %2207 = vmatpush.bf16.msra.mxu1 %v4933_v29  ;;  %v4916_v24 = vld [vmem:[%s7238_s10 + $0x48] sm:$0xff] }
 0x7b5   :  { %v1413_v18 = vadd.f32 %v1412_v47, %v6098_v50  ;;  %v1447_v26 = vadd.f32 %v1446_v46, %v6100_v55  ;;  %2140 = vmatpush.bf16.msra.mxu3 %v4916_v24 }
 0x7b6   :  { %v1504_v31 = vpack.c.bf16 %v1476_v52, %v1472_v40  ;;  %v1505_v45 = vpack.c.bf16 %v1477_v9, %v1473_v16  ;;  %2174 = vmatpush.bf16.msrb.mxu0 %v4924_v13  ;;  %v4923_v52 = vld [vmem:[%s7238_s10 + $0x80] sm:$0xff] }
 0x7b7   :  { %v4931_v9 = vld [vmem:[%s7238_s10 + $0xc0] sm:$0xff]  ;;  %v1482_v47 = vmax.f32 %v1413_v18, 0.0  ;;  %v1483_v32 = vmax.f32 %v1447_v26, 0.0 }
 0x7b8   :  { %1790 = vmatmul.bf16.gmra.mxu2 %v1504_v31  ;;  %1824 = vmatmul.bf16.gmra.mxu3 %v1505_v45  ;;  %v4907_v18 = vld [vmem:[%s7238_s10] sm:$0xff] }
 0x7b9   :  { %v1344_v54 = vpop.f32.mrf.mxu2  ;;  %v1378_v59 = vpop.f32.mrf.mxu3  ;;  %2208 = vmatpush.bf16.msra.mxu1 %v4932_v49  ;;  %2107 = vmatpush.bf16.msrb.mxu2 %v4907_v18 }
 0x7ba   :  { %v1345_v42 = vadd.f32 %v1344_v54, %v6104_v25  ;;  %v1379_v29 = vadd.f32 %v1378_v59, %v6106_v28  ;;  %2175 = vmatpush.bf16.msrb.mxu0 %v4923_v52  ;;  %v4915_v54 = vld [vmem:[%s7238_s10 + $0x40] sm:$0xff] }
 0x7bb   :  { %2141 = vmatpush.bf16.msra.mxu3 %v4915_v54 }
 0x7bc   :  { %v1414_v57 = vpop.f32.mrf.mxu0  ;;  %v1448_v1 = vpop.f32.mrf.mxu1  ;;  %v1480_v59 = vmax.f32 %v1345_v42, 0.0  ;;  %v1481_v26 = vmax.f32 %v1379_v29, 0.0 }
 0x7bd   :  { %v1415_v40 = vadd.f32 %v1414_v57, %v6098_v50  ;;  %v1449_v16 = vadd.f32 %v1448_v1, %v6100_v55  ;;  %2209 = vmatpush.bf16.msra.mxu1 %v4931_v9 }
 0x7bf   :  { %v1486_v46 = vmax.f32 %v1415_v40, 0.0  ;;  %v1487_v27 = vmax.f32 %v1449_v16, 0.0 }
 0x7c1   :  { %v1346_v31 = vpop.f32.mrf.mxu2  ;;  %v1380_v45 = vpop.f32.mrf.mxu3  ;;  %v1510_v36 = vpack.c.bf16 %v1486_v46, %v1482_v47  ;;  %v1511_v13 = vpack.c.bf16 %v1487_v27, %v1483_v32  ;;  %v4504_v47 = vld [vmem:[%s7237_s8 + $0xa0] sm:$0xf]  ;;  %v4983_v46 = vld [vmem:[%s7237_s8 + $0xa4] sm:$0xf] }
 0x7c2   :  { %v1347_v49 = vadd.f32 %v1346_v31, %v6104_v25  ;;  %v1381_v24 = vadd.f32 %v1380_v45, %v6106_v28  ;;  %v4985_v32 = vld [vmem:[%s7237_s8 + $0xdc] sm:$0xf0]  ;;  %v4506_v31 = vld [vmem:[%s7237_s8 + $0xe0] sm:$0xf0] }
 0x7c3   :  { %1863 = vmatmul.bf16.gmra.mxu0 %v1510_v36  ;;  %1897 = vmatmul.bf16.gmra.mxu1 %v1511_v13  ;;  %v4505_v29 = vor.u32 %v4985_v32, %v4504_v47  ;;  %v4509_v45 = vor.u32 %v4983_v46, %v4506_v31 }
 0x7c4   :  { %v1484_v57 = vmax.f32 %v1347_v49, 0.0  ;;  %v1485_v1 = vmax.f32 %v1381_v24, 0.0  ;;  %v1417_v40 = vpop.f32.mrf.mxu0  ;;  %v1451_v16 = vpop.f32.mrf.mxu1 }
 0x7c5   :  { %v1418_v36 = vadd.f32 %v1417_v40, %v6098_v50  ;;  %v1452_v13 = vadd.f32 %v1451_v16, %v6100_v55  ;;  %2300 = vmatpush.bf16.msra.mxu2 %v4505_v29  ;;  %2334 = vmatpush.bf16.msrb.mxu3 %v4509_v45 }
 0x7c6   :  { %v1508_v52 = vpack.c.bf16 %v1484_v57, %v1480_v59  ;;  %v1509_v9 = vpack.c.bf16 %v1485_v1, %v1481_v26 }
 0x7c7   :  { %v1490_v59 = vmax.f32 %v1418_v36, 0.0  ;;  %v1491_v26 = vmax.f32 %v1452_v13, 0.0 }
 0x7c8   :  { %1795 = vmatmul.bf16.gmra.mxu2 %v1508_v52  ;;  %1829 = vmatmul.bf16.gmra.mxu3 %v1509_v9 }
 0x7c9   :  { %v1349_v27 = vpop.f32.mrf.mxu2  ;;  %v1383_v42 = vpop.f32.mrf.mxu3 }
 0x7ca   :  { %v1350_v52 = vadd.f32 %v1349_v27, %v6104_v25  ;;  %v1384_v9 = vadd.f32 %v1383_v42, %v6106_v28  ;;  %v1082_v27 = vadd.f32 %v5900_v30, %v6059_v17  ;;  %v1116_v42 = vadd.f32 %v5902_v35, %v6061_v4 }
 0x7cb   :  { %v1012_v30 = vadd.f32 %v5890_v51, %v6071_v11  ;;  %v1046_v35 = vadd.f32 %v5892_v0, %v6073_v14  ;;  %v4984_v51 = vld [vmem:[%s7237_s8 + $0xac] sm:$0xf] }
 0x7cc   :  { %v1419_v49 = vpop.f32.mrf.mxu0  ;;  %v1453_v24 = vpop.f32.mrf.mxu1 }
 0x7cd   :  { %v1420_v18 = vadd.f32 %v1419_v49, %v6098_v50  ;;  %v1454_v54 = vadd.f32 %v1453_v24, %v6100_v55  ;;  %v1488_v50 = vmax.f32 %v1350_v52, 0.0  ;;  %v1489_v55 = vmax.f32 %v1384_v9, 0.0 }
 0x7ce   :  { %v1144_v49 = vmax.f32 %v1082_v27, 0.0  ;;  %v1145_v24 = vmax.f32 %v1116_v42, 0.0  ;;  %v1138_v52 = vmax.f32 %v1012_v30, 0.0  ;;  %v1139_v0 = vmax.f32 %v1046_v35, 0.0  ;;  %v4490_v30 = vld [vmem:[%s7237_s8 + $0x60] sm:$0xf0] }
 0x7cf   :  { %v1494_v57 = vmax.f32 %v1420_v18, 0.0  ;;  %v1495_v1 = vmax.f32 %v1454_v54, 0.0  ;;  %v1014_v18 = vadd.f32 %v5930_v41, %v6071_v11  ;;  %v1048_v54 = vadd.f32 %v5932_v48, %v6073_v14  ;;  %v4512_v41 = vld [vmem:[%s7237_s8 + $0xa8] sm:$0xf] }
 0x7d0   :  { %v4986_v48 = vld [vmem:[%s7237_s8 + $0xe4] sm:$0xf0] }
 0x7d1   :  { %v1351_v47 = vpop.f32.mrf.mxu2  ;;  %v1385_v40 = vpop.f32.mrf.mxu3  ;;  %v1514_v32 = vpack.c.bf16 %v1494_v57, %v1490_v59  ;;  %v1515_v16 = vpack.c.bf16 %v1495_v1, %v1491_v26  ;;  %v1142_v1 = vmax.f32 %v1014_v18, 0.0  ;;  %v4513_v9 = vor.u32 %v4986_v48, %v4512_v41 }
 0x7d2   :  { %v1352_v46 = vadd.f32 %v1351_v47, %v6104_v25  ;;  %v1386_v29 = vadd.f32 %v1385_v40, %v6106_v28  ;;  %v1080_v25 = vadd.f32 %v5886_v21, %v6059_v17  ;;  %v1114_v28 = vadd.f32 %v5888_v22, %v6061_v4  ;;  %v4514_v47 = vld [vmem:[%s7237_s8 + $0xe8] sm:$0xf0] }
 0x7d3   :  { %1868 = vmatmul.bf16.gmra.mxu0 %v1514_v32  ;;  %1902 = vmatmul.bf16.gmra.mxu1 %v1515_v16  ;;  %v1143_v22 = vmax.f32 %v1048_v54, 0.0  ;;  %v4517_v40 = vor.u32 %v4984_v51, %v4514_v47  ;;  %v1178_v32 = vpack.c.bf16 %v1142_v1, %v1138_v52  ;;  %v1092_v54 = vadd.f32 %v5978_v7, %v6059_v17 }
 0x7d4   :  { %v1492_v31 = vmax.f32 %v1352_v46, 0.0  ;;  %v1493_v45 = vmax.f32 %v1386_v29, 0.0  ;;  %v1140_v59 = vmax.f32 %v1080_v25, 0.0  ;;  %v1141_v26 = vmax.f32 %v1114_v28, 0.0  ;;  %2368 = vmatpush.bf16.msra.mxu0 %v4513_v9 }
 0x7d5   :  { %v1179_v16 = vpack.c.bf16 %v1143_v22, %v1139_v0  ;;  %2402 = vmatpush.bf16.msrb.mxu1 %v4517_v40  ;;  %v1087_v46 = vadd.f32 %v5954_v43, %v6059_v17  ;;  %v1121_v29 = vadd.f32 %v5956_v60, %v6061_v4  ;;  %v1017_v43 = vadd.f32 %v5950_v62, %v6071_v11  ;;  %v4981_v62 = vld [vmem:[%s7237_s8 + $0x5c] sm:$0xf0] }
 0x7d6   :  { %v1512_v36 = vpack.c.bf16 %v1492_v31, %v1488_v50  ;;  %v1513_v13 = vpack.c.bf16 %v1493_v45, %v1489_v55  ;;  %v1180_v21 = vpack.c.bf16 %v1144_v49, %v1140_v59  ;;  %v1181_v57 = vpack.c.bf16 %v1145_v24, %v1141_v26 }
 0x7d7   :  { %v1085_v50 = vadd.f32 %v5940_v53, %v6059_v17  ;;  %v1119_v55 = vadd.f32 %v5942_v44, %v6061_v4  ;;  %v1152_v31 = vmax.f32 %v1087_v46, 0.0  ;;  %v1153_v45 = vmax.f32 %v1121_v29, 0.0 }
 0x7d8   :  { %1800 = vmatmul.bf16.gmra.mxu2 %v1512_v36  ;;  %1834 = vmatmul.bf16.gmra.mxu3 %v1513_v13  ;;  %v1019_v36 = vadd.f32 %v5966_v63, %v6071_v11  ;;  %v1053_v13 = vadd.f32 %v5968_v61, %v6073_v14  ;;  %v1051_v60 = vadd.f32 %v5952_v37, %v6073_v14  ;;  %v1146_v49 = vmax.f32 %v1017_v43, 0.0  ;;  %v4488_v61 = vld [vmem:[%s7237_s8 + $0x20] sm:$0xf]  ;;  %v4979_v37 = vld [vmem:[%s7237_s8 + $0x24] sm:$0xf] }
 0x7d9   :  { %v1148_v27 = vmax.f32 %v1085_v50, 0.0  ;;  %v1149_v42 = vmax.f32 %v1119_v55, 0.0  ;;  %v1126_v59 = vadd.f32 %v5980_v56, %v6061_v4  ;;  %v4489_v26 = vor.u32 %v4981_v62, %v4488_v61  ;;  %v4496_v50 = vld [vmem:[%s7237_s8 + $0x28] sm:$0xf] }
 0x7da   :  { %v1150_v28 = vmax.f32 %v1019_v36, 0.0  ;;  %v1151_v44 = vmax.f32 %v1053_v13, 0.0  ;;  %v1147_v24 = vmax.f32 %v1051_v60, 0.0  ;;  %v4493_v35 = vor.u32 %v4979_v37, %v4490_v30 }
 0x7db   :  { %v1184_v53 = vpack.c.bf16 %v1152_v31, %v1148_v27  ;;  %v1185_v25 = vpack.c.bf16 %v1153_v45, %v1149_v42  ;;  %2301 = vmatpush.bf16.msra.mxu2 %v4489_v26  ;;  %v1160_v1 = vmax.f32 %v1092_v54, 0.0  ;;  %v1161_v22 = vmax.f32 %v1126_v59, 0.0 }
 0x7dc   :  { %v1182_v63 = vpack.c.bf16 %v1150_v28, %v1146_v49  ;;  %v1183_v18 = vpack.c.bf16 %v1151_v44, %v1147_v24  ;;  %2335 = vmatpush.bf16.msrb.mxu3 %v4493_v35  ;;  %v1024_v7 = vadd.f32 %v6000_v19, %v6071_v11  ;;  %v1058_v56 = vadd.f32 %v6002_v20, %v6073_v14  ;;  %v7283_v35 = vld [vmem:[#allocation18_spill] sm:$0xff] }
 0x7dd   :  { %v1022_v51 = vadd.f32 %v5974_v5, %v6071_v11  ;;  %v1097_v20 = vadd.f32 %v6036_v38, %v6059_v17  ;;  %v1095_v5 = vadd.f32 %v6004_v10, %v6059_v17  ;;  %v4982_v38 = vld [vmem:[%s7237_s8 + $0x64] sm:$0xf0]  ;;  %v1029_v10 = vadd.f32 %v6055_v8, %v6071_v11 }
 0x7de   :  { %v1158_v0 = vmax.f32 %v1024_v7, 0.0  ;;  %v1159_v9 = vmax.f32 %v1058_v56, 0.0  ;;  %v1027_v36 = vadd.f32 %v6020_v33, %v6071_v11  ;;  %v1061_v13 = vadd.f32 %v6022_v34, %v6073_v14 }
 0x7df   :  { %v1154_v47 = vmax.f32 %v1022_v51, 0.0  ;;  %v1168_v46 = vmax.f32 %v1097_v20, 0.0  ;;  %v1164_v55 = vmax.f32 %v1095_v5, 0.0 }
 0x7e1   :  { %v1186_v19 = vpack.c.bf16 %v1158_v0, %v1154_v47  ;;  %v1192_v8 = vpack.c.bf16 %v1168_v46, %v1164_v55  ;;  %v7286_v46 = vld [vmem:[#allocation8_spill] sm:$0xff] }
 0x7e3   :  { %2176 = vmatmul.bf16.vlgmr.msrb.gmra.mxu0 %v1180_v21  ;;  %2210 = vmatmul.bf16.vlgmr.msra.gmra.mxu1 %v1181_v57  ;;  %v1090_v21 = vadd.f32 %v5970_v2, %v6059_v17  ;;  %v1124_v57 = vadd.f32 %v5972_v3, %v6061_v4  ;;  %v1056_v2 = vadd.f32 %v5976_v6, %v6073_v14 }
 0x7e4   :  { %v1129_v6 = vadd.f32 %v6006_v39, %v6061_v4  ;;  %v1063_v39 = vadd.f32 %v6057_v15, %v6073_v14  ;;  %v4497_v17 = vor.u32 %v4982_v38, %v4496_v50  ;;  %v1166_v15 = vmax.f32 %v1029_v10, 0.0 }
 0x7e5   :  { %v1156_v41 = vmax.f32 %v1090_v21, 0.0  ;;  %v1157_v48 = vmax.f32 %v1124_v57, 0.0  ;;  %v1155_v40 = vmax.f32 %v1056_v2, 0.0  ;;  %v7284_v21 = vld [vmem:[#allocation19_spill] sm:$0xff] }
 0x7e6   :  { %v1165_v31 = vmax.f32 %v1129_v6, 0.0  ;;  %2369 = vmatpush.bf16.msra.mxu0 %v4497_v17  ;;  %v1167_v60 = vmax.f32 %v1063_v39, 0.0 }
 0x7e7   :  { %v1188_v52 = vpack.c.bf16 %v1160_v1, %v1156_v41  ;;  %v1189_v3 = vpack.c.bf16 %v1161_v22, %v1157_v48 }
 0x7e8   :  { %2108 = vmatmul.bf16.vlgmr.msrb.gmra.mxu2 %v1178_v32  ;;  %2142 = vmatmul.bf16.vlgmr.msra.gmra.mxu3 %v1179_v16  ;;  %v1187_v32 = vpack.c.bf16 %v1159_v9, %v1155_v40  ;;  %v1131_v16 = vadd.f32 %v6038_v23, %v6061_v4  ;;  %v4980_v23 = vld [vmem:[%s7237_s8 + $0x2c] sm:$0xf] }
 0x7e9   :  { %v4498_v4 = vld [vmem:[%s7237_s8 + $0x68] sm:$0xf0] }
 0x7ea   :  { %v1169_v29 = vmax.f32 %v1131_v16, 0.0  ;;  %v4501_v45 = vor.u32 %v4980_v23, %v4498_v4 }
 0x7ec   :  { %v1193_v43 = vpack.c.bf16 %v1169_v29, %v1165_v31  ;;  %2403 = vmatpush.bf16.msrb.mxu1 %v4501_v45 }
 0x7f3   :  { %2181 = vmatmul.bf16.gmra.mxu0 %v1184_v53  ;;  %2215 = vmatmul.bf16.gmra.mxu1 %v1185_v25  ;;  %v1162_v53 = vmax.f32 %v1027_v36, 0.0  ;;  %v1163_v25 = vmax.f32 %v1061_v13, 0.0 }
 0x7f5   :  { %v1190_v28 = vpack.c.bf16 %v1166_v15, %v1162_v53  ;;  %v1191_v44 = vpack.c.bf16 %v1167_v60, %v1163_v25 }
 0x7f8   :  { %2113 = vmatmul.bf16.gmra.mxu2 %v1182_v63  ;;  %2147 = vmatmul.bf16.gmra.mxu3 %v1183_v18 }
 0x803   :  { %2186 = vmatmul.bf16.gmra.mxu0 %v1188_v52  ;;  %2220 = vmatmul.bf16.gmra.mxu1 %v1189_v3 }
 0x808   :  { %2118 = vmatmul.bf16.gmra.mxu2 %v1186_v19  ;;  %2152 = vmatmul.bf16.gmra.mxu3 %v1187_v32 }
 0x810   :  { %v1849_v27 = vpop.f32.mrf.mxu0  ;;  %v1883_v42 = vpop.f32.mrf.mxu1 }
 0x813   :  { %2191 = vmatmul.bf16.gmra.mxu0 %v1192_v8  ;;  %2225 = vmatmul.bf16.gmra.mxu1 %v1193_v43 }
 0x818   :  { %v1851_v49 = vpop.f32.mrf.mxu0  ;;  %v1885_v24 = vpop.f32.mrf.mxu1  ;;  %2123 = vmatmul.bf16.gmra.mxu2 %v1190_v28  ;;  %2157 = vmatmul.bf16.gmra.mxu3 %v1191_v44 }
 0x81b   :  { %v1781_v33 = vpop.f32.mrf.mxu2  ;;  %v1815_v34 = vpop.f32.mrf.mxu3 }
 0x81c   :  { %v1816_v11 = vadd.f32 %v1815_v34, %v1781_v33  ;;  %v7290_v34 = vld [vmem:[#allocation14_spill] sm:$0xff] }
 0x81e   :  { %v1850_v14 = vadd.f32 %v1849_v27, %v1816_v11 }
 0x820   :  { %v1854_v63 = vpop.f32.mrf.mxu0  ;;  %v1888_v18 = vpop.f32.mrf.mxu1  ;;  %v6348_v61 = vadd.f32 %v1883_v42, %v1850_v14  ;;  %v7287_v42 = vld [vmem:[#allocation11_spill] sm:$0xff] }
 0x823   :  { %2196 = vmatmul.bf16.gmra.mxu0 %v6079_v12  ;;  %2230 = vmatmul.bf16.gmra.mxu1 %v6081_v58  ;;  %v1783_v62 = vpop.f32.mrf.mxu2  ;;  %v1817_v37 = vpop.f32.mrf.mxu3  ;;  %v7285_v58 = vld [vmem:[#allocation5_spill] sm:$0xff] }
 0x824   :  { %v1818_v54 = vadd.f32 %v1817_v37, %v1783_v62  ;;  %v4994_v62 = vld [vmem:[%s7238_s10 + $0x238] sm:$0xff] }
 0x825   :  { %v5002_v37 = vld [vmem:[%s7238_s10 + $0x278] sm:$0xff]  ;;  %2746 = vmatpush.bf16.msrb.mxu2 %v4994_v62 }
 0x826   :  { %v1852_v59 = vadd.f32 %v1851_v49, %v1818_v54  ;;  %2780 = vmatpush.bf16.msra.mxu3 %v5002_v37  ;;  %v5006_v37 = vld [vmem:[%s7238_s10 + $0x298] sm:$0xff] }
 0x828   :  { %v1856_v26 = vpop.f32.mrf.mxu0  ;;  %v1890_v30 = vpop.f32.mrf.mxu1  ;;  %2128 = vmatmul.bf16.gmra.mxu2 %v7283_v35  ;;  %2162 = vmatmul.bf16.gmra.mxu3 %v7284_v21  ;;  %v6354_v57 = vadd.f32 %v1885_v24, %v1852_v59 }
 0x82b   :  { %v1786_v1 = vpop.f32.mrf.mxu2  ;;  %v1820_v22 = vpop.f32.mrf.mxu3 }
 0x82c   :  { %v1821_v7 = vadd.f32 %v1820_v22, %v1786_v1 }
 0x82e   :  { %v1855_v56 = vadd.f32 %v1854_v63, %v1821_v7  ;;  %v4993_v7 = vld [vmem:[%s7238_s10 + $0x230] sm:$0xff] }
 0x82f   :  { %2747 = vmatpush.bf16.msrb.mxu2 %v4993_v7 }
 0x830   :  { %v1859_v41 = vpop.f32.mrf.mxu0  ;;  %v1893_v12 = vpop.f32.mrf.mxu1  ;;  %v6356_v48 = vadd.f32 %v1888_v18, %v1855_v56  ;;  %v5001_v56 = vld [vmem:[%s7238_s10 + $0x270] sm:$0xff] }
 0x831   :  { %2781 = vmatpush.bf16.msra.mxu3 %v5001_v56 }
 0x833   :  { %4528 = vmatmul.msk.bf16.vlgmr.msra.gmra.mxu0 %vm150_vm2, %v7285_v58  ;;  %4533 = vmatmul.msk.bf16.vlgmr.msrb.gmra.mxu1 %vm150_vm2, %v7285_v58  ;;  %v1788_v51 = vpop.f32.mrf.mxu2  ;;  %v1822_v2 = vpop.f32.mrf.mxu3 }
 0x834   :  { %v1823_v52 = vadd.f32 %v1822_v2, %v1788_v51 }
 0x836   :  { %v1857_v3 = vadd.f32 %v1856_v26, %v1823_v52 }
 0x838   :  { %v1861_v0 = vpop.f32.mrf.mxu0  ;;  %v1895_v9 = vpop.f32.mrf.mxu1  ;;  %4518 = vmatmul.msk.bf16.vlgmr.msra.gmra.mxu2 %vm150_vm2, %v7285_v58  ;;  %4523 = vmatmul.msk.bf16.vlgmr.msrb.gmra.mxu3 %vm150_vm2, %v7285_v58  ;;  %v6366_v47 = vadd.f32 %v1890_v30, %v1857_v3  ;;  %v5018_v3 = vld [vmem:[%s7238_s10 + $0x2f8] sm:$0xff] }
 0x839   :  { %2848 = vmatpush.bf16.msra.mxu1 %v5018_v3  ;;  %v5004_v3 = vld [vmem:[%s7238_s10 + $0x288] sm:$0xff] }
 0x83b   :  { %v1791_v40 = vpop.f32.mrf.mxu2  ;;  %v1825_v19 = vpop.f32.mrf.mxu3 }
 0x83c   :  { %v1826_v32 = vadd.f32 %v1825_v19, %v1791_v40 }
 0x83e   :  { %v1860_v20 = vadd.f32 %v1859_v41, %v1826_v32  ;;  %v7293_v41 = vld [vmem:[#allocation17_spill] sm:$0xff] }
 0x840   :  { %v1864_v16 = vpop.f32.mrf.mxu0  ;;  %v1898_v5 = vpop.f32.mrf.mxu1  ;;  %v6368_v6 = vadd.f32 %v1893_v12, %v1860_v20 }
 0x843   :  { %4529 = vmatmul.msk.bf16.gmra.mxu0 %vm150_vm2, %v7286_v46  ;;  %4534 = vmatmul.msk.bf16.gmra.mxu1 %vm150_vm2, %v7286_v46  ;;  %v1793_v29 = vpop.f32.mrf.mxu2  ;;  %v1827_v50 = vpop.f32.mrf.mxu3 }
 0x844   :  { %v1828_v38 = vadd.f32 %v1827_v50, %v1793_v29 }
 0x846   :  { %v1862_v23 = vadd.f32 %v1861_v0, %v1828_v38  ;;  %v4992_v0 = vld [vmem:[%s7238_s10 + $0x228] sm:$0xff]  ;;  %v5009_v38 = vld [vmem:[%s7238_s10 + $0x2b0] sm:$0xff] }
 0x847   :  { %2748 = vmatpush.bf16.msrb.mxu2 %v4992_v0  ;;  %v5012_v0 = vld [vmem:[%s7238_s10 + $0x2c8] sm:$0xff] }
 0x848   :  { %v6374_v10 = vpop.f32.mrf.mxu0  ;;  %v6376_v39 = vpop.f32.mrf.mxu1  ;;  %4519 = vmatmul.msk.bf16.gmra.mxu2 %vm150_vm2, %v7286_v46  ;;  %4524 = vmatmul.msk.bf16.gmra.mxu3 %vm150_vm2, %v7286_v46  ;;  %v6382_v17 = vadd.f32 %v1895_v9, %v1862_v23  ;;  %v5000_v9 = vld [vmem:[%s7238_s10 + $0x268] sm:$0xff]  ;;  %v5017_v23 = vld [vmem:[%s7238_s10 + $0x2f0] sm:$0xff] }
 0x849   :  { %2782 = vmatpush.bf16.msra.mxu3 %v5000_v9  ;;  %2849 = vmatpush.bf16.msra.mxu1 %v5017_v23 }
 0x84b   :  { %v1796_v4 = vpop.f32.mrf.mxu2  ;;  %v1830_v55 = vpop.f32.mrf.mxu3 }
 0x84c   :  { %v1831_v31 = vadd.f32 %v1830_v55, %v1796_v4 }
 0x84e   :  { %v1865_v45 = vadd.f32 %v1864_v16, %v1831_v31  ;;  %v4999_v31 = vld [vmem:[%s7238_s10 + $0x260] sm:$0xff] }
 0x84f   :  { %2783 = vmatpush.bf16.msra.mxu3 %v4999_v31 }
 0x850   :  { %v1869_v36 = vpop.f32.mrf.mxu0  ;;  %v1903_v13 = vpop.f32.mrf.mxu1  ;;  %v6384_v27 = vadd.f32 %v1898_v5, %v1865_v45  ;;  %v5008_v45 = vld [vmem:[%s7238_s10 + $0x2a8] sm:$0xff] }
 0x853   :  { %4530 = vmatmul.msk.bf16.gmra.mxu0 %vm150_vm2, %v7287_v42  ;;  %4535 = vmatmul.msk.bf16.gmra.mxu1 %vm150_vm2, %v7287_v42  ;;  %v6390_v8 = vpop.f32.mrf.mxu2  ;;  %v6392_v43 = vpop.f32.mrf.mxu3 }
 0x858   :  { %v6394_v15 = vpop.f32.mrf.mxu0  ;;  %v6396_v60 = vpop.f32.mrf.mxu1  ;;  %4520 = vmatmul.msk.bf16.gmra.mxu2 %vm150_vm2, %v7287_v42  ;;  %4525 = vmatmul.msk.bf16.gmra.mxu3 %vm150_vm2, %v7287_v42 }
 0x859   :  { %7288 = vst [vmem:[#allocation18_spill] sm:$0xff] %v6394_v15 }
 0x85a   :  { %7289 = vst [vmem:[#allocation19_spill] sm:$0xff] %v6396_v60 }
 0x85b   :  { %v1801_v53 = vpop.f32.mrf.mxu2  ;;  %v1835_v25 = vpop.f32.mrf.mxu3 }
 0x85c   :  { %v1836_v28 = vadd.f32 %v1835_v25, %v1801_v53  ;;  %v5007_v25 = vld [vmem:[%s7238_s10 + $0x2a0] sm:$0xff] }
 0x85e   :  { %v1870_v44 = vadd.f32 %v1869_v36, %v1836_v28  ;;  %v5016_v36 = vld [vmem:[%s7238_s10 + $0x2e8] sm:$0xff]  ;;  %v5015_v28 = vld [vmem:[%s7238_s10 + $0x2e0] sm:$0xff] }
 0x85f   :  { %2850 = vmatpush.bf16.msra.mxu1 %v5016_v36 }
 0x860   :  { %v2177_v49 = vpop.f32.mrf.mxu0  ;;  %v2211_v24 = vpop.f32.mrf.mxu1  ;;  %v6402_v33 = vadd.f32 %v1903_v13, %v1870_v44 }
 0x863   :  { %4531 = vmatmul.msk.bf16.gmra.mxu0 %vm150_vm2, %v7290_v34  ;;  %4536 = vmatmul.msk.bf16.gmra.mxu1 %vm150_vm2, %v7290_v34  ;;  %v6408_v11 = vpop.f32.mrf.mxu2  ;;  %v6410_v14 = vpop.f32.mrf.mxu3 }
 0x864   :  { %7291 = vst [vmem:[#allocation5_spill] sm:$0xff] %v6408_v11  ;;  %2851 = vmatpush.bf16.msra.mxu1 %v5015_v28  ;;  %v4996_v28 = vld [vmem:[%s7238_s10 + $0x248] sm:$0xff] }
 0x865   :  { %7292 = vst [vmem:[#allocation8_spill] sm:$0xff] %v6410_v14 }
 0x868   :  { %v6412_v63 = vpop.f32.mrf.mxu0  ;;  %v6414_v18 = vpop.f32.mrf.mxu1  ;;  %4521 = vmatmul.msk.bf16.gmra.mxu2 %vm150_vm2, %v7290_v34  ;;  %4526 = vmatmul.msk.bf16.gmra.mxu3 %vm150_vm2, %v7290_v34 }
 0x86b   :  { %v2109_v54 = vpop.f32.mrf.mxu2  ;;  %v2143_v59 = vpop.f32.mrf.mxu3 }
 0x86c   :  { %v2110_v26 = vadd.f32 %v2109_v54, %v6348_v61  ;;  %v5010_v61 = vld [vmem:[%s7238_s10 + $0x2b8] sm:$0xff] }
 0x86d   :  { %2814 = vmatpush.bf16.msrb.mxu0 %v5010_v61  ;;  %v5014_v54 = vld [vmem:[%s7238_s10 + $0x2d8] sm:$0xff]  ;;  %v5013_v61 = vld [vmem:[%s7238_s10 + $0x2d0] sm:$0xff] }
 0x86e   :  { %v2144_v30 = vadd.f32 %v2143_v59, %v2110_v26  ;;  %2852 = vmatpush.bf16.msra.mxu1 %v5014_v54 }
 0x870   :  { %v2178_v35 = vadd.f32 %v2177_v49, %v2144_v30  ;;  %v2182_v21 = vpop.f32.mrf.mxu0  ;;  %v2216_v1 = vpop.f32.mrf.mxu1 }
 0x871   :  { %2815 = vmatpush.bf16.msrb.mxu0 %v5009_v38 }
 0x872   :  { %v6427_v22 = vadd.f32 %v2211_v24, %v2178_v35  ;;  %2853 = vmatpush.bf16.msra.mxu1 %v5013_v61 }
 0x873   :  { %4532 = vmatmul.msk.bf16.gmra.mxu0 %vm150_vm2, %v7293_v41  ;;  %4537 = vmatmul.msk.bf16.gmra.mxu1 %vm150_vm2, %v7293_v41  ;;  %v6442_v12 = vpop.f32.mrf.mxu2  ;;  %v6444_v51 = vpop.f32.mrf.mxu3 }
 0x875   :  { %2816 = vmatpush.bf16.msrb.mxu0 %v5008_v45 }
 0x876   :  { %2854 = vmatpush.bf16.msra.mxu1 %v5012_v0 }
 0x878   :  { %v6446_v2 = vpop.f32.mrf.mxu0  ;;  %v6448_v52 = vpop.f32.mrf.mxu1  ;;  %4522 = vmatmul.msk.bf16.gmra.mxu2 %vm150_vm2, %v7293_v41  ;;  %4527 = vmatmul.msk.bf16.gmra.mxu3 %vm150_vm2, %v7293_v41 }
 0x879   :  { %2817 = vmatpush.bf16.msrb.mxu0 %v5007_v25  ;;  %v4988_v25 = vld [vmem:[%s7238_s10 + $0x208] sm:$0xff] }
 0x87b   :  { %v2114_v40 = vpop.f32.mrf.mxu2  ;;  %v2148_v19 = vpop.f32.mrf.mxu3 }
 0x87c   :  { %v2115_v32 = vadd.f32 %v2114_v40, %v6356_v48  ;;  %v4991_v48 = vld [vmem:[%s7238_s10 + $0x220] sm:$0xff] }
 0x87d   :  { %2749 = vmatpush.bf16.msrb.mxu2 %v4991_v48  ;;  %2818 = vmatpush.bf16.msrb.mxu0 %v5006_v37 }
 0x87e   :  { %v2149_v20 = vadd.f32 %v2148_v19, %v2115_v32  ;;  %v4989_v19 = vld [vmem:[%s7238_s10 + $0x210] sm:$0xff] }
 0x87f   :  { %v4997_v32 = vld [vmem:[%s7238_s10 + $0x250] sm:$0xff] }
 0x880   :  { %v2183_v16 = vadd.f32 %v2182_v21, %v2149_v20  ;;  %v2187_v5 = vpop.f32.mrf.mxu0  ;;  %v2221_v29 = vpop.f32.mrf.mxu1  ;;  %v4998_v21 = vld [vmem:[%s7238_s10 + $0x258] sm:$0xff]  ;;  %v5003_v20 = vld [vmem:[%s7238_s10 + $0x280] sm:$0xff] }
 0x881   :  { %2784 = vmatpush.bf16.msra.mxu3 %v4998_v21  ;;  %v2244_v21 = vld [vmem:[%s7239_s9 + $0x8] sm:$0xf] }
 0x882   :  { %v6464_v50 = vadd.f32 %v2216_v1, %v2183_v16  ;;  %v5005_v1 = vld [vmem:[%s7238_s10 + $0x290] sm:$0xff]  ;;  %v6574_v0 = vperm.slane %v2244_v21, 2 }
 0x883   :  { %v6475_v4 = vpop.f32.mrf.mxu2  ;;  %v6477_v55 = vpop.f32.mrf.mxu3  ;;  %2819 = vmatpush.bf16.msrb.mxu0 %v5005_v1 }
 0x885   :  { %2785 = vmatpush.bf16.msra.mxu3 %v4997_v32 }
 0x887   :  { %2820 = vmatpush.bf16.msrb.mxu0 %v5004_v3 }
 0x888   :  { %v6488_v13 = vpop.f32.mrf.mxu0  ;;  %v6490_v53 = vpop.f32.mrf.mxu1 }
 0x889   :  { %2786 = vmatpush.bf16.msra.mxu3 %v4996_v28 }
 0x88b   :  { %v2119_v44 = vpop.f32.mrf.mxu2  ;;  %v2153_v49 = vpop.f32.mrf.mxu3  ;;  %2821 = vmatpush.bf16.msrb.mxu0 %v5003_v20 }
 0x88c   :  { %v2120_v24 = vadd.f32 %v2119_v44, %v6368_v6  ;;  %v4990_v6 = vld [vmem:[%s7238_s10 + $0x218] sm:$0xff] }
 0x88d   :  { %2750 = vmatpush.bf16.msrb.mxu2 %v4990_v6 }
 0x88e   :  { %v2154_v62 = vadd.f32 %v2153_v49, %v2120_v24  ;;  %v4987_v49 = vld [vmem:[%s7238_s10 + $0x200] sm:$0xff] }
 0x88f   :  { %v4995_v24 = vld [vmem:[%s7238_s10 + $0x240] sm:$0xff] }
 0x890   :  { %v2188_v59 = vadd.f32 %v2187_v5, %v2154_v62  ;;  %v2192_v26 = vpop.f32.mrf.mxu0  ;;  %v2226_v30 = vpop.f32.mrf.mxu1  ;;  %2787 = vmatpush.bf16.msra.mxu3 %v4995_v24 }
 0x891   :  { %2751 = vmatpush.bf16.msrb.mxu2 %v4989_v19  ;;  %v6576_v19 = vperm.slane %v2244_v21, 3 }
 0x892   :  { %v6505_v35 = vadd.f32 %v2221_v29, %v2188_v59  ;;  %v5011_v29 = vld [vmem:[%s7238_s10 + $0x2c0] sm:$0xff] }
 0x893   :  { %v6516_v7 = vpop.f32.mrf.mxu2  ;;  %v6518_v56 = vpop.f32.mrf.mxu3  ;;  %2855 = vmatpush.bf16.msra.mxu1 %v5011_v29 }
 0x895   :  { %2752 = vmatpush.bf16.msrb.mxu2 %v4988_v25 }
 0x898   :  { %v6529_v9 = vpop.f32.mrf.mxu0  ;;  %v6531_v40 = vpop.f32.mrf.mxu1 }
 0x899   :  { %7294 = vst [vmem:[#allocation11_spill] sm:$0xff] %v6529_v9  ;;  %2753 = vmatpush.bf16.msrb.mxu2 %v4987_v49 }
 0x89a   :  { %7295 = vst [vmem:[#allocation14_spill] sm:$0xff] %v6531_v40 }
 0x89b   :  { %v2124_v16 = vpop.f32.mrf.mxu2  ;;  %v2158_v5 = vpop.f32.mrf.mxu3 }
 0x89c   :  { %v2125_v38 = vadd.f32 %v2124_v16, %v6384_v27  ;;  %v5025_v16 = vld [vmem:[%s7237_s8 + $0xec] sm:$0xf0] }
 0x89e   :  { %v2159_v23 = vadd.f32 %v2158_v5, %v2125_v38  ;;  %v5023_v5 = vld [vmem:[%s7237_s8 + $0xb4] sm:$0xf] }
 0x8a0   :  { %v2193_v48 = vadd.f32 %v2192_v26, %v2159_v23  ;;  %v2197_v31 = vpop.f32.mrf.mxu0  ;;  %v2231_v45 = vpop.f32.mrf.mxu1 }
 0x8a2   :  { %v6546_v36 = vadd.f32 %v2226_v30, %v2193_v48  ;;  %v4686_v48 = vld [vmem:[%s7237_s8 + $0xf0] sm:$0xf0] }
 0x8a3   :  { %v6554_v44 = vpop.f32.mrf.mxu2  ;;  %v6556_v27 = vpop.f32.mrf.mxu3  ;;  %v4689_v25 = vor.u32 %v5023_v5, %v4686_v48 }
 0x8a4   :  { %7296 = vst [vmem:[#allocation17_spill] sm:$0xff] %v6556_v27 }
 0x8a5   :  { %2990 = vmatpush.bf16.msrb.mxu3 %v4689_v25  ;;  %v5026_v25 = vld [vmem:[%s7237_s8 + $0xf4] sm:$0xf0] }
 0x8a8   :  { %v6564_v62 = vpop.f32.mrf.mxu0  ;;  %v6566_v37 = vpop.f32.mrf.mxu1 }
 0x8a9   :  { %7297 = vst [vmem:[#allocation20_spill] sm:$0xff] %v6564_v62 }
 0x8aa   :  { %7298 = vst [vmem:[#allocation21_spill] sm:$0xff] %v6566_v37 }
 0x8ab   :  { %v2129_v54 = vpop.f32.mrf.mxu2  ;;  %v2163_v59 = vpop.f32.mrf.mxu3 }
 0x8ac   :  { %v2130_v26 = vadd.f32 %v2129_v54, %v6402_v33  ;;  %v4684_v33 = vld [vmem:[%s7237_s8 + $0xb0] sm:$0xf] }
 0x8ad   :  { %v4685_v23 = vor.u32 %v5025_v16, %v4684_v33  ;;  %v6598_v33 = vperm.slane %v2244_v21, 0  ;;  %v6600_v16 = vperm.slane %v2244_v21, 1 }
 0x8ae   :  { %v2164_v30 = vadd.f32 %v2163_v59, %v2130_v26 }
 0x8af   :  { %2956 = vmatpush.bf16.msra.mxu2 %v4685_v23 }
 0x8b0   :  { %v2198_v6 = vadd.f32 %v2197_v31, %v2164_v30  ;;  %v2371_v1 = vpop.f32.mrf.mxu0  ;;  %v2405_v61 = vpop.f32.mrf.mxu1 }
 0x8b1   :  { %v2372_v29 = vadd.f32 %v2371_v1, %v6574_v0  ;;  %v2406_v38 = vadd.f32 %v2405_v61, %v6576_v19 }
 0x8b2   :  { %v6572_v3 = vadd.f32 %v2231_v45, %v2198_v6 }
 0x8b3   :  { %v6578_v32 = vpop.f32.mrf.mxu2  ;;  %v6580_v20 = vpop.f32.mrf.mxu3  ;;  %v2432_v24 = vmax.f32 %v2372_v29, 0.0  ;;  %v2433_v54 = vmax.f32 %v2406_v38, 0.0 }
 0x8b4   :  { %7299 = vst [vmem:[#allocation22_spill] sm:$0xff] %v6578_v32 }
 0x8b5   :  { %7300 = vst [vmem:[#allocation23_spill] sm:$0xff] %v6580_v20 }
 0x8b8   :  { %v2373_v31 = vpop.f32.mrf.mxu0  ;;  %v2407_v45 = vpop.f32.mrf.mxu1 }
 0x8b9   :  { %v2374_v28 = vadd.f32 %v2373_v31, %v6574_v0  ;;  %v2408_v49 = vadd.f32 %v2407_v45, %v6576_v19  ;;  %v4692_v45 = vld [vmem:[%s7237_s8 + $0xb8] sm:$0xf] }
 0x8bb   :  { %v2436_v59 = vmax.f32 %v2374_v28, 0.0  ;;  %v2437_v26 = vmax.f32 %v2408_v49, 0.0  ;;  %v2303_v30 = vpop.f32.mrf.mxu2  ;;  %v2337_v6 = vpop.f32.mrf.mxu3  ;;  %v4693_v49 = vor.u32 %v5026_v25, %v4692_v45 }
 0x8bc   :  { %v2304_v31 = vadd.f32 %v2303_v30, %v6598_v33  ;;  %v2338_v23 = vadd.f32 %v2337_v6, %v6600_v16  ;;  %v5024_v30 = vld [vmem:[%s7237_s8 + $0xbc] sm:$0xf] }
 0x8bd   :  { %v2472_v1 = vpack.c.bf16 %v2436_v59, %v2432_v24  ;;  %v2473_v61 = vpack.c.bf16 %v2437_v26, %v2433_v54  ;;  %3024 = vmatpush.bf16.msra.mxu0 %v4693_v49  ;;  %v4694_v6 = vld [vmem:[%s7237_s8 + $0xf8] sm:$0xf0] }
 0x8be   :  { %v2430_v24 = vmax.f32 %v2304_v31, 0.0  ;;  %v2431_v54 = vmax.f32 %v2338_v23, 0.0 }
 0x8bf   :  { %2822 = vmatmul.bf16.vlgmr.msrb.gmra.mxu0 %v2472_v1  ;;  %2856 = vmatmul.bf16.vlgmr.msra.gmra.mxu1 %v2473_v61 }
 0x8c0   :  { %v2376_v5 = vpop.f32.mrf.mxu0  ;;  %v2410_v48 = vpop.f32.mrf.mxu1 }
 0x8c1   :  { %v2377_v1 = vadd.f32 %v2376_v5, %v6574_v0  ;;  %v2411_v61 = vadd.f32 %v2410_v48, %v6576_v19 }
 0x8c3   :  { %v2305_v29 = vpop.f32.mrf.mxu2  ;;  %v2339_v38 = vpop.f32.mrf.mxu3  ;;  %v2441_v49 = vmax.f32 %v2411_v61, 0.0 }
 0x8c4   :  { %v2306_v21 = vadd.f32 %v2305_v29, %v6598_v33  ;;  %v2340_v28 = vadd.f32 %v2339_v38, %v6600_v16  ;;  %v4697_v29 = vor.u32 %v5024_v30, %v4694_v6 }
 0x8c6   :  { %v2434_v59 = vmax.f32 %v2306_v21, 0.0  ;;  %v2435_v26 = vmax.f32 %v2340_v28, 0.0  ;;  %3058 = vmatpush.bf16.msrb.mxu1 %v4697_v29  ;;  %v2440_v28 = vmax.f32 %v2377_v1, 0.0 }
 0x8c8   :  { %v2470_v38 = vpack.c.bf16 %v2434_v59, %v2430_v24  ;;  %v2471_v45 = vpack.c.bf16 %v2435_v26, %v2431_v54  ;;  %v2378_v31 = vpop.f32.mrf.mxu0  ;;  %v2412_v23 = vpop.f32.mrf.mxu1 }
 0x8c9   :  { %v2379_v25 = vadd.f32 %v2378_v31, %v6574_v0  ;;  %v2413_v21 = vadd.f32 %v2412_v23, %v6576_v19 }
 0x8ca   :  { %2754 = vmatmul.bf16.vlgmr.msrb.gmra.mxu2 %v2470_v38  ;;  %2788 = vmatmul.bf16.vlgmr.msra.gmra.mxu3 %v2471_v45 }
 0x8cb   :  { %v2444_v37 = vmax.f32 %v2379_v25, 0.0  ;;  %v2445_v62 = vmax.f32 %v2413_v21, 0.0  ;;  %v2308_v20 = vpop.f32.mrf.mxu2  ;;  %v2342_v5 = vpop.f32.mrf.mxu3 }
 0x8cc   :  { %v2309_v59 = vadd.f32 %v2308_v20, %v6598_v33  ;;  %v2343_v26 = vadd.f32 %v2342_v5, %v6600_v16 }
 0x8cd   :  { %v2476_v32 = vpack.c.bf16 %v2444_v37, %v2440_v28  ;;  %v2477_v48 = vpack.c.bf16 %v2445_v62, %v2441_v49 }
 0x8ce   :  { %v2438_v61 = vmax.f32 %v2309_v59, 0.0  ;;  %v2439_v38 = vmax.f32 %v2343_v26, 0.0 }
 0x8cf   :  { %2827 = vmatmul.bf16.gmra.mxu0 %v2476_v32  ;;  %2861 = vmatmul.bf16.gmra.mxu1 %v2477_v48 }
 0x8d0   :  { %v2381_v24 = vpop.f32.mrf.mxu0  ;;  %v2415_v54 = vpop.f32.mrf.mxu1 }
 0x8d1   :  { %v2382_v62 = vadd.f32 %v2381_v24, %v6574_v0  ;;  %v2416_v37 = vadd.f32 %v2415_v54, %v6576_v19  ;;  %v4668_v54 = vld [vmem:[%s7237_s8 + $0x30] sm:$0xf] }
 0x8d3   :  { %v2310_v30 = vpop.f32.mrf.mxu2  ;;  %v2344_v6 = vpop.f32.mrf.mxu3  ;;  %v2448_v49 = vmax.f32 %v2382_v62, 0.0  ;;  %v2449_v5 = vmax.f32 %v2416_v37, 0.0 }
 0x8d4   :  { %v2311_v29 = vadd.f32 %v2310_v30, %v6598_v33  ;;  %v2345_v1 = vadd.f32 %v2344_v6, %v6600_v16 }
 0x8d6   :  { %v2442_v45 = vmax.f32 %v2311_v29, 0.0  ;;  %v2443_v31 = vmax.f32 %v2345_v1, 0.0  ;;  %v5021_v29 = vld [vmem:[%s7237_s8 + $0x6c] sm:$0xf0] }
 0x8d7   :  { %v4669_v1 = vor.u32 %v5021_v29, %v4668_v54 }
 0x8d8   :  { %v2383_v32 = vpop.f32.mrf.mxu0  ;;  %v2417_v23 = vpop.f32.mrf.mxu1  ;;  %v2474_v25 = vpack.c.bf16 %v2442_v45, %v2438_v61  ;;  %v2475_v20 = vpack.c.bf16 %v2443_v31, %v2439_v38  ;;  %v5019_v61 = vld [vmem:[%s7237_s8 + $0x34] sm:$0xf] }
 0x8d9   :  { %v2384_v21 = vadd.f32 %v2383_v32, %v6574_v0  ;;  %v2418_v28 = vadd.f32 %v2417_v23, %v6576_v19  ;;  %v4670_v38 = vld [vmem:[%s7237_s8 + $0x70] sm:$0xf0]  ;;  %2957 = vmatpush.bf16.msra.mxu2 %v4669_v1 }
 0x8da   :  { %2759 = vmatmul.bf16.gmra.mxu2 %v2474_v25  ;;  %2793 = vmatmul.bf16.gmra.mxu3 %v2475_v20  ;;  %v4673_v62 = vor.u32 %v5019_v61, %v4670_v38 }
 0x8db   :  { %v2452_v48 = vmax.f32 %v2384_v21, 0.0  ;;  %v2453_v59 = vmax.f32 %v2418_v28, 0.0  ;;  %v2313_v26 = vpop.f32.mrf.mxu2  ;;  %v2347_v30 = vpop.f32.mrf.mxu3 }
 0x8dc   :  { %v2314_v37 = vadd.f32 %v2313_v26, %v6598_v33  ;;  %v2348_v32 = vadd.f32 %v2347_v30, %v6600_v16  ;;  %2991 = vmatpush.bf16.msrb.mxu3 %v4673_v62  ;;  %v5022_v26 = vld [vmem:[%s7237_s8 + $0x74] sm:$0xf0] }
 0x8dd   :  { %v2480_v6 = vpack.c.bf16 %v2452_v48, %v2448_v49  ;;  %v2481_v24 = vpack.c.bf16 %v2453_v59, %v2449_v5  ;;  %v4676_v59 = vld [vmem:[%s7237_s8 + $0x38] sm:$0xf] }
 0x8de   :  { %v2446_v28 = vmax.f32 %v2314_v37, 0.0  ;;  %v2447_v49 = vmax.f32 %v2348_v32, 0.0  ;;  %v5020_v37 = vld [vmem:[%s7237_s8 + $0x3c] sm:$0xf] }
 0x8df   :  { %2832 = vmatmul.bf16.gmra.mxu0 %v2480_v6  ;;  %2866 = vmatmul.bf16.gmra.mxu1 %v2481_v24  ;;  %v4677_v24 = vor.u32 %v5022_v26, %v4676_v59 }
 0x8e0   :  { %v2386_v45 = vpop.f32.mrf.mxu0  ;;  %v2420_v31 = vpop.f32.mrf.mxu1 }
 0x8e1   :  { %v2387_v30 = vadd.f32 %v2386_v45, %v6574_v0  ;;  %v2421_v6 = vadd.f32 %v2420_v31, %v6576_v19  ;;  %3025 = vmatpush.bf16.msra.mxu0 %v4677_v24  ;;  %v4678_v45 = vld [vmem:[%s7237_s8 + $0x78] sm:$0xf0] }
 0x8e2   :  { %v4681_v31 = vor.u32 %v5020_v37, %v4678_v45 }
 0x8e3   :  { %v2315_v23 = vpop.f32.mrf.mxu2  ;;  %v2349_v25 = vpop.f32.mrf.mxu3  ;;  %v2456_v32 = vmax.f32 %v2387_v30, 0.0 }
 0x8e4   :  { %v2316_v20 = vadd.f32 %v2315_v23, %v6598_v33  ;;  %v2350_v21 = vadd.f32 %v2349_v25, %v6600_v16  ;;  %v2457_v23 = vmax.f32 %v2421_v6, 0.0  ;;  %3059 = vmatpush.bf16.msrb.mxu1 %v4681_v31 }
 0x8e6   :  { %v2450_v5 = vmax.f32 %v2316_v20, 0.0  ;;  %v2451_v48 = vmax.f32 %v2350_v21, 0.0 }
 0x8e8   :  { %v2388_v54 = vpop.f32.mrf.mxu0  ;;  %v2422_v29 = vpop.f32.mrf.mxu1  ;;  %v2478_v1 = vpack.c.bf16 %v2450_v5, %v2446_v28  ;;  %v2479_v61 = vpack.c.bf16 %v2451_v48, %v2447_v49 }
 0x8e9   :  { %v2389_v38 = vadd.f32 %v2388_v54, %v6574_v0  ;;  %v2423_v62 = vadd.f32 %v2422_v29, %v6576_v19 }
 0x8ea   :  { %2764 = vmatmul.bf16.gmra.mxu2 %v2478_v1  ;;  %2798 = vmatmul.bf16.gmra.mxu3 %v2479_v61 }
 0x8eb   :  { %v2460_v25 = vmax.f32 %v2389_v38, 0.0  ;;  %v2461_v20 = vmax.f32 %v2423_v62, 0.0  ;;  %v2318_v21 = vpop.f32.mrf.mxu2  ;;  %v2352_v28 = vpop.f32.mrf.mxu3 }
 0x8ec   :  { %v2319_v26 = vadd.f32 %v2318_v21, %v6598_v33  ;;  %v2353_v24 = vadd.f32 %v2352_v28, %v6600_v16 }
 0x8ed   :  { %v2484_v49 = vpack.c.bf16 %v2460_v25, %v2456_v32  ;;  %v2485_v5 = vpack.c.bf16 %v2461_v20, %v2457_v23 }
 0x8ee   :  { %v2454_v1 = vmax.f32 %v2319_v26, 0.0  ;;  %v2455_v61 = vmax.f32 %v2353_v24, 0.0 }
 0x8ef   :  { %2837 = vmatmul.bf16.gmra.mxu0 %v2484_v49  ;;  %2871 = vmatmul.bf16.gmra.mxu1 %v2485_v5 }
 0x8f0   :  { %v2391_v48 = vpop.f32.mrf.mxu0  ;;  %v2425_v59 = vpop.f32.mrf.mxu1 }
 0x8f1   :  { %v2392_v37 = vadd.f32 %v2391_v48, %v6574_v0  ;;  %v2426_v45 = vadd.f32 %v2425_v59, %v6576_v19 }
 0x8f3   :  { %v2320_v54 = vpop.f32.mrf.mxu2  ;;  %v2354_v29 = vpop.f32.mrf.mxu3  ;;  %v2464_v28 = vmax.f32 %v2392_v37, 0.0  ;;  %v2465_v49 = vmax.f32 %v2426_v45, 0.0 }
 0x8f4   :  { %v2321_v30 = vadd.f32 %v2320_v54, %v6598_v33  ;;  %v2355_v6 = vadd.f32 %v2354_v29, %v6600_v16 }
 0x8f6   :  { %v2458_v38 = vmax.f32 %v2321_v30, 0.0  ;;  %v2459_v62 = vmax.f32 %v2355_v6, 0.0 }
 0x8f8   :  { %v2393_v31 = vpop.f32.mrf.mxu0  ;;  %v2427_v32 = vpop.f32.mrf.mxu1  ;;  %v2482_v23 = vpack.c.bf16 %v2458_v38, %v2454_v1  ;;  %v2483_v25 = vpack.c.bf16 %v2459_v62, %v2455_v61 }
 0x8f9   :  { %v2394_v20 = vadd.f32 %v2393_v31, %v6574_v0  ;;  %v2428_v21 = vadd.f32 %v2427_v32, %v6576_v19 }
 0x8fa   :  { %2769 = vmatmul.bf16.gmra.mxu2 %v2482_v23  ;;  %2803 = vmatmul.bf16.gmra.mxu3 %v2483_v25  ;;  %v5034_v23 = vld [vmem:[%s7238_s10 + $0x338] sm:$0xff] }
 0x8fb   :  { %v2468_v5 = vmax.f32 %v2394_v20, 0.0  ;;  %v2469_v26 = vmax.f32 %v2428_v21, 0.0  ;;  %v2323_v24 = vpop.f32.mrf.mxu2  ;;  %v2357_v54 = vpop.f32.mrf.mxu3  ;;  %v5042_v25 = vld [vmem:[%s7238_s10 + $0x378] sm:$0xff]  ;;  %3402 = vmatpush.bf16.msrb.mxu2 %v5034_v23 }
 0x8fc   :  { %v2324_v59 = vadd.f32 %v2323_v24, %v6598_v33  ;;  %v2358_v30 = vadd.f32 %v2357_v54, %v6600_v16  ;;  %3436 = vmatpush.bf16.msra.mxu3 %v5042_v25  ;;  %v5050_v54 = vld [vmem:[%s7238_s10 + $0x3b8] sm:$0xff] }
 0x8fd   :  { %v2488_v29 = vpack.c.bf16 %v2468_v5, %v2464_v28  ;;  %v2489_v48 = vpack.c.bf16 %v2469_v26, %v2465_v49  ;;  %3470 = vmatpush.bf16.msrb.mxu0 %v5050_v54  ;;  %v5054_v54 = vld [vmem:[%s7238_s10 + $0x3d8] sm:$0xff] }
 0x8fe   :  { %v2462_v61 = vmax.f32 %v2324_v59, 0.0  ;;  %v2463_v38 = vmax.f32 %v2358_v30, 0.0  ;;  %v5058_v30 = vld [vmem:[%s7238_s10 + $0x3f8] sm:$0xff] }
 0x8ff   :  { %2842 = vmatmul.bf16.gmra.mxu0 %v2488_v29  ;;  %2876 = vmatmul.bf16.gmra.mxu1 %v2489_v48  ;;  %v5033_v29 = vld [vmem:[%s7238_s10 + $0x330] sm:$0xff] }
 0x900   :  { %v5041_v48 = vld [vmem:[%s7238_s10 + $0x370] sm:$0xff]  ;;  %3403 = vmatpush.bf16.msrb.mxu2 %v5033_v29  ;;  %3504 = vmatpush.bf16.msra.mxu1 %v5058_v30 }
 0x901   :  { %3437 = vmatpush.bf16.msra.mxu3 %v5041_v48 }
 0x903   :  { %v2325_v6 = vpop.f32.mrf.mxu2  ;;  %v2359_v0 = vpop.f32.mrf.mxu3 }
 0x904   :  { %v2326_v19 = vadd.f32 %v2325_v6, %v6598_v33  ;;  %v2360_v1 = vadd.f32 %v2359_v0, %v6600_v16 }
 0x906   :  { %v2466_v62 = vmax.f32 %v2326_v19, 0.0  ;;  %v2467_v37 = vmax.f32 %v2360_v1, 0.0  ;;  %v5049_v19 = vld [vmem:[%s7238_s10 + $0x3b0] sm:$0xff]  ;;  %v5032_v1 = vld [vmem:[%s7238_s10 + $0x328] sm:$0xff] }
 0x907   :  { %3471 = vmatpush.bf16.msrb.mxu0 %v5049_v19  ;;  %3404 = vmatpush.bf16.msrb.mxu2 %v5032_v1 }
 0x908   :  { %v2486_v45 = vpack.c.bf16 %v2466_v62, %v2462_v61  ;;  %v2487_v31 = vpack.c.bf16 %v2467_v37, %v2463_v38  ;;  %v5040_v61 = vld [vmem:[%s7238_s10 + $0x368] sm:$0xff] }
 0x909   :  { %3438 = vmatpush.bf16.msra.mxu3 %v5040_v61  ;;  %v5045_v61 = vld [vmem:[%s7238_s10 + $0x390] sm:$0xff] }
 0x90a   :  { %2774 = vmatmul.bf16.gmra.mxu2 %v2486_v45  ;;  %2808 = vmatmul.bf16.gmra.mxu3 %v2487_v31 }
 0x90f   :  { %4708 = vmatmul.msk.bf16.vlgmr.msra.gmra.mxu0 %vm150_vm2, %v7285_v58  ;;  %4713 = vmatmul.msk.bf16.vlgmr.msrb.gmra.mxu1 %vm150_vm2, %v7285_v58 }
 0x91a   :  { %4698 = vmatmul.msk.bf16.vlgmr.msra.gmra.mxu2 %vm150_vm2, %v7285_v58  ;;  %4703 = vmatmul.msk.bf16.vlgmr.msrb.gmra.mxu3 %vm150_vm2, %v7285_v58 }
 0x91f   :  { %4709 = vmatmul.msk.bf16.gmra.mxu0 %vm150_vm2, %v7286_v46  ;;  %4714 = vmatmul.msk.bf16.gmra.mxu1 %vm150_vm2, %v7286_v46 }
 0x92a   :  { %4699 = vmatmul.msk.bf16.gmra.mxu2 %vm150_vm2, %v7286_v46  ;;  %4704 = vmatmul.msk.bf16.gmra.mxu3 %vm150_vm2, %v7286_v46 }
 0x92f   :  { %4710 = vmatmul.msk.bf16.gmra.mxu0 %vm150_vm2, %v7287_v42  ;;  %4715 = vmatmul.msk.bf16.gmra.mxu1 %vm150_vm2, %v7287_v42 }
 0x93a   :  { %4700 = vmatmul.msk.bf16.gmra.mxu2 %vm150_vm2, %v7287_v42  ;;  %4705 = vmatmul.msk.bf16.gmra.mxu3 %vm150_vm2, %v7287_v42 }
 0x93c   :  { %v2823_v58 = vpop.f32.mrf.mxu0  ;;  %v2857_v33 = vpop.f32.mrf.mxu1 }
 0x93f   :  { %4711 = vmatmul.msk.bf16.gmra.mxu0 %vm150_vm2, %v7290_v34  ;;  %4716 = vmatmul.msk.bf16.gmra.mxu1 %vm150_vm2, %v7290_v34 }
 0x944   :  { %v6702_v46 = vpop.f32.mrf.mxu0  ;;  %v6704_v16 = vpop.f32.mrf.mxu1 }
 0x94a   :  { %4701 = vmatmul.msk.bf16.gmra.mxu2 %vm150_vm2, %v7290_v34  ;;  %4706 = vmatmul.msk.bf16.gmra.mxu3 %vm150_vm2, %v7290_v34 }
 0x94c   :  { %v2828_v32 = vpop.f32.mrf.mxu0  ;;  %v2862_v42 = vpop.f32.mrf.mxu1 }
 0x94d   :  { %v2755_v20 = vpop.f32.mrf.mxu2  ;;  %v2789_v21 = vpop.f32.mrf.mxu3 }
 0x94e   :  { %v2790_v28 = vadd.f32 %v2789_v21, %v2755_v20 }
 0x94f   :  { %4712 = vmatmul.msk.bf16.gmra.mxu0 %vm150_vm2, %v7293_v41  ;;  %4717 = vmatmul.msk.bf16.gmra.mxu1 %vm150_vm2, %v7293_v41 }
 0x950   :  { %v2824_v34 = vadd.f32 %v2823_v58, %v2790_v28  ;;  %v5048_v58 = vld [vmem:[%s7238_s10 + $0x3a8] sm:$0xff] }
 0x951   :  { %3472 = vmatpush.bf16.msrb.mxu0 %v5048_v58 }
 0x952   :  { %v2858_v49 = vadd.f32 %v2857_v33, %v2824_v34  ;;  %v5056_v33 = vld [vmem:[%s7238_s10 + $0x3e8] sm:$0xff]  ;;  %v5055_v34 = vld [vmem:[%s7238_s10 + $0x3e0] sm:$0xff] }
 0x954   :  { %v6721_v5 = vadd.f32 %v2858_v49, %v6427_v22  ;;  %v6723_v26 = vpop.f32.mrf.mxu0  ;;  %v6725_v24 = vpop.f32.mrf.mxu1  ;;  %v5046_v49 = vld [vmem:[%s7238_s10 + $0x398] sm:$0xff] }
 0x955   :  { %v6736_v59 = vpop.f32.mrf.mxu2  ;;  %v6738_v22 = vpop.f32.mrf.mxu3 }
 0x95a   :  { %4702 = vmatmul.msk.bf16.gmra.mxu2 %vm150_vm2, %v7293_v41  ;;  %4707 = vmatmul.msk.bf16.gmra.mxu3 %vm150_vm2, %v7293_v41  ;;  %v5057_v41 = vld [vmem:[%s7238_s10 + $0x3f0] sm:$0xff] }
 0x95b   :  { %3505 = vmatpush.bf16.msra.mxu1 %v5057_v41 }
 0x95c   :  { %v2833_v6 = vpop.f32.mrf.mxu0  ;;  %v2867_v0 = vpop.f32.mrf.mxu1 }
 0x95d   :  { %v2760_v38 = vpop.f32.mrf.mxu2  ;;  %v2794_v62 = vpop.f32.mrf.mxu3 }
 0x95e   :  { %v2795_v37 = vadd.f32 %v2794_v62, %v2760_v38  ;;  %v5053_v38 = vld [vmem:[%s7238_s10 + $0x3d0] sm:$0xff] }
 0x95f   :  { %3506 = vmatpush.bf16.msra.mxu1 %v5056_v33 }
 0x960   :  { %v2829_v45 = vadd.f32 %v2828_v32, %v2795_v37  ;;  %v5031_v32 = vld [vmem:[%s7238_s10 + $0x320] sm:$0xff]  ;;  %v5044_v37 = vld [vmem:[%s7238_s10 + $0x388] sm:$0xff] }
 0x961   :  { %3405 = vmatpush.bf16.msrb.mxu2 %v5031_v32 }
 0x962   :  { %v2863_v31 = vadd.f32 %v2862_v42, %v2829_v45  ;;  %v5039_v42 = vld [vmem:[%s7238_s10 + $0x360] sm:$0xff]  ;;  %v5052_v45 = vld [vmem:[%s7238_s10 + $0x3c8] sm:$0xff] }
 0x963   :  { %3439 = vmatpush.bf16.msra.mxu3 %v5039_v42  ;;  %3507 = vmatpush.bf16.msra.mxu1 %v5055_v34 }
 0x964   :  { %v6766_v23 = vadd.f32 %v2863_v31, %v6464_v50  ;;  %v6768_v25 = vpop.f32.mrf.mxu0  ;;  %v6770_v20 = vpop.f32.mrf.mxu1  ;;  %v5047_v50 = vld [vmem:[%s7238_s10 + $0x3a0] sm:$0xff] }
 0x965   :  { %v6778_v21 = vpop.f32.mrf.mxu2  ;;  %v6780_v28 = vpop.f32.mrf.mxu3  ;;  %3473 = vmatpush.bf16.msrb.mxu0 %v5047_v50  ;;  %v5051_v50 = vld [vmem:[%s7238_s10 + $0x3c0] sm:$0xff] }
 0x967   :  { %3508 = vmatpush.bf16.msra.mxu1 %v5054_v54  ;;  %v5029_v54 = vld [vmem:[%s7238_s10 + $0x310] sm:$0xff] }
 0x969   :  { %3474 = vmatpush.bf16.msrb.mxu0 %v5046_v49 }
 0x96b   :  { %3509 = vmatpush.bf16.msra.mxu1 %v5053_v38 }
 0x96c   :  { %v2838_v29 = vpop.f32.mrf.mxu0  ;;  %v2872_v48 = vpop.f32.mrf.mxu1 }
 0x96d   :  { %v2765_v30 = vpop.f32.mrf.mxu2  ;;  %v2799_v19 = vpop.f32.mrf.mxu3  ;;  %3475 = vmatpush.bf16.msrb.mxu0 %v5045_v61 }
 0x96e   :  { %v2800_v1 = vadd.f32 %v2799_v19, %v2765_v30  ;;  %v5037_v30 = vld [vmem:[%s7238_s10 + $0x350] sm:$0xff] }
 0x96f   :  { %3510 = vmatpush.bf16.msra.mxu1 %v5052_v45 }
 0x970   :  { %v2834_v62 = vadd.f32 %v2833_v6, %v2800_v1  ;;  %v5030_v6 = vld [vmem:[%s7238_s10 + $0x318] sm:$0xff] }
 0x971   :  { %3476 = vmatpush.bf16.msrb.mxu0 %v5044_v37  ;;  %3406 = vmatpush.bf16.msrb.mxu2 %v5030_v6 }
 0x972   :  { %v2868_v41 = vadd.f32 %v2867_v0, %v2834_v62  ;;  %v5038_v0 = vld [vmem:[%s7238_s10 + $0x358] sm:$0xff]  ;;  %v5028_v62 = vld [vmem:[%s7238_s10 + $0x308] sm:$0xff] }
 0x973   :  { %3440 = vmatpush.bf16.msra.mxu3 %v5038_v0  ;;  %3511 = vmatpush.bf16.msra.mxu1 %v5051_v50  ;;  %v5027_v50 = vld [vmem:[%s7238_s10 + $0x300] sm:$0xff] }
 0x974   :  { %v6807_v31 = vadd.f32 %v2868_v41, %v6505_v35  ;;  %v6809_v58 = vpop.f32.mrf.mxu0  ;;  %v6811_v33 = vpop.f32.mrf.mxu1  ;;  %v5043_v35 = vld [vmem:[%s7238_s10 + $0x380] sm:$0xff]  ;;  %v5036_v41 = vld [vmem:[%s7238_s10 + $0x348] sm:$0xff] }
 0x975   :  { %7301 = vst [vmem:[#allocation24_spill] sm:$0xff] %v6809_v58  ;;  %v6819_v32 = vpop.f32.mrf.mxu2  ;;  %v6821_v42 = vpop.f32.mrf.mxu3  ;;  %3477 = vmatpush.bf16.msrb.mxu0 %v5043_v35  ;;  %3407 = vmatpush.bf16.msrb.mxu2 %v5029_v54 }
 0x976   :  { %7302 = vst [vmem:[#allocation25_spill] sm:$0xff] %v6811_v33 }
 0x977   :  { %3441 = vmatpush.bf16.msra.mxu3 %v5037_v30 }
 0x979   :  { %3408 = vmatpush.bf16.msrb.mxu2 %v5028_v62 }
 0x97b   :  { %3442 = vmatpush.bf16.msra.mxu3 %v5036_v41 }
 0x97c   :  { %v2843_v34 = vpop.f32.mrf.mxu0  ;;  %v2877_v49 = vpop.f32.mrf.mxu1 }
 0x97d   :  { %v2770_v19 = vpop.f32.mrf.mxu2  ;;  %v2804_v1 = vpop.f32.mrf.mxu3  ;;  %3409 = vmatpush.bf16.msrb.mxu2 %v5027_v50 }
 0x97e   :  { %v2805_v61 = vadd.f32 %v2804_v1, %v2770_v19 }
 0x980   :  { %v2839_v38 = vadd.f32 %v2838_v29, %v2805_v61 }
 0x982   :  { %v2873_v37 = vadd.f32 %v2872_v48, %v2839_v38  ;;  %v5035_v48 = vld [vmem:[%s7238_s10 + $0x340] sm:$0xff] }
 0x983   :  { %3443 = vmatpush.bf16.msra.mxu3 %v5035_v48 }
 0x984   :  { %v6842_v45 = vadd.f32 %v2873_v37, %v6546_v36  ;;  %v6844_v6 = vpop.f32.mrf.mxu0  ;;  %v6846_v0 = vpop.f32.mrf.mxu1  ;;  %v2900_v36 = vld [vmem:[%s7239_s9 + $0xc] sm:$0xf] }
 0x985   :  { %7303 = vst [vmem:[#allocation26_spill] sm:$0xff] %v6844_v6  ;;  %v6848_v35 = vpop.f32.mrf.mxu2  ;;  %v6850_v29 = vpop.f32.mrf.mxu3  ;;  %v6861_v38 = vperm.slane %v2900_v36, 2  ;;  %v6863_v62 = vperm.slane %v2900_v36, 3  ;;  %v6876_v9 = vperm.slane %v2900_v36, 0 }
 0x986   :  { %7304 = vst [vmem:[#allocation27_spill] sm:$0xff] %v6846_v0 }
 0x987   :  { %7305 = vst [vmem:[#allocation28_spill] sm:$0xff] %v6848_v35 }
 0x988   :  { %7306 = vst [vmem:[#allocation29_spill] sm:$0xff] %v6850_v29 }
 0x98c   :  { %v3027_v54 = vpop.f32.mrf.mxu0  ;;  %v3061_v30 = vpop.f32.mrf.mxu1 }
 0x98d   :  { %v2775_v19 = vpop.f32.mrf.mxu2  ;;  %v2809_v1 = vpop.f32.mrf.mxu3  ;;  %v3028_v0 = vadd.f32 %v3027_v54, %v6861_v38  ;;  %v3062_v50 = vadd.f32 %v3061_v30, %v6863_v62 }
 0x98e   :  { %v2810_v61 = vadd.f32 %v2809_v1, %v2775_v19 }
 0x98f   :  { %v3088_v15 = vmax.f32 %v3028_v0, 0.0 }
 0x990   :  { %v2844_v41 = vadd.f32 %v2843_v34, %v2810_v61  ;;  %v3089_v34 = vmax.f32 %v3062_v50, 0.0 }
 0x992   :  { %v2878_v37 = vadd.f32 %v2877_v49, %v2844_v41 }
 0x994   :  { %v6868_v48 = vadd.f32 %v2878_v37, %v6572_v3  ;;  %v3029_v6 = vpop.f32.mrf.mxu0  ;;  %v3063_v60 = vpop.f32.mrf.mxu1 }
 0x995   :  { %v3030_v40 = vadd.f32 %v3029_v6, %v6861_v38  ;;  %v3064_v33 = vadd.f32 %v3063_v60, %v6863_v62  ;;  %v6872_v19 = vpop.f32.mrf.mxu2  ;;  %v6874_v1 = vpop.f32.mrf.mxu3  ;;  %v6878_v6 = vperm.slane %v2900_v36, 1 }
 0x996   :  { %7307 = vst [vmem:[#allocation30_spill] sm:$0xff] %v6868_v48 }
 0x997   :  { %7308 = vst [vmem:[#allocation31_spill] sm:$0xff] %v6872_v19  ;;  %v3092_v49 = vmax.f32 %v3030_v40, 0.0  ;;  %v3093_v61 = vmax.f32 %v3064_v33, 0.0 }
 0x998   :  { %7309 = vst [vmem:[#allocation32_spill] sm:$0xff] %v6874_v1 }
 0x999   :  { %v3128_v54 = vpack.c.bf16 %v3092_v49, %v3088_v15  ;;  %v3129_v41 = vpack.c.bf16 %v3093_v61, %v3089_v34 }
 0x99b   :  { %3478 = vmatmul.bf16.vlgmr.msrb.gmra.mxu0 %v3128_v54  ;;  %3512 = vmatmul.bf16.vlgmr.msra.gmra.mxu1 %v3129_v41 }
 0x99c   :  { %v3032_v3 = vpop.f32.mrf.mxu0  ;;  %v3066_v30 = vpop.f32.mrf.mxu1 }
 0x99d   :  { %v2959_v37 = vpop.f32.mrf.mxu2  ;;  %v2993_v48 = vpop.f32.mrf.mxu3  ;;  %v3033_v60 = vadd.f32 %v3032_v3, %v6861_v38  ;;  %v3067_v1 = vadd.f32 %v3066_v30, %v6863_v62 }
 0x99e   :  { %v2960_v0 = vadd.f32 %v2959_v37, %v6876_v9  ;;  %v2994_v40 = vadd.f32 %v2993_v48, %v6878_v6 }
 0x99f   :  { %v3096_v41 = vmax.f32 %v3033_v60, 0.0  ;;  %v3097_v3 = vmax.f32 %v3067_v1, 0.0 }
 0x9a0   :  { %v3086_v58 = vmax.f32 %v2960_v0, 0.0  ;;  %v3087_v37 = vmax.f32 %v2994_v40, 0.0 }
 0x9a4   :  { %v3034_v15 = vpop.f32.mrf.mxu0  ;;  %v3068_v33 = vpop.f32.mrf.mxu1 }
 0x9a5   :  { %v3035_v50 = vadd.f32 %v3034_v15, %v6861_v38  ;;  %v3069_v34 = vadd.f32 %v3068_v33, %v6863_v62  ;;  %v2961_v49 = vpop.f32.mrf.mxu2  ;;  %v2995_v61 = vpop.f32.mrf.mxu3 }
 0x9a6   :  { %v2962_v54 = vadd.f32 %v2961_v49, %v6876_v9  ;;  %v2996_v36 = vadd.f32 %v2995_v61, %v6878_v6 }
 0x9a7   :  { %v3100_v19 = vmax.f32 %v3035_v50, 0.0  ;;  %v3101_v30 = vmax.f32 %v3069_v34, 0.0 }
 0x9a8   :  { %v3090_v14 = vmax.f32 %v2962_v54, 0.0  ;;  %v3091_v48 = vmax.f32 %v2996_v36, 0.0 }
 0x9a9   :  { %v3133_v11 = vpack.c.bf16 %v3101_v30, %v3097_v3  ;;  %v3132_v27 = vpack.c.bf16 %v3100_v19, %v3096_v41 }
 0x9aa   :  { %v3126_v29 = vpack.c.bf16 %v3090_v14, %v3086_v58  ;;  %v3127_v15 = vpack.c.bf16 %v3091_v48, %v3087_v37 }
 0x9ab   :  { %3483 = vmatmul.bf16.gmra.mxu0 %v3132_v27  ;;  %3517 = vmatmul.bf16.gmra.mxu1 %v3133_v11 }
 0x9ac   :  { %v3037_v33 = vpop.f32.mrf.mxu0  ;;  %v3071_v35 = vpop.f32.mrf.mxu1  ;;  %3410 = vmatmul.bf16.vlgmr.msrb.gmra.mxu2 %v3126_v29  ;;  %3444 = vmatmul.bf16.vlgmr.msra.gmra.mxu3 %v3127_v15 }
 0x9ad   :  { %v2964_v49 = vpop.f32.mrf.mxu2  ;;  %v2998_v61 = vpop.f32.mrf.mxu3  ;;  %v3038_v1 = vadd.f32 %v3037_v33, %v6861_v38  ;;  %v3072_v60 = vadd.f32 %v3071_v35, %v6863_v62 }
 0x9ae   :  { %v2965_v0 = vadd.f32 %v2964_v49, %v6876_v9  ;;  %v2999_v40 = vadd.f32 %v2998_v61, %v6878_v6 }
 0x9af   :  { %v3104_v54 = vmax.f32 %v3038_v1, 0.0  ;;  %v3105_v36 = vmax.f32 %v3072_v60, 0.0 }
 0x9b0   :  { %v3094_v3 = vmax.f32 %v2965_v0, 0.0  ;;  %v3095_v30 = vmax.f32 %v2999_v40, 0.0 }
 0x9b4   :  { %v3039_v50 = vpop.f32.mrf.mxu0  ;;  %v3073_v19 = vpop.f32.mrf.mxu1 }
 0x9b5   :  { %v3040_v14 = vadd.f32 %v3039_v50, %v6861_v38  ;;  %v3074_v11 = vadd.f32 %v3073_v19, %v6863_v62  ;;  %v2966_v27 = vpop.f32.mrf.mxu2  ;;  %v3000_v58 = vpop.f32.mrf.mxu3 }
 0x9b6   :  { %v2967_v29 = vadd.f32 %v2966_v27, %v6876_v9  ;;  %v3001_v34 = vadd.f32 %v3000_v58, %v6878_v6 }
 0x9b7   :  { %v3108_v41 = vmax.f32 %v3040_v14, 0.0  ;;  %v3109_v35 = vmax.f32 %v3074_v11, 0.0 }
 0x9b8   :  { %v3098_v37 = vmax.f32 %v2967_v29, 0.0  ;;  %v3099_v48 = vmax.f32 %v3001_v34, 0.0 }
 0x9b9   :  { %v3137_v15 = vpack.c.bf16 %v3109_v35, %v3105_v36  ;;  %v3136_v33 = vpack.c.bf16 %v3108_v41, %v3104_v54 }
 0x9ba   :  { %v3130_v49 = vpack.c.bf16 %v3098_v37, %v3094_v3  ;;  %v3131_v61 = vpack.c.bf16 %v3099_v48, %v3095_v30 }
 0x9bb   :  { %3488 = vmatmul.bf16.gmra.mxu0 %v3136_v33  ;;  %3522 = vmatmul.bf16.gmra.mxu1 %v3137_v15 }
 0x9bc   :  { %v3042_v50 = vpop.f32.mrf.mxu0  ;;  %v3076_v19 = vpop.f32.mrf.mxu1  ;;  %3415 = vmatmul.bf16.gmra.mxu2 %v3130_v49  ;;  %3449 = vmatmul.bf16.gmra.mxu3 %v3131_v61 }
 0x9bd   :  { %v2969_v27 = vpop.f32.mrf.mxu2  ;;  %v3003_v58 = vpop.f32.mrf.mxu3  ;;  %v3043_v1 = vadd.f32 %v3042_v50, %v6861_v38  ;;  %v3077_v60 = vadd.f32 %v3076_v19, %v6863_v62 }
 0x9be   :  { %v2970_v0 = vadd.f32 %v2969_v27, %v6876_v9  ;;  %v3004_v40 = vadd.f32 %v3003_v58, %v6878_v6 }
 0x9bf   :  { %v3112_v3 = vmax.f32 %v3043_v1, 0.0  ;;  %v3113_v30 = vmax.f32 %v3077_v60, 0.0 }
 0x9c0   :  { %v3102_v15 = vmax.f32 %v2970_v0, 0.0  ;;  %v3103_v33 = vmax.f32 %v3004_v40, 0.0 }
 0x9c4   :  { %v3044_v14 = vpop.f32.mrf.mxu0  ;;  %v3078_v11 = vpop.f32.mrf.mxu1 }
 0x9c5   :  { %v3045_v29 = vadd.f32 %v3044_v14, %v6861_v38  ;;  %v3079_v34 = vadd.f32 %v3078_v11, %v6863_v62  ;;  %v2971_v54 = vpop.f32.mrf.mxu2  ;;  %v3005_v36 = vpop.f32.mrf.mxu3 }
 0x9c6   :  { %v2972_v41 = vadd.f32 %v2971_v54, %v6876_v9  ;;  %v3006_v35 = vadd.f32 %v3005_v36, %v6878_v6 }
 0x9c7   :  { %v3116_v37 = vmax.f32 %v3045_v29, 0.0  ;;  %v3117_v48 = vmax.f32 %v3079_v34, 0.0 }
 0x9c8   :  { %v3106_v49 = vmax.f32 %v2972_v41, 0.0  ;;  %v3107_v61 = vmax.f32 %v3006_v35, 0.0 }
 0x9c9   :  { %v3140_v50 = vpack.c.bf16 %v3116_v37, %v3112_v3  ;;  %v3141_v19 = vpack.c.bf16 %v3117_v48, %v3113_v30 }
 0x9ca   :  { %v3134_v27 = vpack.c.bf16 %v3106_v49, %v3102_v15  ;;  %v3135_v58 = vpack.c.bf16 %v3107_v61, %v3103_v33 }
 0x9cb   :  { %3493 = vmatmul.bf16.gmra.mxu0 %v3140_v50  ;;  %3527 = vmatmul.bf16.gmra.mxu1 %v3141_v19 }
 0x9cc   :  { %v3047_v14 = vpop.f32.mrf.mxu0  ;;  %v3081_v11 = vpop.f32.mrf.mxu1  ;;  %3420 = vmatmul.bf16.gmra.mxu2 %v3134_v27  ;;  %3454 = vmatmul.bf16.gmra.mxu3 %v3135_v58 }
 0x9cd   :  { %v2974_v54 = vpop.f32.mrf.mxu2  ;;  %v3008_v36 = vpop.f32.mrf.mxu3  ;;  %v3048_v1 = vadd.f32 %v3047_v14, %v6861_v38  ;;  %v3082_v60 = vadd.f32 %v3081_v11, %v6863_v62 }
 0x9ce   :  { %v2975_v0 = vadd.f32 %v2974_v54, %v6876_v9  ;;  %v3009_v40 = vadd.f32 %v3008_v36, %v6878_v6 }
 0x9cf   :  { %v3120_v15 = vmax.f32 %v3048_v1, 0.0  ;;  %v3121_v33 = vmax.f32 %v3082_v60, 0.0 }
 0x9d0   :  { %v3110_v50 = vmax.f32 %v2975_v0, 0.0  ;;  %v3111_v19 = vmax.f32 %v3009_v40, 0.0 }
 0x9d4   :  { %v3049_v29 = vpop.f32.mrf.mxu0  ;;  %v3083_v34 = vpop.f32.mrf.mxu1 }
 0x9d5   :  { %v3050_v41 = vadd.f32 %v3049_v29, %v6861_v38  ;;  %v3084_v35 = vadd.f32 %v3083_v34, %v6863_v62  ;;  %v2976_v3 = vpop.f32.mrf.mxu2  ;;  %v3010_v30 = vpop.f32.mrf.mxu3 }
 0x9d6   :  { %v2977_v37 = vadd.f32 %v2976_v3, %v6876_v9  ;;  %v3011_v48 = vadd.f32 %v3010_v30, %v6878_v6 }
 0x9d7   :  { %v3124_v49 = vmax.f32 %v3050_v41, 0.0  ;;  %v3125_v61 = vmax.f32 %v3084_v35, 0.0 }
 0x9d8   :  { %v3114_v27 = vmax.f32 %v2977_v37, 0.0  ;;  %v3115_v58 = vmax.f32 %v3011_v48, 0.0 }
 0x9d9   :  { %v3144_v14 = vpack.c.bf16 %v3124_v49, %v3120_v15  ;;  %v3145_v11 = vpack.c.bf16 %v3125_v61, %v3121_v33  ;;  %v2112_v49 = vadd.f32 %v6442_v12, %v6354_v57 }
 0x9da   :  { %v3138_v54 = vpack.c.bf16 %v3114_v27, %v3110_v50  ;;  %v3139_v38 = vpack.c.bf16 %v3115_v58, %v3111_v19 }
 0x9db   :  { %3498 = vmatmul.bf16.gmra.mxu0 %v3144_v14  ;;  %3532 = vmatmul.bf16.gmra.mxu1 %v3145_v11  ;;  %v2146_v58 = vadd.f32 %v6444_v51, %v2112_v49  ;;  %v7311_v49 = vld [vmem:[#allocation4_spill] sm:$0xff] }
 0x9dc   :  { %3425 = vmatmul.bf16.gmra.mxu2 %v3138_v54  ;;  %3459 = vmatmul.bf16.gmra.mxu3 %v3139_v38  ;;  %v6925_v38 = vld [vmem:[%s7231_s5 + $0x6] ss:$0 sm:$0xff] }
 0x9dd   :  { %v2979_v62 = vpop.f32.mrf.mxu2  ;;  %v3013_v36 = vpop.f32.mrf.mxu3  ;;  %v2180_v57 = vadd.f32 %v6412_v63, %v2146_v58 }
 0x9de   :  { %v2980_v29 = vadd.f32 %v2979_v62, %v6876_v9  ;;  %v3014_v1 = vadd.f32 %v3013_v36, %v6878_v6 }
 0x9e0   :  { %v3118_v41 = vmax.f32 %v2980_v29, 0.0  ;;  %v3119_v35 = vmax.f32 %v3014_v1, 0.0 }
 0x9e5   :  { %v2981_v60 = vpop.f32.mrf.mxu2  ;;  %v3015_v34 = vpop.f32.mrf.mxu3 }
 0x9e6   :  { %v2982_v0 = vadd.f32 %v2981_v60, %v6876_v9  ;;  %v3016_v40 = vadd.f32 %v3015_v34, %v6878_v6  ;;  %v2792_v9 = vadd.f32 %v6738_v22, %v6736_v59  ;;  %v7310_v34 = vld [vmem:[#allocation3_spill] sm:$0xff] }
 0x9e8   :  { %v3122_v3 = vmax.f32 %v2982_v0, 0.0  ;;  %v3123_v30 = vmax.f32 %v3016_v40, 0.0  ;;  %v2826_v11 = vadd.f32 %v6702_v46, %v2792_v9  ;;  %v2214_v46 = vadd.f32 %v6414_v18, %v2180_v57 }
 0x9e9   :  { %v2797_v18 = vadd.f32 %v6780_v28, %v6778_v21 }
 0x9ea   :  { %v3142_v37 = vpack.c.bf16 %v3122_v3, %v3118_v41  ;;  %v3143_v48 = vpack.c.bf16 %v3123_v30, %v3119_v35  ;;  %v2860_v59 = vadd.f32 %v6704_v16, %v2826_v11  ;;  %v2117_v16 = vadd.f32 %v6475_v4, %v6366_v47  ;;  %v7312_v11 = vld [vmem:[#allocation6_spill] sm:$0xff] }
 0x9ec   :  { %3430 = vmatmul.bf16.gmra.mxu2 %v3142_v37  ;;  %3464 = vmatmul.bf16.gmra.mxu3 %v3143_v48  ;;  %v2883_v40 = vadd.f32 %v2860_v59, %v2214_v46  ;;  %v2151_v48 = vadd.f32 %v6477_v55, %v2117_v16 }
 0x9ee   :  { %v2185_v21 = vadd.f32 %v6446_v2, %v2151_v48 }
 0xa18   :  { %v3479_v15 = vpop.f32.mrf.mxu0  ;;  %v3513_v33 = vpop.f32.mrf.mxu1 }
 0xa20   :  { %v3481_v61 = vpop.f32.mrf.mxu0  ;;  %v3515_v6 = vpop.f32.mrf.mxu1 }
 0xa28   :  { %v3484_v22 = vpop.f32.mrf.mxu0  ;;  %v3518_v1 = vpop.f32.mrf.mxu1 }
 0xa2f   :  { %v3411_v50 = vpop.f32.mrf.mxu2  ;;  %v3445_v19 = vpop.f32.mrf.mxu3 }
 0xa30   :  { %v3446_v27 = vadd.f32 %v3445_v19, %v3411_v50  ;;  %v2831_v50 = vadd.f32 %v6723_v26, %v2797_v18  ;;  %v3520_v19 = vpop.f32.mrf.mxu1 }
 0xa32   :  { %v3480_v14 = vadd.f32 %v3479_v15, %v3446_v27  ;;  %v3486_v15 = vpop.f32.mrf.mxu0  ;;  %v2865_v55 = vadd.f32 %v6725_v24, %v2831_v50 }
 0xa34   :  { %v3514_v54 = vadd.f32 %v3513_v33, %v3480_v14  ;;  %v2219_v14 = vadd.f32 %v6448_v52, %v2185_v21  ;;  %v2802_v52 = vadd.f32 %v6821_v42, %v6819_v32 }
 0xa36   :  { %v3538_v12 = vadd.f32 %v3514_v54, %v6721_v5  ;;  %v2885_v57 = vadd.f32 %v2865_v55, %v2219_v14 }
 0xa37   :  { %v3413_v62 = vpop.f32.mrf.mxu2  ;;  %v3447_v36 = vpop.f32.mrf.mxu3 }
 0xa38   :  { %v3448_v29 = vadd.f32 %v3447_v36, %v3413_v62  ;;  %v3550_v51 = vadd.f32 %v6925_v38, %v3538_v12  ;;  %v3523_v24 = vpop.f32.mrf.mxu1 }
 0xa3a   :  { %v3482_v60 = vadd.f32 %v3481_v61, %v3448_v29  ;;  %v6933_v0 = vadd.f32 %v3550_v51, %v7310_v34  ;;  %v3489_v12 = vpop.f32.mrf.mxu0 }
 0xa3c   :  { %v3516_v41 = vadd.f32 %v3515_v6, %v3482_v60  ;;  %v3572_v63 = vsel %vm150_vm2, %v6933_v0, 0.0  ;;  %v7313_v60 = vld [vmem:[#allocation7_spill] sm:$0xff] }
 0xa3d   :  { %3573 = vadd.xlane.f32.xlu1 %v3572_v63 }
 0xa3e   :  { %v3539_v5 = vadd.f32 %v3516_v41, %v2883_v40  ;;  %v2836_v40 = vadd.f32 %v6768_v25, %v2802_v52 }
 0xa3f   :  { %v3416_v35 = vpop.f32.mrf.mxu2  ;;  %v3450_v3 = vpop.f32.mrf.mxu3 }
 0xa40   :  { %v3451_v30 = vadd.f32 %v3450_v3, %v3416_v35  ;;  %v3551_v37 = vadd.f32 %v6925_v38, %v3539_v5  ;;  %v3525_v3 = vpop.f32.mrf.mxu1 }
 0xa42   :  { %v3485_v33 = vadd.f32 %v3484_v22, %v3451_v30  ;;  %v6944_v61 = vadd.f32 %v3551_v37, %v7311_v49  ;;  %v3491_v63 = vpop.f32.mrf.mxu0  ;;  %v7314_v30 = vld [vmem:[#allocation9_spill] sm:$0xff] }
 0xa44   :  { %v3519_v47 = vadd.f32 %v3518_v1, %v3485_v33  ;;  %v3575_v4 = vsel %vm150_vm2, %v6944_v61, 0.0 }
 0xa45   :  { %3576 = vadd.xlane.f32.xlu0 %v3575_v4  ;;  %v7315_v4 = vld [vmem:[#allocation10_spill] sm:$0xff] }
 0xa46   :  { %v3540_v28 = vadd.f32 %v3519_v47, %v6766_v23  ;;  %v2122_v23 = vadd.f32 %v6516_v7, %v6382_v17 }
 0xa47   :  { %v3418_v9 = vpop.f32.mrf.mxu2  ;;  %v3452_v6 = vpop.f32.mrf.mxu3 }
 0xa48   :  { %v3453_v27 = vadd.f32 %v3452_v6, %v3418_v9  ;;  %v3552_v58 = vadd.f32 %v6925_v38, %v3540_v28  ;;  %v2156_v46 = vadd.f32 %v6518_v56, %v2122_v23  ;;  %v2870_v56 = vadd.f32 %v6770_v20, %v2836_v40  ;;  %v3528_v21 = vpop.f32.mrf.mxu1  ;;  %v7318_v23 = vld [vmem:[#allocation29_spill] sm:$0xff]  ;;  %v7323_v40 = vld [vmem:[#allocation11_spill] sm:$0xff] }
 0xa4a   :  { %v3487_v26 = vadd.f32 %v3486_v15, %v3453_v27  ;;  %v6955_v54 = vadd.f32 %v3552_v58, %v7312_v11  ;;  %v2190_v7 = vadd.f32 %v6488_v13, %v2156_v46  ;;  %v7316_v27 = vld [vmem:[#allocation12_spill] sm:$0xff] }
 0xa4c   :  { %v3521_v62 = vadd.f32 %v3520_v19, %v3487_v26  ;;  %v3578_v2 = vsel %vm150_vm2, %v6955_v54, 0.0  ;;  %v2224_v25 = vadd.f32 %v6490_v53, %v2190_v7  ;;  %v3494_v19 = vpop.f32.mrf.mxu0  ;;  %v1833_v26 = vadd.f32 %v6392_v43, %v6390_v8  ;;  %v7325_v7 = vld [vmem:[#allocation25_spill] sm:$0xff] }
 0xa4d   :  { %3579 = vadd.xlane.f32.xlu2 %v3578_v2  ;;  %v7317_v2 = vld [vmem:[#allocation28_spill] sm:$0xff] }
 0xa4e   :  { %v3541_v36 = vadd.f32 %v3521_v62, %v2885_v57  ;;  %v2887_v48 = vadd.f32 %v2870_v56, %v2224_v25  ;;  %v1867_v11 = vadd.f32 %v6374_v10, %v1833_v26 }
 0xa4f   :  { %v3421_v59 = vpop.f32.mrf.mxu2  ;;  %v3455_v22 = vpop.f32.mrf.mxu3 }
 0xa50   :  { %v3456_v29 = vadd.f32 %v3455_v22, %v3421_v59  ;;  %v3553_v51 = vadd.f32 %v6925_v38, %v3541_v36  ;;  %v1901_v62 = vadd.f32 %v6376_v39, %v1867_v11  ;;  %v7319_v59 = vld [vmem:[#allocation17_spill] sm:$0xff]  ;;  %v3530_v43 = vpop.f32.mrf.mxu1 }
 0xa52   :  { %v3490_v1 = vadd.f32 %v3489_v12, %v3456_v29  ;;  %v6966_v34 = vadd.f32 %v3553_v51, %v7313_v60  ;;  %v7320_v29 = vld [vmem:[#allocation5_spill] sm:$0xff]  ;;  %v7321_v51 = vld [vmem:[#allocation8_spill] sm:$0xff] }
 0xa53   :  { %v1838_v46 = vadd.f32 %v7321_v51, %v7320_v29  ;;  %v7337_v29 = vld [vmem:[#allocation27_spill] sm:$0xff] }
 0xa54   :  { %v3524_v41 = vadd.f32 %v3523_v24, %v3490_v1  ;;  %v3581_v17 = vsel %vm150_vm2, %v6966_v34, 0.0  ;;  %v2807_v24 = vadd.f32 %v7318_v23, %v7317_v2  ;;  %v3496_v36 = vpop.f32.mrf.mxu0  ;;  %v7322_v1 = vld [vmem:[#allocation24_spill] sm:$0xff] }
 0xa55   :  { %3582 = vadd.xlane.f32.xlu1 %v3581_v17  ;;  %v7324_v17 = vld [vmem:[#allocation18_spill] sm:$0xff] }
 0xa56   :  { %v3542_v32 = vadd.f32 %v3524_v41, %v6807_v31  ;;  %v2841_v8 = vadd.f32 %v7322_v1, %v2807_v24  ;;  %v7338_v1 = vld [vmem:[#allocation21_spill] sm:$0xff] }
 0xa57   :  { %v3423_v42 = vpop.f32.mrf.mxu2  ;;  %v3457_v16 = vpop.f32.mrf.mxu3 }
 0xa58   :  { %v3458_v5 = vadd.f32 %v3457_v16, %v3423_v42  ;;  %v3554_v35 = vadd.f32 %v6925_v38, %v3542_v32  ;;  %v7326_v32 = vld [vmem:[#allocation14_spill] sm:$0xff] }
 0xa5a   :  { %v3492_v18 = vadd.f32 %v3491_v63, %v3458_v5  ;;  %v6977_v37 = vadd.f32 %v3554_v35, %v7314_v30  ;;  %v2875_v63 = vadd.f32 %v7325_v7, %v2841_v8  ;;  %v7327_v5 = vld [vmem:[#allocation19_spill] sm:$0xff]  ;;  %v7328_v30 = vld [vmem:[#allocation2_spill] sm:$0xff] }
 0xa5b   :  { %v7339_v7 = vld [vmem:[#allocation15_spill] sm:$0xff] }
 0xa5c   :  { %v3526_v15 = vadd.f32 %v3525_v3, %v3492_v18  ;;  %v3584_v13 = vsel %vm150_vm2, %v6977_v37, 0.0  ;;  %v3499_v3 = vpop.f32.mrf.mxu0 }
 0xa5d   :  { %3585 = vadd.xlane.f32.xlu0 %v3584_v13 }
 0xa5e   :  { %v3543_v31 = vadd.f32 %v3526_v15, %v2887_v48  ;;  %v7329_v15 = vld [vmem:[#allocation22_spill] sm:$0xff] }
 0xa5f   :  { %v3426_v33 = vpop.f32.mrf.mxu2  ;;  %v3460_v49 = vpop.f32.mrf.mxu3 }
 0xa60   :  { %v3461_v20 = vadd.f32 %v3460_v49, %v3426_v33  ;;  %v3555_v50 = vadd.f32 %v6925_v38, %v3543_v31  ;;  %v3533_v31 = vpop.f32.mrf.mxu1 }
 0xa62   :  { %v3495_v47 = vadd.f32 %v3494_v19, %v3461_v20  ;;  %v6983_v53 = vadd.f32 %v3555_v50, %v7315_v4  ;;  %v7331_v4 = vld [vmem:[#allocation32_spill] sm:$0xff] }
 0xa64   :  { %v3529_v28 = vadd.f32 %v3528_v21, %v3495_v47  ;;  %v3587_v9 = vsel %vm150_vm2, %v6983_v53, 0.0  ;;  %v7330_v47 = vld [vmem:[#allocation31_spill] sm:$0xff]  ;;  %v3501_v2 = vpop.f32.mrf.mxu0 }
 0xa65   :  { %3588 = vadd.xlane.f32.xlu2 %v3587_v9  ;;  %v2812_v21 = vadd.f32 %v7331_v4, %v7330_v47  ;;  %v7332_v9 = vld [vmem:[#allocation23_spill] sm:$0xff] }
 0xa66   :  { %v3544_v6 = vadd.f32 %v3529_v28, %v6842_v45  ;;  %v2127_v45 = vadd.f32 %v6554_v44, %v1901_v62  ;;  %v1872_v44 = vadd.f32 %v7324_v17, %v1838_v46  ;;  %v7334_v62 = vld [vmem:[#allocation20_spill] sm:$0xff] }
 0xa67   :  { %v3428_v57 = vpop.f32.mrf.mxu2  ;;  %v3462_v12 = vpop.f32.mrf.mxu3 }
 0xa68   :  { %v3556_v55 = vadd.f32 %v6925_v38, %v3544_v6  ;;  %v2161_v22 = vadd.f32 %v7319_v59, %v2127_v45  ;;  %v3463_v52 = vadd.f32 %v3462_v12, %v3428_v57  ;;  %v1906_v35 = vadd.f32 %v7327_v5, %v1872_v44 }
 0xa6a   :  { %v6990_v58 = vadd.f32 %v3556_v55, %v7316_v27  ;;  %v2195_v41 = vadd.f32 %v7323_v40, %v2161_v22  ;;  %v3497_v39 = vadd.f32 %v3496_v36, %v3463_v52  ;;  %v2132_v13 = vadd.f32 %v7329_v15, %v1906_v35  ;;  %v7335_v36 = vld [vmem:[#allocation13_spill] sm:$0xff]  ;;  %v7336_v22 = vld [vmem:[#allocation30_spill] sm:$0xff] }
 0xa6c   :  { %v3590_v14 = vsel %vm150_vm2, %v6990_v58, 0.0  ;;  %v2229_v42 = vadd.f32 %v7326_v32, %v2195_v41  ;;  %v3531_v16 = vadd.f32 %v3530_v43, %v3497_v39  ;;  %v2166_v6 = vadd.f32 %v7332_v9, %v2132_v13  ;;  %v3535_v43 = vpop.f32.mrf.mxu1 }
 0xa6d   :  { %3591 = vadd.xlane.f32.xlu2 %v3590_v14 }
 0xa6e   :  { %v2889_v18 = vadd.f32 %v2875_v63, %v2229_v42  ;;  %v2200_v45 = vadd.f32 %v7334_v62, %v2166_v6 }
 0xa6f   :  { %v3431_v10 = vpop.f32.mrf.mxu2  ;;  %v3465_v60 = vpop.f32.mrf.mxu3 }
 0xa70   :  { %v3466_v56 = vadd.f32 %v3465_v60, %v3431_v10  ;;  %v3545_v20 = vadd.f32 %v3531_v16, %v2889_v18  ;;  %v2234_v8 = vadd.f32 %v7338_v1, %v2200_v45 }
 0xa72   :  { %v3500_v33 = vadd.f32 %v3499_v3, %v3466_v56  ;;  %v3557_v26 = vadd.f32 %v6925_v38, %v3545_v20 }
 0xa74   :  { %v3534_v55 = vadd.f32 %v3533_v31, %v3500_v33  ;;  %v7029_v59 = vadd.f32 %v3557_v26, %v7335_v36 }
 0xa76   :  { %v3546_v52 = vadd.f32 %v3534_v55, %v7336_v22 }
 0xa77   :  { %v3433_v50 = vpop.f32.mrf.mxu2  ;;  %v3467_v19 = vpop.f32.mrf.mxu3 }
 0xa78   :  { %v3468_v27 = vadd.f32 %v3467_v19, %v3433_v50  ;;  %v3558_v40 = vadd.f32 %v6925_v38, %v3546_v52 }
 0xa7a   :  { %v3502_v23 = vadd.f32 %v3501_v2, %v3468_v27  ;;  %v7045_v63 = vadd.f32 %v3558_v40, %v7339_v7 }
 0xa7c   :  { %v3536_v10 = vadd.f32 %v3535_v43, %v3502_v23  ;;  %v3596_v56 = vsel %vm150_vm2, %v7045_v63, 0.0 }
 0xab0   :  { %v3574_v25 = vpop.xlane.xlu1 %3573 }
 0xab1   :  { %v3602_v48 = vmul.f32 %v3574_v25, %v7328_v30  ;;  %v7340_v25 = vld [vmem:[#allocation16_spill] sm:$0xff] }
 0xab3   :  { %v7013_v49 = vsub.f32 %v6933_v0, %v3602_v48  ;;  %v7333_v0 = vld [vmem:[#allocation26_spill] sm:$0xff] }
 0xab4   :  { %v2846_v57 = vadd.f32 %v7333_v0, %v2812_v21 }
 0xab5   :  { %v3622_v28 = vmul.f32 %v7013_v49, %v7013_v49 }
 0xab6   :  { %v2880_v51 = vadd.f32 %v7337_v29, %v2846_v57 }
 0xab7   :  { %v3632_v14 = vsel %vm150_vm2, %v3622_v28, 0.0 }
 0xab8   :  { %v3577_v11 = vpop.xlane.xlu0 %3576  ;;  %3633 = vadd.xlane.f32.xlu1 %v3632_v14  ;;  %v2891_v39 = vadd.f32 %v2880_v51, %v2234_v8 }
 0xab9   :  { %v3603_v12 = vmul.f32 %v3577_v11, %v7328_v30 }
 0xaba   :  { %v3547_v32 = vadd.f32 %v3536_v10, %v2891_v39 }
 0xabb   :  { %v7026_v24 = vsub.f32 %v6944_v61, %v3603_v12  ;;  %v3593_v61 = vsel %vm150_vm2, %v7029_v59, 0.0 }
 0xabc   :  { %v3559_v5 = vadd.f32 %v6925_v38, %v3547_v32 }
 0xabd   :  { %v3623_v46 = vmul.f32 %v7026_v24, %v7026_v24 }
 0xabe   :  { %v7058_v18 = vadd.f32 %v3559_v5, %v7340_v25 }
 0xabf   :  { %v3635_v60 = vsel %vm150_vm2, %v3623_v46, 0.0 }
 0xac0   :  { %v3580_v41 = vpop.xlane.xlu2 %3579  ;;  %3636 = vadd.xlane.f32.xlu0 %v3635_v60  ;;  %3594 = vadd.xlane.f32.xlu1 %v3593_v61  ;;  %v3599_v13 = vsel %vm150_vm2, %v7058_v18, 0.0 }
 0xac1   :  { %v3604_v17 = vmul.f32 %v3580_v41, %v7328_v30 }
 0xac3   :  { %v7042_v44 = vsub.f32 %v6955_v54, %v3604_v17 }
 0xac5   :  { %v3624_v42 = vmul.f32 %v7042_v44, %v7042_v44 }
 0xac7   :  { %v3638_v16 = vsel %vm150_vm2, %v3624_v42, 0.0 }
 0xac8   :  { %v3583_v35 = vpop.xlane.xlu1 %3582  ;;  %3639 = vadd.xlane.f32.xlu0 %v3638_v16  ;;  %3597 = vadd.xlane.f32.xlu1 %v3596_v56 }
 0xac9   :  { %v3605_v54 = vmul.f32 %v3583_v35, %v7328_v30 }
 0xacb   :  { %v7055_v3 = vsub.f32 %v6966_v34, %v3605_v54  ;;  %v7114_v54 = vld [vmem:[%s7231_s5 + $0x7] ss:$0 sm:$0xff] }
 0xacd   :  { %v3625_v48 = vmul.f32 %v7055_v3, %v7055_v3 }
 0xacf   :  { %v3641_v15 = vsel %vm150_vm2, %v3625_v48, 0.0 }
 0xad0   :  { %v3586_v38 = vpop.xlane.xlu0 %3585  ;;  %3642 = vadd.xlane.f32.xlu2 %v3641_v15  ;;  %3600 = vadd.xlane.f32.xlu0 %v3599_v13 }
 0xad1   :  { %v3606_v31 = vmul.f32 %v3586_v38, %v7328_v30 }
 0xad3   :  { %v7067_v33 = vsub.f32 %v6977_v37, %v3606_v31 }
 0xad5   :  { %v3626_v34 = vmul.f32 %v7067_v33, %v7067_v33 }
 0xad7   :  { %v3644_v20 = vsel %vm150_vm2, %v3626_v34, 0.0 }
 0xad8   :  { %v3589_v50 = vpop.xlane.xlu2 %3588  ;;  %3645 = vadd.xlane.f32.xlu2 %v3644_v20 }
 0xad9   :  { %v3607_v19 = vmul.f32 %v3589_v50, %v7328_v30  ;;  %v7125_v50 = vld [vmem:[%s7231_s5 + $0x8] ss:$0 sm:$0xff] }
 0xadb   :  { %v7074_v47 = vsub.f32 %v6983_v53, %v3607_v19  ;;  %v5060_v53 = vld [vmem:[%s7232_s4 + $0x28] sm:$0xff] }
 0xadc   :  { %3859 = vmatpush.bf16.msra.mxu2 %v5060_v53 }
 0xadd   :  { %v3627_v4 = vmul.f32 %v7074_v47, %v7074_v47 }
 0xadf   :  { %v3647_v21 = vsel %vm150_vm2, %v3627_v4, 0.0 }
 0xae0   :  { %v3592_v28 = vpop.xlane.xlu2 %3591  ;;  %3648 = vadd.xlane.f32.xlu1 %v3647_v21 }
 0xae1   :  { %v3608_v37 = vmul.f32 %v3592_v28, %v7328_v30 }
 0xae3   :  { %v7081_v9 = vsub.f32 %v6990_v58, %v3608_v37  ;;  %v5059_v58 = vld [vmem:[%s7232_s4 + $0x20] sm:$0xff] }
 0xae4   :  { %3860 = vmatpush.bf16.msra.mxu2 %v5059_v58 }
 0xae5   :  { %v3628_v6 = vmul.f32 %v7081_v9, %v7081_v9 }
 0xae7   :  { %v3650_v55 = vsel %vm150_vm2, %v3628_v6, 0.0 }
 0xae8   :  { %3651 = vadd.xlane.f32.xlu0 %v3650_v55 }
 0xb2b   :  { %v3634_v27 = vpop.xlane.xlu1 %3633 }
 0xb2c   :  { %v3662_v14 = vmul.f32 %v3634_v27, %v7328_v30 }
 0xb2e   :  { %v3672_v26 = vadd.f32 1e-05, %v3662_v14 }
 0xb30   :  { %5149 = vrsqrt.f32 %v3672_v26  ;;  %vm3688_vm6 = vweird.f32 %v3672_v26 }
 0xb33   :  { %v3637_v11 = vpop.xlane.xlu0 %3636  ;;  %v3595_v0 = vpop.xlane.xlu1 %3594 }
 0xb34   :  { %v3663_v57 = vmul.f32 %v3637_v11, %v7328_v30  ;;  %v3609_v12 = vmul.f32 %v3595_v0, %v7328_v30 }
 0xb36   :  { %v5150_v62 = vpop.eup %5149  ;;  %v3673_v45 = vadd.f32 1e-05, %v3663_v57  ;;  %v7096_v2 = vsub.f32 %v7029_v59, %v3609_v12 }
 0xb37   :  { %v3683_v23 = vmul.f32 %v5150_v62, %v3672_v26  ;;  %vm3689_vm5 = vweird.f32 %v5150_v62 }
 0xb38   :  { %5151 = vrsqrt.f32 %v3673_v45  ;;  %v3629_v36 = vmul.f32 %v7096_v2, %v7096_v2  ;;  %vm3690_vm7 = vmor %vm3688_vm6, %vm3689_vm5  ;;  %vm3698_vm9 = vweird.f32 %v3673_v45 }
 0xb39   :  { %v3684_v22 = vmul.f32 %v5150_v62, %v3683_v23 }
 0xb3a   :  { %v3653_v52 = vsel %vm150_vm2, %v3629_v36, 0.0 }
 0xb3b   :  { %v3685_v29 = vmul.f32 0.5, %v3684_v22  ;;  %v3640_v51 = vpop.xlane.xlu0 %3639  ;;  %3654 = vadd.xlane.f32.xlu2 %v3653_v52  ;;  %v3598_v46 = vpop.xlane.xlu1 %3597 }
 0xb3c   :  { %v3664_v1 = vmul.f32 %v3640_v51, %v7328_v30  ;;  %v3610_v8 = vmul.f32 %v3598_v46, %v7328_v30 }
 0xb3d   :  { %v3686_v43 = vsub.f32 1.5, %v3685_v29 }
 0xb3e   :  { %v5152_v10 = vpop.eup %5151  ;;  %v3674_v59 = vadd.f32 1e-05, %v3664_v1  ;;  %v7104_v60 = vsub.f32 %v7045_v63, %v3610_v8 }
 0xb3f   :  { %v3687_v61 = vmul.f32 %v5150_v62, %v3686_v43  ;;  %v3693_v40 = vmul.f32 %v5152_v10, %v3673_v45  ;;  %vm3699_vm8 = vweird.f32 %v5152_v10 }
 0xb40   :  { %5153 = vrsqrt.f32 %v3674_v59  ;;  %v3630_v41 = vmul.f32 %v7104_v60, %v7104_v60  ;;  %vm3700_vm10 = vmor %vm3698_vm9, %vm3699_vm8  ;;  %vm3708_vm12 = vweird.f32 %v3674_v59 }
 0xb41   :  { %v3694_v39 = vmul.f32 %v5152_v10, %v3693_v40  ;;  %v3691_v7 = vsel %vm3690_vm7, %v5150_v62, %v3687_v61 }
 0xb42   :  { %v3656_v17 = vsel %vm150_vm2, %v3630_v41, 0.0  ;;  %v3782_v25 = vmul.f32 %v3691_v7, %v7013_v49 }
 0xb43   :  { %v3695_v32 = vmul.f32 0.5, %v3694_v39  ;;  %v3643_v42 = vpop.xlane.xlu2 %3642  ;;  %v3601_v16 = vpop.xlane.xlu0 %3600  ;;  %3657 = vadd.xlane.f32.xlu1 %v3656_v17 }
 0xb44   :  { %v3665_v63 = vmul.f32 %v3643_v42, %v7328_v30  ;;  %v3611_v56 = vmul.f32 %v3601_v16, %v7328_v30  ;;  %v3793_v49 = vmul.f32 %v7114_v54, %v3782_v25 }
 0xb45   :  { %v3696_v5 = vsub.f32 1.5, %v3695_v32 }
 0xb46   :  { %v5154_v35 = vpop.eup %5153  ;;  %v3675_v48 = vadd.f32 1e-05, %v3665_v63  ;;  %v7118_v15 = vsub.f32 %v7058_v18, %v3611_v56  ;;  %v3804_v53 = vadd.f32 %v7125_v50, %v3793_v49 }
 0xb47   :  { %v3697_v13 = vmul.f32 %v5152_v10, %v3696_v5  ;;  %v3703_v38 = vmul.f32 %v5154_v35, %v3674_v59  ;;  %vm3709_vm11 = vweird.f32 %v5154_v35 }
 0xb48   :  { %5155 = vrsqrt.f32 %v3675_v48  ;;  %v3631_v31 = vmul.f32 %v7118_v15, %v7118_v15  ;;  %vm3710_vm13 = vmor %vm3708_vm12, %vm3709_vm11  ;;  %vm3718_vm15 = vweird.f32 %v3675_v48 }
 0xb49   :  { %v3701_v34 = vsel %vm3700_vm10, %v5152_v10, %v3697_v13  ;;  %v3704_v20 = vmul.f32 %v5154_v35, %v3703_v38 }
 0xb4a   :  { %v3783_v18 = vmul.f32 %v3701_v34, %v7026_v24  ;;  %v3659_v19 = vsel %vm150_vm2, %v3631_v31, 0.0 }
 0xb4b   :  { %v3705_v4 = vmul.f32 0.5, %v3704_v20  ;;  %v3646_v21 = vpop.xlane.xlu2 %3645  ;;  %3660 = vadd.xlane.f32.xlu0 %v3659_v19 }
 0xb4c   :  { %v3794_v28 = vmul.f32 %v7114_v54, %v3783_v18  ;;  %v3666_v37 = vmul.f32 %v3646_v21, %v7328_v30 }
 0xb4d   :  { %v3706_v6 = vsub.f32 1.5, %v3705_v4 }
 0xb4e   :  { %v5156_v55 = vpop.eup %5155  ;;  %v3805_v27 = vadd.f32 %v7125_v50, %v3794_v28  ;;  %v3676_v14 = vadd.f32 1e-05, %v3666_v37 }
 0xb4f   :  { %v3707_v26 = vmul.f32 %v5154_v35, %v3706_v6  ;;  %v3713_v58 = vmul.f32 %v5156_v55, %v3675_v48  ;;  %vm3719_vm14 = vweird.f32 %v5156_v55 }
 0xb50   :  { %v3819_v24 = vpack.c.bf16 %v3805_v27, %v3804_v53  ;;  %5157 = vrsqrt.f32 %v3676_v14  ;;  %vm3720_vm0 = vmor %vm3718_vm15, %vm3719_vm14  ;;  %vm3728_vm3 = vweird.f32 %v3676_v14 }
 0xb51   :  { %v3714_v11 = vmul.f32 %v5156_v55, %v3713_v58  ;;  %v3711_v0 = vsel %vm3710_vm13, %v5154_v35, %v3707_v26  ;;  %v5062_v58 = vld [vmem:[%s7232_s4 + $0x38] sm:$0xff] }
 0xb52   :  { %4858 = vmatmul.msk.bf16.vlgmr.msra.gmra.mxu2 %vm150_vm2, %v3819_v24  ;;  %v3784_v36 = vmul.f32 %v3711_v0, %v7042_v44  ;;  %3942 = vmatpush.bf16.msrb.mxu3 %v5062_v58 }
 0xb53   :  { %v3715_v57 = vmul.f32 0.5, %v3714_v11  ;;  %v3649_v12 = vpop.xlane.xlu1 %3648 }
 0xb54   :  { %v3667_v62 = vmul.f32 %v3649_v12, %v7328_v30  ;;  %v3795_v8 = vmul.f32 %v7114_v54, %v3784_v36 }
 0xb55   :  { %v3716_v45 = vsub.f32 1.5, %v3715_v57 }
 0xb56   :  { %v5158_v23 = vpop.eup %5157  ;;  %v3677_v22 = vadd.f32 1e-05, %v3667_v62  ;;  %v3806_v40 = vadd.f32 %v7125_v50, %v3795_v8  ;;  %v5061_v62 = vld [vmem:[%s7232_s4 + $0x30] sm:$0xff] }
 0xb57   :  { %v3717_v52 = vmul.f32 %v5156_v55, %v3716_v45  ;;  %v3723_v29 = vmul.f32 %v5158_v23, %v3676_v14  ;;  %vm3729_vm1 = vweird.f32 %v5158_v23  ;;  %3943 = vmatpush.bf16.msrb.mxu3 %v5061_v62 }
 0xb58   :  { %5159 = vrsqrt.f32 %v3677_v22  ;;  %vm3730_vm4 = vmor %vm3728_vm3, %vm3729_vm1  ;;  %vm3738_vm6 = vweird.f32 %v3677_v22 }
 0xb59   :  { %v3721_v51 = vsel %vm3720_vm0, %v5156_v55, %v3717_v52  ;;  %v3724_v46 = vmul.f32 %v5158_v23, %v3723_v29 }
 0xb5a   :  { %v3785_v1 = vmul.f32 %v3721_v51, %v7055_v3 }
 0xb5b   :  { %v3725_v43 = vmul.f32 0.5, %v3724_v46  ;;  %v3652_v31 = vpop.xlane.xlu0 %3651 }
 0xb5c   :  { %v3796_v10 = vmul.f32 %v7114_v54, %v3785_v1 }
 0xb5d   :  { %v3726_v59 = vsub.f32 1.5, %v3725_v43 }
 0xb5e   :  { %v5160_v61 = vpop.eup %5159  ;;  %v3807_v44 = vadd.f32 %v7125_v50, %v3796_v10 }
 0xb5f   :  { %v3727_v41 = vmul.f32 %v5158_v23, %v3726_v59  ;;  %v3733_v39 = vmul.f32 %v5160_v61, %v3677_v22  ;;  %vm3739_vm5 = vweird.f32 %v5160_v61 }
 0xb60   :  { %v3820_v17 = vpack.c.bf16 %v3807_v44, %v3806_v40  ;;  %vm3740_vm7 = vmor %vm3738_vm6, %vm3739_vm5 }
 0xb61   :  { %v3734_v7 = vmul.f32 %v5160_v61, %v3733_v39  ;;  %v3731_v3 = vsel %vm3730_vm4, %v5158_v23, %v3727_v41 }
 0xb62   :  { %4859 = vmatmul.msk.bf16.gmra.mxu2 %vm150_vm2, %v3820_v17  ;;  %v3786_v16 = vmul.f32 %v3731_v3, %v7067_v33  ;;  %v3668_v33 = vmul.f32 %v3652_v31, %v7328_v30 }
 0xb63   :  { %v3735_v32 = vmul.f32 0.5, %v3734_v7 }
 0xb64   :  { %v3797_v35 = vmul.f32 %v7114_v54, %v3786_v16  ;;  %v3678_v34 = vadd.f32 1e-05, %v3668_v33 }
 0xb65   :  { %v3736_v42 = vsub.f32 1.5, %v3735_v32 }
 0xb66   :  { %v3808_v48 = vadd.f32 %v7125_v50, %v3797_v35  ;;  %5161 = vrsqrt.f32 %v3678_v34  ;;  %vm3748_vm9 = vweird.f32 %v3678_v34 }
 0xb67   :  { %v3737_v63 = vmul.f32 %v5160_v61, %v3736_v42 }
 0xb69   :  { %v3741_v56 = vsel %vm3740_vm7, %v5160_v61, %v3737_v63 }
 0xb6a   :  { %v3787_v5 = vmul.f32 %v3741_v56, %v7074_v47 }
 0xb6c   :  { %v3798_v25 = vmul.f32 %v7114_v54, %v3787_v5  ;;  %v5162_v20 = vpop.eup %5161  ;;  %v5084_v5 = vld [vmem:[%s7231_s5 + $0x9] ss:$0 sm:$0xff] }
 0xb6d   :  { %v3743_v49 = vmul.f32 %v5162_v20, %v3678_v34  ;;  %vm3749_vm8 = vweird.f32 %v5162_v20 }
 0xb6e   :  { %v3809_v13 = vadd.f32 %v7125_v50, %v3798_v25  ;;  %vm3750_vm10 = vmor %vm3748_vm9, %vm3749_vm8 }
 0xb6f   :  { %v3744_v18 = vmul.f32 %v5162_v20, %v3743_v49 }
 0xb70   :  { %v3821_v38 = vpack.c.bf16 %v3809_v13, %v3808_v48 }
 0xb71   :  { %v3745_v21 = vmul.f32 0.5, %v3744_v18 }
 0xb72   :  { %4860 = vmatmul.msk.bf16.gmra.mxu2 %vm150_vm2, %v3821_v38 }
 0xb73   :  { %v3746_v28 = vsub.f32 1.5, %v3745_v21 }
 0xb75   :  { %v3747_v27 = vmul.f32 %v5162_v20, %v3746_v28 }
 0xb77   :  { %v3751_v24 = vsel %vm3750_vm10, %v5162_v20, %v3747_v27 }
 0xb78   :  { %v3788_v23 = vmul.f32 %v3751_v24, %v7081_v9 }
 0xb7a   :  { %v3799_v46 = vmul.f32 %v7114_v54, %v3788_v23 }
 0xb7c   :  { %v3810_v9 = vadd.f32 %v7125_v50, %v3799_v46 }
 0xbae   :  { %v3655_v47 = vpop.xlane.xlu2 %3654 }
 0xbaf   :  { %v3669_v19 = vmul.f32 %v3655_v47, %v7328_v30 }
 0xbb1   :  { %v3679_v4 = vadd.f32 1e-05, %v3669_v19 }
 0xbb3   :  { %5163 = vrsqrt.f32 %v3679_v4  ;;  %vm3758_vm12 = vweird.f32 %v3679_v4 }
 0xbb6   :  { %v3658_v37 = vpop.xlane.xlu1 %3657 }
 0xbb7   :  { %v3670_v6 = vmul.f32 %v3658_v37, %v7328_v30 }
 0xbb9   :  { %v5164_v55 = vpop.eup %5163  ;;  %v3680_v53 = vadd.f32 1e-05, %v3670_v6 }
 0xbba   :  { %v3753_v14 = vmul.f32 %v5164_v55, %v3679_v4  ;;  %vm3759_vm11 = vweird.f32 %v5164_v55 }
 0xbbb   :  { %5165 = vrsqrt.f32 %v3680_v53  ;;  %vm3760_vm13 = vmor %vm3758_vm12, %vm3759_vm11  ;;  %vm3768_vm15 = vweird.f32 %v3680_v53 }
 0xbbc   :  { %v3754_v26 = vmul.f32 %v5164_v55, %v3753_v14  ;;  %v5063_v14 = vld [vmem:[%s7240_s11] sm:$0xff] }
 0xbbe   :  { %v3755_v11 = vmul.f32 0.5, %v3754_v26  ;;  %v3661_v0 = vpop.xlane.xlu0 %3660 }
 0xbbf   :  { %v3671_v57 = vmul.f32 %v3661_v0, %v7328_v30 }
 0xbc0   :  { %v3756_v12 = vsub.f32 1.5, %v3755_v11 }
 0xbc1   :  { %v5166_v45 = vpop.eup %5165  ;;  %v3681_v36 = vadd.f32 1e-05, %v3671_v57 }
 0xbc2   :  { %v3757_v22 = vmul.f32 %v5164_v55, %v3756_v12  ;;  %v3763_v52 = vmul.f32 %v5166_v45, %v3680_v53  ;;  %vm3769_vm14 = vweird.f32 %v5166_v45  ;;  %v5064_v53 = vld [vmem:[%s7240_s11 + $0x8] sm:$0xff] }
 0xbc3   :  { %5167 = vrsqrt.f32 %v3681_v36  ;;  %vm3770_vm0 = vmor %vm3768_vm15, %vm3769_vm14  ;;  %vm3778_vm3 = vweird.f32 %v3681_v36  ;;  %4026 = vmatpush.bf16.msra.mxu0 %v5064_v53 }
 0xbc4   :  { %v3761_v29 = vsel %vm3760_vm13, %v5164_v55, %v3757_v22  ;;  %v3764_v51 = vmul.f32 %v5166_v45, %v3763_v52  ;;  %v5085_v22 = vld [vmem:[%s7231_s5 + $0xa] ss:$0 sm:$0xff] }
 0xbc5   :  { %v3789_v30 = vmul.f32 %v3761_v29, %v7096_v2 }
 0xbc6   :  { %v3765_v1 = vmul.f32 0.5, %v3764_v51 }
 0xbc7   :  { %v3800_v8 = vmul.f32 %v7114_v54, %v3789_v30  ;;  %4027 = vmatpush.bf16.msra.mxu0 %v5063_v14 }
 0xbc8   :  { %v3766_v43 = vsub.f32 1.5, %v3765_v1 }
 0xbc9   :  { %v5168_v10 = vpop.eup %5167  ;;  %v3811_v59 = vadd.f32 %v7125_v50, %v3800_v8 }
 0xbca   :  { %v3767_v61 = vmul.f32 %v5166_v45, %v3766_v43  ;;  %v3773_v40 = vmul.f32 %v5168_v10, %v3681_v36  ;;  %vm3779_vm1 = vweird.f32 %v5168_v10 }
 0xbcb   :  { %v3822_v44 = vpack.c.bf16 %v3811_v59, %v3810_v9  ;;  %vm3780_vm4 = vmor %vm3778_vm3, %vm3779_vm1 }
 0xbcc   :  { %v3774_v41 = vmul.f32 %v5168_v10, %v3773_v40  ;;  %v3771_v2 = vsel %vm3770_vm0, %v5166_v45, %v3767_v61 }
 0xbcd   :  { %4861 = vmatmul.msk.bf16.gmra.mxu2 %vm150_vm2, %v3822_v44  ;;  %v3790_v7 = vmul.f32 %v3771_v2, %v7104_v60 }
 0xbce   :  { %v3775_v39 = vmul.f32 0.5, %v3774_v41 }
 0xbcf   :  { %v3801_v63 = vmul.f32 %v7114_v54, %v3790_v7 }
 0xbd0   :  { %v3776_v17 = vsub.f32 1.5, %v3775_v39 }
 0xbd1   :  { %v3812_v35 = vadd.f32 %v7125_v50, %v3801_v63 }
 0xbd2   :  { %v3777_v3 = vmul.f32 %v5168_v10, %v3776_v17 }
 0xbd4   :  { %v3781_v32 = vsel %vm3780_vm4, %v5168_v10, %v3777_v3 }
 0xbd5   :  { %v3791_v42 = vmul.f32 %v3781_v32, %v7118_v15  ;;  %v3862_v16 = vpop.f32.mrf.mxu2 }
 0xbd6   :  { %v3863_v48 = vadd.f32 %v5084_v5, %v3862_v16 }
 0xbd7   :  { %v3802_v56 = vmul.f32 %v7114_v54, %v3791_v42 }
 0xbd8   :  { %v3887_v15 = vmax.f32 %v3863_v48, 0.0 }
 0xbd9   :  { %v3813_v25 = vadd.f32 %v7125_v50, %v3802_v56 }
 0xbdb   :  { %v3823_v60 = vpack.c.bf16 %v3813_v25, %v3812_v35 }
 0xbdd   :  { %v3864_v13 = vpop.f32.mrf.mxu2  ;;  %4862 = vmatmul.msk.bf16.gmra.mxu2 %vm150_vm2, %v3823_v60 }
 0xbde   :  { %v3865_v38 = vadd.f32 %v5084_v5, %v3864_v13  ;;  %v5086_v13 = vld [vmem:[%s7241_s12] ss:$0 sm:$0xff] }
 0xbe0   :  { %v3888_v31 = vmax.f32 %v3865_v38, 0.0 }
 0xbe2   :  { %v3902_v33 = vpack.c.bf16 %v3888_v31, %v3887_v15 }
 0xbe4   :  { %4875 = vmatmul.msk.bf16.vlgmr.msrb.gmra.mxu3 %vm150_vm2, %v3902_v33 }
 0xbe5   :  { %v3867_v54 = vpop.f32.mrf.mxu2 }
 0xbe6   :  { %v3868_v34 = vadd.f32 %v5084_v5, %v3867_v54 }
 0xbe8   :  { %v3889_v18 = vmax.f32 %v3868_v34, 0.0 }
 0xbed   :  { %v3869_v20 = vpop.f32.mrf.mxu2 }
 0xbee   :  { %v3870_v49 = vadd.f32 %v5084_v5, %v3869_v20 }
 0xbf0   :  { %v3890_v47 = vmax.f32 %v3870_v49, 0.0 }
 0xbf2   :  { %v3903_v19 = vpack.c.bf16 %v3890_v47, %v3889_v18 }
 0xbf4   :  { %4876 = vmatmul.msk.bf16.gmra.mxu3 %vm150_vm2, %v3903_v19 }
 0xbf5   :  { %v3872_v50 = vpop.f32.mrf.mxu2 }
 0xbf6   :  { %v3873_v4 = vadd.f32 %v5084_v5, %v3872_v50 }
 0xbf8   :  { %v3891_v37 = vmax.f32 %v3873_v4, 0.0 }
 0xbfd   :  { %v3874_v21 = vpop.f32.mrf.mxu2 }
 0xbfe   :  { %v3875_v28 = vadd.f32 %v5084_v5, %v3874_v21 }
 0xc00   :  { %v3892_v6 = vmax.f32 %v3875_v28, 0.0 }
 0xc02   :  { %v3904_v55 = vpack.c.bf16 %v3892_v6, %v3891_v37 }
 0xc04   :  { %4877 = vmatmul.msk.bf16.gmra.mxu3 %vm150_vm2, %v3904_v55 }
 0xc50   :  { %v3877_v27 = vpop.f32.mrf.mxu2 }
 0xc51   :  { %v3878_v26 = vadd.f32 %v5084_v5, %v3877_v27 }
 0xc53   :  { %v3893_v11 = vmax.f32 %v3878_v26, 0.0 }
 0xc58   :  { %v3879_v58 = vpop.f32.mrf.mxu2 }
 0xc59   :  { %v3880_v24 = vadd.f32 %v5084_v5, %v3879_v58 }
 0xc5b   :  { %v3894_v0 = vmax.f32 %v3880_v24, 0.0 }
 0xc5d   :  { %v3905_v57 = vpack.c.bf16 %v3894_v0, %v3893_v11 }
 0xc5f   :  { %4878 = vmatmul.msk.bf16.gmra.mxu3 %vm150_vm2, %v3905_v57 }
 0xc60   :  { %v3882_v12 = vpop.f32.mrf.mxu2 }
 0xc61   :  { %v3883_v62 = vadd.f32 %v5084_v5, %v3882_v12 }
 0xc63   :  { %v3895_v52 = vmax.f32 %v3883_v62, 0.0 }
 0xc67   :  { %v3945_v45 = vpop.f32.mrf.mxu3 }
 0xc68   :  { %v3884_v23 = vpop.f32.mrf.mxu2  ;;  %v3946_v30 = vadd.f32 %v5085_v22, %v3945_v45 }
 0xc69   :  { %v3885_v36 = vadd.f32 %v5084_v5, %v3884_v23 }
 0xc6a   :  { %v3970_v8 = vmax.f32 %v3946_v30, 0.0 }
 0xc6b   :  { %v3896_v29 = vmax.f32 %v3885_v36, 0.0 }
 0xc6d   :  { %v3906_v51 = vpack.c.bf16 %v3896_v29, %v3895_v52 }
 0xc6f   :  { %v3947_v46 = vpop.f32.mrf.mxu3  ;;  %4879 = vmatmul.msk.bf16.gmra.mxu3 %vm150_vm2, %v3906_v51 }
 0xc70   :  { %v3948_v1 = vadd.f32 %v5085_v22, %v3947_v46 }
 0xc72   :  { %v3971_v43 = vmax.f32 %v3948_v1, 0.0 }
 0xc74   :  { %v3984_v10 = vpack.c.bf16 %v3971_v43, %v3970_v8 }
 0xc76   :  { %4888 = vmatmul.msk.bf16.vlgmr.msra.gmra.mxu0 %vm150_vm2, %v3984_v10 }
 0xc77   :  { %v3950_v9 = vpop.f32.mrf.mxu3 }
 0xc78   :  { %v3951_v59 = vadd.f32 %v5085_v22, %v3950_v9 }
 0xc7a   :  { %v3972_v44 = vmax.f32 %v3951_v59, 0.0 }
 0xc7f   :  { %v3952_v61 = vpop.f32.mrf.mxu3 }
 0xc80   :  { %v3953_v40 = vadd.f32 %v5085_v22, %v3952_v61 }
 0xc82   :  { %v3973_v41 = vmax.f32 %v3953_v40, 0.0 }
 0xc84   :  { %v3985_v2 = vpack.c.bf16 %v3973_v41, %v3972_v44 }
 0xc86   :  { %4889 = vmatmul.msk.bf16.gmra.mxu0 %vm150_vm2, %v3985_v2 }
 0xc87   :  { %v3955_v39 = vpop.f32.mrf.mxu3 }
 0xc88   :  { %v3956_v17 = vadd.f32 %v5085_v22, %v3955_v39 }
 0xc8a   :  { %v3974_v32 = vmax.f32 %v3956_v17, 0.0 }
 0xc8f   :  { %v3957_v7 = vpop.f32.mrf.mxu3 }
 0xc90   :  { %v3958_v3 = vadd.f32 %v5085_v22, %v3957_v7 }
 0xc92   :  { %v3975_v42 = vmax.f32 %v3958_v3, 0.0 }
 0xc94   :  { %v3986_v16 = vpack.c.bf16 %v3975_v42, %v3974_v32 }
 0xc96   :  { %4890 = vmatmul.msk.bf16.gmra.mxu0 %vm150_vm2, %v3986_v16 }
 0xce2   :  { %v3960_v63 = vpop.f32.mrf.mxu3 }
 0xce3   :  { %v3961_v56 = vadd.f32 %v5085_v22, %v3960_v63 }
 0xce5   :  { %v3976_v25 = vmax.f32 %v3961_v56, 0.0 }
 0xcea   :  { %v3962_v5 = vpop.f32.mrf.mxu3 }
 0xceb   :  { %v3963_v35 = vadd.f32 %v5085_v22, %v3962_v5 }
 0xced   :  { %v3977_v60 = vmax.f32 %v3963_v35, 0.0 }
 0xcef   :  { %v3987_v48 = vpack.c.bf16 %v3977_v60, %v3976_v25 }
 0xcf1   :  { %4891 = vmatmul.msk.bf16.gmra.mxu0 %vm150_vm2, %v3987_v48 }
 0xcf2   :  { %v3965_v38 = vpop.f32.mrf.mxu3 }
 0xcf3   :  { %v4029_v15 = vpop.f32.mrf.mxu0  ;;  %v3966_v33 = vadd.f32 %v5085_v22, %v3965_v38 }
 0xcf4   :  { %v4030_v31 = vadd.f32 %v5086_v13, %v4029_v15 }
 0xcf5   :  { %v3978_v18 = vmax.f32 %v3966_v33, 0.0 }
 0xcf6   :  { %4054 = vst [vmem:[%s7242_s13] sm:$0xff] %v4030_v31 }
 0xcfa   :  { %v3967_v54 = vpop.f32.mrf.mxu3 }
 0xcfb   :  { %v3968_v34 = vadd.f32 %v5085_v22, %v3967_v54  ;;  %v4031_v20 = vpop.f32.mrf.mxu0 }
 0xcfc   :  { %v4032_v49 = vadd.f32 %v5086_v13, %v4031_v20 }
 0xcfd   :  { %v3979_v47 = vmax.f32 %v3968_v34, 0.0 }
 0xcfe   :  { %4055 = vst [vmem:[%s7242_s13 + $0x8] sm:$0xff] %v4032_v49 }
 0xcff   :  { %v3988_v19 = vpack.c.bf16 %v3979_v47, %v3978_v18 }
 0xd01   :  { %4892 = vmatmul.msk.bf16.gmra.mxu0 %vm150_vm2, %v3988_v19 }
 0xd03   :  { %v4034_v50 = vpop.f32.mrf.mxu0 }
 0xd04   :  { %v4035_v4 = vadd.f32 %v5086_v13, %v4034_v50 }
 0xd06   :  { %4056 = vst [vmem:[%s7242_s13 + $0x10] sm:$0xff] %v4035_v4 }
 0xd0b   :  { %v4036_v21 = vpop.f32.mrf.mxu0 }
 0xd0c   :  { %v4037_v28 = vadd.f32 %v5086_v13, %v4036_v21 }
 0xd0e   :  { %4057 = vst [vmem:[%s7242_s13 + $0x18] sm:$0xff] %v4037_v28 }
 0xd13   :  { %v4039_v37 = vpop.f32.mrf.mxu0 }
 0xd14   :  { %v4040_v6 = vadd.f32 %v5086_v13, %v4039_v37 }
 0xd16   :  { %4058 = vst [vmem:[%s7242_s13 + $0x20] sm:$0xff] %v4040_v6 }
 0xd1b   :  { %v4041_v55 = vpop.f32.mrf.mxu0 }
 0xd1c   :  { %v4042_v53 = vadd.f32 %v5086_v13, %v4041_v55 }
 0xd1e   :  { %4059 = vst [vmem:[%s7242_s13 + $0x28] sm:$0xff] %v4042_v53 }
 0xd6e   :  { %v4044_v27 = vpop.f32.mrf.mxu0 }
 0xd6f   :  { %v4045_v14 = vadd.f32 %v5086_v13, %v4044_v27 }
 0xd71   :  { %4060 = vst [vmem:[%s7242_s13 + $0x30] sm:$0xff] %v4045_v14 }
 0xd76   :  { %v4046_v26 = vpop.f32.mrf.mxu0 }
 0xd77   :  { %v4047_v58 = vadd.f32 %v5086_v13, %v4046_v26 }
 0xd79   :  { %4061 = vst [vmem:[%s7242_s13 + $0x38] sm:$0xff] %v4047_v58 }
 0xd7e   :  { %v4049_v24 = vpop.f32.mrf.mxu0 }
 0xd7f   :  { %v4050_v11 = vadd.f32 %v5086_v13, %v4049_v24 }
 0xd81   :  { %4062 = vst [vmem:[%s7242_s13 + $0x40] sm:$0xff] %v4050_v11 }
 0xd86   :  { %v4051_v0 = vpop.f32.mrf.mxu0 }
 0xd87   :  { %v4052_v57 = vadd.f32 %v5086_v13, %v4051_v0 }
 0xd89   :  { %4063 = vst [vmem:[%s7242_s13 + $0x48] sm:$0xff] %v4052_v57 }

</bundles_post_ra>
